<compile_context>
chip_gen: v7x
topology: tpu7x:2x2x1
jax: 0.10.0
libtpu: 0.0.40
codegen_flags: <defaults>
</compile_context>

<pallas_src>
import functools

import jax
import jax.numpy as jnp
import numpy as np
from jax.experimental import pallas as pl
from jax.experimental.pallas import tpu as pltpu

# ---------------- small config (consistent with the module structure) --------
VOCAB = 65            # vocab_size = len(chars)
VOCAB_PAD = 128       # lane-dense padded lm_head width
N_EMBED = 64          # n_embed (384 in the original, shrunk for the demo)
N_HEAD = 4            # n_head
HEAD_SIZE = N_EMBED // N_HEAD
N_LAYER = 2           # n_layer
BLOCK_SIZE = 16       # block_size (max context)
B = 2
T = 16                # sequence length used (<= BLOCK_SIZE)
LN_EPS = 1e-5         # torch.nn.LayerNorm default
NEG_INF = -1e30       # finite mask value (avoids exp(-inf - (-inf)) NaNs)


def _layer_norm(x, w, b):
    mu = jnp.mean(x, axis=-1, keepdims=True)
    var = jnp.mean((x - mu) ** 2, axis=-1, keepdims=True)
    return (x - mu) * jax.lax.rsqrt(var + LN_EPS) * w + b


def _bf16_dot(a, b):
    """MXU matmul: bf16 operands, f32 accumulation."""
    return jnp.dot(a.astype(jnp.bfloat16), b.astype(jnp.bfloat16),
                   preferred_element_type=jnp.float32)


def gpt_kernel(x_ref,
               ln1w_ref, ln1b_ref, wqkv_ref, wproj_ref, bproj_ref,
               ln2w_ref, ln2b_ref, w1_ref, b1_ref, w2_ref, b2_ref,
               lnfw_ref, lnfb_ref, wf1_ref, bf1_ref, wf2_ref, bf2_ref,
               wlm_ref, blm_ref,
               out_ref, *, batch, seq_len):
    C = N_EMBED
    hs = HEAD_SIZE
    xf = x_ref[...]                                   # (B*T, C) f32

    # Additive causal mask, built once and reused by every layer / head.
    row = jax.lax.broadcasted_iota(jnp.int32, (seq_len, seq_len), 0)
    col = jax.lax.broadcasted_iota(jnp.int32, (seq_len, seq_len), 1)
    mask_bias = jnp.where(row >= col, 0.0, NEG_INF).astype(jnp.float32)

    for l in range(N_LAYER):
        # -------- multi-head causal self-attention (pre-LN) -------------------
        h = _layer_norm(xf, ln1w_ref[l], ln1b_ref[l])          # (B*T, C) f32
        # Fused QKV: one (B*T, C) x (C, 3C) matmul; Wq pre-scaled by C**-0.5.
        qkv = _bf16_dot(h, wqkv_ref[l])                        # (B*T, 3C) f32

        sa_rows = []
        for b in range(batch):
            qkv_b = qkv[b * seq_len:(b + 1) * seq_len]         # (T, 3C) static
            heads = []
            for hh in range(N_HEAD):
                qh = qkv_b[:, hh * hs:(hh + 1) * hs]
                kh = qkv_b[:, C + hh * hs:C + (hh + 1) * hs]
                vh = qkv_b[:, 2 * C + hh * hs:2 * C + (hh + 1) * hs]
                wei = jax.lax.dot_general(                     # q @ k^T  (T, T)
                    qh.astype(jnp.bfloat16), kh.astype(jnp.bfloat16),
                    (((1,), (1,)), ((), ())),
                    preferred_element_type=jnp.float32)
                wei = wei + mask_bias
                m = jnp.max(wei, axis=-1, keepdims=True)
                e = jnp.exp(wei - m)
                p = e * pl.reciprocal(jnp.sum(e, axis=-1, keepdims=True),
                                      approx=True)
                heads.append(_bf16_dot(p, vh))                 # (T, hs)
            sa_rows.append(jnp.concatenate(heads, axis=-1))    # (T, C)
        head_cat = jnp.concatenate(sa_rows, axis=0)            # (B*T, C)

        # Single concat-heads output projection (K = C).
        sa = _bf16_dot(head_cat, wproj_ref[l]) + bproj_ref[l]
        xf = xf + sa                                           # residual

        # -------- feed-forward (pre-LN) ---------------------------------------
        h2 = _layer_norm(xf, ln2w_ref[l], ln2b_ref[l])
        ff = jnp.maximum(_bf16_dot(h2, w1_ref[l]) + b1_ref[l], 0.0)
        ff = _bf16_dot(ff, w2_ref[l]) + b2_ref[l]
        xf = xf + ff                                           # residual

    # -------- ln_f -> extra FeedForward -> lm_head (padded to 128 lanes) ------
    xf = _layer_norm(xf, lnfw_ref[...], lnfb_ref[...])
    ff = jnp.maximum(_bf16_dot(xf, wf1_ref[...]) + bf1_ref[...], 0.0)
    xf = _bf16_dot(ff, wf2_ref[...]) + bf2_ref[...]
    logits = _bf16_dot(xf, wlm_ref[...]) + blm_ref[...]        # (B*T, 128)
    out_ref[...] = logits


KERNEL_PARAM_ORDER = ["ln1w", "ln1b", "wqkv", "wproj", "bproj",
                      "ln2w", "ln2b", "w1", "b1", "w2", "b2",
                      "lnfw", "lnfb", "wf1", "bf1", "wf2", "bf2",
                      "wlm", "blm"]


def prepare_kernel_params(p):
    """Convert torch-layout f32 params into the kernel layout: fused/lane-dense
    bf16 matmul weights, attention scale folded into Wq, lm_head padded to 128."""
    L, C, H, hs = N_LAYER, N_EMBED, N_HEAD, HEAD_SIZE
    scale = C ** -0.5

    def heads_to_cols(w):                      # (L, H, C, hs) -> (L, C, H*hs)
        return jnp.transpose(w, (0, 2, 1, 3)).reshape(L, C, H * hs)

    kp = {}
    wq = heads_to_cols(p["wq"]) * scale        # fold scale into Wq
    wk = heads_to_cols(p["wk"])
    wv = heads_to_cols(p["wv"])
    kp["wqkv"] = jnp.concatenate([wq, wk, wv], axis=-1).astype(jnp.bfloat16)
    kp["wproj"] = p["wproj"].reshape(L, H * hs, C).astype(jnp.bfloat16)
    for k in ("ln1w", "ln1b", "bproj", "ln2w", "ln2b", "b1", "b2",
              "lnfw", "lnfb", "bf1", "bf2"):
        kp[k] = p[k]                           # keep f32 (VPU math)
    for k in ("w1", "w2", "wf1", "wf2"):
        kp[k] = p[k].astype(jnp.bfloat16)
    kp["wlm"] = jnp.zeros((C, VOCAB_PAD), jnp.bfloat16).at[:, :VOCAB].set(
        p["wlm"].astype(jnp.bfloat16))
    kp["blm"] = jnp.zeros((1, VOCAB_PAD), jnp.float32).at[:, :VOCAB].set(p["blm"])
    return kp


def model_forward(idx, params):
    """Full forward pass (eval mode, targets=None). The embedding gather is
    glue done in plain JAX; all other compute runs inside one Pallas kernel."""
    Bc, Tc = idx.shape
    tok_emb = params["tok_emb"][idx]                 # (B, T, C)
    pos_emb = params["pos_emb"][:Tc]                 # (T, C)
    x0 = (tok_emb + pos_emb).astype(jnp.float32).reshape(Bc * Tc, N_EMBED)

    kparams = prepare_kernel_params(params)
    weights = [kparams[k] for k in KERNEL_PARAM_ORDER]

    # No grid: whole problem (B*T=32 rows) in one kernel body, everything
    # resident in VMEM (tiny at this size).
    logits = pl.pallas_call(
        functools.partial(gpt_kernel, batch=Bc, seq_len=Tc),
        out_shape=jax.ShapeDtypeStruct((Bc * Tc, VOCAB_PAD), jnp.float32),
        compiler_params=pltpu.CompilerParams(vmem_limit_bytes=32 * 1024 * 1024),
    )(x0, *weights)

    return logits.reshape(Bc, Tc, VOCAB_PAD)[:, :, :VOCAB]


def init_params(key):
    """Torch-like layout, f32 (single source of truth; kernel layout derived)."""
    ks = iter(jax.random.split(key, 32))

    def nrm(shape):
        return jax.random.normal(next(ks), shape, jnp.float32) * 0.02

    L, C, H, hs, H4 = N_LAYER, N_EMBED, N_HEAD, HEAD_SIZE, 4 * N_EMBED
    p = {}
    p["tok_emb"] = nrm((VOCAB, C))
    p["pos_emb"] = nrm((BLOCK_SIZE, C))
    p["ln1w"] = jnp.ones((L, 1, C), jnp.float32)
    p["ln1b"] = jnp.zeros((L, 1, C), jnp.float32)
    p["wq"] = nrm((L, H, C, hs))
    p["wk"] = nrm((L, H, C, hs))
    p["wv"] = nrm((L, H, C, hs))
    p["wproj"] = nrm((L, H, hs, C))
    p["bproj"] = nrm((L, 1, C))
    p["ln2w"] = jnp.ones((L, 1, C), jnp.float32)
    p["ln2b"] = jnp.zeros((L, 1, C), jnp.float32)
    p["w1"] = nrm((L, C, H4))
    p["b1"] = nrm((L, 1, H4))
    p["w2"] = nrm((L, H4, C))
    p["b2"] = nrm((L, 1, C))
    p["lnfw"] = jnp.ones((1, C), jnp.float32)
    p["lnfb"] = jnp.zeros((1, C), jnp.float32)
    p["wf1"] = nrm((C, H4))
    p["bf1"] = nrm((1, H4))
    p["wf2"] = nrm((H4, C))
    p["bf2"] = nrm((1, C))
    p["wlm"] = nrm((C, VOCAB))
    p["blm"] = nrm((1, VOCAB))
    return p


def reference_forward(idx, params):
    """Pure-JAX f32 reference mirroring the PyTorch forward (eval mode)."""
    def ln(x, w, b):
        mu = jnp.mean(x, axis=-1, keepdims=True)
        var = jnp.mean((x - mu) ** 2, axis=-1, keepdims=True)
        return (x - mu) * jax.lax.rsqrt(var + LN_EPS) * w + b

    Bc, Tc = idx.shape
    x = params["tok_emb"][idx] + params["pos_emb"][:Tc]
    scale = N_EMBED ** -0.5
    mask = jnp.tril(jnp.ones((Tc, Tc), bool))
    for l in range(N_LAYER):
        h = ln(x, params["ln1w"][l, 0], params["ln1b"][l, 0])
        q = jnp.einsum("btc,hcd->bthd", h, params["wq"][l])
        k = jnp.einsum("btc,hcd->bthd", h, params["wk"][l])
        v = jnp.einsum("btc,hcd->bthd", h, params["wv"][l])
        wei = jnp.einsum("bthd,bshd->bhts", q, k) * scale
        wei = jnp.where(mask[None, None], wei, -jnp.inf)
        wei = jax.nn.softmax(wei, axis=-1)
        o = jnp.einsum("bhts,bshd->bthd", wei, v)
        sa = jnp.einsum("bthd,hdc->btc", o, params["wproj"][l]) + params["bproj"][l, 0]
        x = x + sa
        h2 = ln(x, params["ln2w"][l, 0], params["ln2b"][l, 0])
        ff = jax.nn.relu(h2 @ params["w1"][l] + params["b1"][l, 0]) @ params["w2"][l] \
            + params["b2"][l, 0]
        x = x + ff
    x = ln(x, params["lnfw"][0], params["lnfb"][0])
    x = jax.nn.relu(x @ params["wf1"] + params["bf1"][0]) @ params["wf2"] + params["bf2"][0]
    return x @ params["wlm"] + params["blm"][0]


if __name__ == "__main__":
    key = jax.random.PRNGKey(0)
    kparam, kidx = jax.random.split(key)
    params = init_params(kparam)
    idx = jax.random.randint(kidx, (B, T), 0, VOCAB, dtype=jnp.int32)

    logits = model_forward(idx, params)
    logits = jax.block_until_ready(logits)

    ref = reference_forward(idx, params)
    # bf16 MXU operands (f32 accumulation) + approx reciprocal -> looser tol.
    np.testing.assert_allclose(np.asarray(logits), np.asarray(ref),
                               rtol=5e-2, atol=5e-3)
    print("KERNEL_OK")
</pallas_src>

<mosaic_0001>
module attributes {stable_mosaic.version = 11 : i64} {
  func.func @gpt_kernel(%arg0: memref<32x64xf32, #tpu.memory_space<vmem>>, %arg1: memref<2x1x64xf32, #tpu.memory_space<vmem>>, %arg2: memref<2x1x64xf32, #tpu.memory_space<vmem>>, %arg3: memref<2x64x192xbf16, #tpu.memory_space<vmem>>, %arg4: memref<2x64x64xbf16, #tpu.memory_space<vmem>>, %arg5: memref<2x1x64xf32, #tpu.memory_space<vmem>>, %arg6: memref<2x1x64xf32, #tpu.memory_space<vmem>>, %arg7: memref<2x1x64xf32, #tpu.memory_space<vmem>>, %arg8: memref<2x64x256xbf16, #tpu.memory_space<vmem>>, %arg9: memref<2x1x256xf32, #tpu.memory_space<vmem>>, %arg10: memref<2x256x64xbf16, #tpu.memory_space<vmem>>, %arg11: memref<2x1x64xf32, #tpu.memory_space<vmem>>, %arg12: memref<1x64xf32, #tpu.memory_space<vmem>>, %arg13: memref<1x64xf32, #tpu.memory_space<vmem>>, %arg14: memref<64x256xbf16, #tpu.memory_space<vmem>>, %arg15: memref<1x256xf32, #tpu.memory_space<vmem>>, %arg16: memref<256x64xbf16, #tpu.memory_space<vmem>>, %arg17: memref<1x64xf32, #tpu.memory_space<vmem>>, %arg18: memref<64x128xbf16, #tpu.memory_space<vmem>>, %arg19: memref<1x128xf32, #tpu.memory_space<vmem>>, %arg20: memref<32x128xf32, #tpu.memory_space<vmem>>) attributes {dimension_semantics = [], scalar_prefetch = 0 : i64, scratch_operands = 0 : i64, tpu.core_type = #tpu.core_type<tc>} {
    %c0 = arith.constant 0 : index
    %c0_0 = arith.constant 0 : index
    %0 = vector.load %arg0[%c0, %c0_0] : memref<32x64xf32, #tpu.memory_space<vmem>>, vector<32x64xf32>
    %1 = tpu.iota {dimensions = array<i32: 0>} : vector<16x16xi32>
    %2 = tpu.iota {dimensions = array<i32: 1>} : vector<16x16xi32>
    %3 = arith.cmpi sge, %1, %2 : vector<16x16xi32>
    %cst = arith.constant 0.000000e+00 : f32
    %cst_1 = arith.constant -1.000000e+30 : f32
    %4 = vector.broadcast %cst : f32 to vector<16x16xf32>
    %5 = vector.broadcast %cst_1 : f32 to vector<16x16xf32>
    %6 = arith.select %3, %4, %5 : vector<16x16xi1>, vector<16x16xf32>
    %c0_2 = arith.constant 0 : index
    %c0_3 = arith.constant 0 : index
    %c0_4 = arith.constant 0 : index
    %7 = vector.load %arg1[%c0_2, %c0_3, %c0_4] : memref<2x1x64xf32, #tpu.memory_space<vmem>>, vector<1x1x64xf32>
    %8 = vector.shape_cast %7 : vector<1x1x64xf32> to vector<1x64xf32>
    %c0_5 = arith.constant 0 : index
    %c0_6 = arith.constant 0 : index
    %c0_7 = arith.constant 0 : index
    %9 = vector.load %arg2[%c0_5, %c0_6, %c0_7] : memref<2x1x64xf32, #tpu.memory_space<vmem>>, vector<1x1x64xf32>
    %10 = vector.shape_cast %9 : vector<1x1x64xf32> to vector<1x64xf32>
    %cst_8 = arith.constant dense<0.000000e+00> : vector<32xf32>
    %11 = vector.multi_reduction <add>, %0, %cst_8 [1] : vector<32x64xf32> to vector<32xf32>
    %12 = vector.shape_cast %11 : vector<32xf32> to vector<32x1xf32>
    %cst_9 = arith.constant 6.400000e+01 : f32
    %13 = vector.broadcast %cst_9 : f32 to vector<32x1xf32>
    %14 = arith.divf %12, %13 : vector<32x1xf32>
    %15 = vector.broadcast %14 : vector<32x1xf32> to vector<32x64xf32>
    %16 = arith.subf %0, %15 : vector<32x64xf32>
    %17 = arith.mulf %16, %16 : vector<32x64xf32>
    %cst_10 = arith.constant dense<0.000000e+00> : vector<32xf32>
    %18 = vector.multi_reduction <add>, %17, %cst_10 [1] : vector<32x64xf32> to vector<32xf32>
    %19 = vector.shape_cast %18 : vector<32xf32> to vector<32x1xf32>
    %cst_11 = arith.constant 6.400000e+01 : f32
    %20 = vector.broadcast %cst_11 : f32 to vector<32x1xf32>
    %21 = arith.divf %19, %20 : vector<32x1xf32>
    %22 = vector.broadcast %14 : vector<32x1xf32> to vector<32x64xf32>
    %23 = arith.subf %0, %22 : vector<32x64xf32>
    %cst_12 = arith.constant 9.99999974E-6 : f32
    %24 = vector.broadcast %cst_12 : f32 to vector<32x1xf32>
    %25 = arith.addf %21, %24 : vector<32x1xf32>
    %26 = math.rsqrt %25 : vector<32x1xf32>
    %27 = vector.broadcast %26 : vector<32x1xf32> to vector<32x64xf32>
    %28 = arith.mulf %23, %27 : vector<32x64xf32>
    %29 = vector.broadcast %8 : vector<1x64xf32> to vector<32x64xf32>
    %30 = arith.mulf %28, %29 : vector<32x64xf32>
    %31 = vector.broadcast %10 : vector<1x64xf32> to vector<32x64xf32>
    %32 = arith.addf %30, %31 : vector<32x64xf32>
    %c0_13 = arith.constant 0 : index
    %c0_14 = arith.constant 0 : index
    %c0_15 = arith.constant 0 : index
    %33 = vector.load %arg3[%c0_13, %c0_14, %c0_15] : memref<2x64x192xbf16, #tpu.memory_space<vmem>>, vector<1x64x192xbf16>
    %34 = vector.shape_cast %33 : vector<1x64x192xbf16> to vector<64x192xbf16>
    %35 = arith.truncf %32 : vector<32x64xf32> to vector<32x64xbf16>
    %cst_16 = arith.constant dense<0.000000e+00> : vector<32x192xf32>
    %36 = tpu.matmul %35, %34, %cst_16 {dimension_numbers = #tpu.dot_dimension_numbers<[1], [0], [0], [1], [0, 0, 1, 1], [], []>} : vector<32x64xbf16>, vector<64x192xbf16>, vector<32x192xf32> -> vector<32x192xf32>
    %37 = vector.extract_strided_slice %36 {offsets = [0, 0], sizes = [16, 192], strides = [1, 1]} : vector<32x192xf32> to vector<16x192xf32>
    %38 = vector.extract_strided_slice %37 {offsets = [0, 0], sizes = [16, 16], strides = [1, 1]} : vector<16x192xf32> to vector<16x16xf32>
    %39 = vector.extract_strided_slice %37 {offsets = [0, 64], sizes = [16, 16], strides = [1, 1]} : vector<16x192xf32> to vector<16x16xf32>
    %40 = vector.extract_strided_slice %37 {offsets = [0, 128], sizes = [16, 16], strides = [1, 1]} : vector<16x192xf32> to vector<16x16xf32>
    %41 = arith.truncf %38 : vector<16x16xf32> to vector<16x16xbf16>
    %42 = arith.truncf %39 : vector<16x16xf32> to vector<16x16xbf16>
    %cst_17 = arith.constant dense<0.000000e+00> : vector<16x16xf32>
    %43 = tpu.matmul %41, %42, %cst_17 {dimension_numbers = #tpu.dot_dimension_numbers<[1], [1], [0], [0], [0, 0, 1, 0], [], []>} : vector<16x16xbf16>, vector<16x16xbf16>, vector<16x16xf32> -> vector<16x16xf32>
    %44 = arith.addf %43, %6 : vector<16x16xf32>
    %cst_18 = arith.constant dense<0xFF800000> : vector<16xf32>
    %45 = vector.multi_reduction <maximumf>, %44, %cst_18 [1] : vector<16x16xf32> to vector<16xf32>
    %46 = vector.shape_cast %45 : vector<16xf32> to vector<16x1xf32>
    %47 = vector.broadcast %46 : vector<16x1xf32> to vector<16x16xf32>
    %48 = arith.subf %44, %47 : vector<16x16xf32>
    %49 = math.exp %48 : vector<16x16xf32>
    %cst_19 = arith.constant dense<0.000000e+00> : vector<16xf32>
    %50 = vector.multi_reduction <add>, %49, %cst_19 [1] : vector<16x16xf32> to vector<16xf32>
    %51 = vector.shape_cast %50 : vector<16xf32> to vector<16x1xf32>
    %52 = tpu.reciprocal %51 {approx = true} : vector<16x1xf32> -> vector<16x1xf32>
    %53 = vector.broadcast %52 : vector<16x1xf32> to vector<16x16xf32>
    %54 = arith.mulf %49, %53 : vector<16x16xf32>
    %55 = arith.truncf %54 : vector<16x16xf32> to vector<16x16xbf16>
    %56 = arith.truncf %40 : vector<16x16xf32> to vector<16x16xbf16>
    %cst_20 = arith.constant dense<0.000000e+00> : vector<16x16xf32>
    %57 = tpu.matmul %55, %56, %cst_20 {dimension_numbers = #tpu.dot_dimension_numbers<[1], [0], [0], [1], [0, 0, 1, 1], [], []>} : vector<16x16xbf16>, vector<16x16xbf16>, vector<16x16xf32> -> vector<16x16xf32>
    %58 = vector.extract_strided_slice %37 {offsets = [0, 16], sizes = [16, 16], strides = [1, 1]} : vector<16x192xf32> to vector<16x16xf32>
    %59 = vector.extract_strided_slice %37 {offsets = [0, 80], sizes = [16, 16], strides = [1, 1]} : vector<16x192xf32> to vector<16x16xf32>
    %60 = vector.extract_strided_slice %37 {offsets = [0, 144], sizes = [16, 16], strides = [1, 1]} : vector<16x192xf32> to vector<16x16xf32>
    %61 = arith.truncf %58 : vector<16x16xf32> to vector<16x16xbf16>
    %62 = arith.truncf %59 : vector<16x16xf32> to vector<16x16xbf16>
    %cst_21 = arith.constant dense<0.000000e+00> : vector<16x16xf32>
    %63 = tpu.matmul %61, %62, %cst_21 {dimension_numbers = #tpu.dot_dimension_numbers<[1], [1], [0], [0], [0, 0, 1, 0], [], []>} : vector<16x16xbf16>, vector<16x16xbf16>, vector<16x16xf32> -> vector<16x16xf32>
    %64 = arith.addf %63, %6 : vector<16x16xf32>
    %cst_22 = arith.constant dense<0xFF800000> : vector<16xf32>
    %65 = vector.multi_reduction <maximumf>, %64, %cst_22 [1] : vector<16x16xf32> to vector<16xf32>
    %66 = vector.shape_cast %65 : vector<16xf32> to vector<16x1xf32>
    %67 = vector.broadcast %66 : vector<16x1xf32> to vector<16x16xf32>
    %68 = arith.subf %64, %67 : vector<16x16xf32>
    %69 = math.exp %68 : vector<16x16xf32>
    %cst_23 = arith.constant dense<0.000000e+00> : vector<16xf32>
    %70 = vector.multi_reduction <add>, %69, %cst_23 [1] : vector<16x16xf32> to vector<16xf32>
    %71 = vector.shape_cast %70 : vector<16xf32> to vector<16x1xf32>
    %72 = tpu.reciprocal %71 {approx = true} : vector<16x1xf32> -> vector<16x1xf32>
    %73 = vector.broadcast %72 : vector<16x1xf32> to vector<16x16xf32>
    %74 = arith.mulf %69, %73 : vector<16x16xf32>
    %75 = arith.truncf %74 : vector<16x16xf32> to vector<16x16xbf16>
    %76 = arith.truncf %60 : vector<16x16xf32> to vector<16x16xbf16>
    %cst_24 = arith.constant dense<0.000000e+00> : vector<16x16xf32>
    %77 = tpu.matmul %75, %76, %cst_24 {dimension_numbers = #tpu.dot_dimension_numbers<[1], [0], [0], [1], [0, 0, 1, 1], [], []>} : vector<16x16xbf16>, vector<16x16xbf16>, vector<16x16xf32> -> vector<16x16xf32>
    %78 = vector.extract_strided_slice %37 {offsets = [0, 32], sizes = [16, 16], strides = [1, 1]} : vector<16x192xf32> to vector<16x16xf32>
    %79 = vector.extract_strided_slice %37 {offsets = [0, 96], sizes = [16, 16], strides = [1, 1]} : vector<16x192xf32> to vector<16x16xf32>
    %80 = vector.extract_strided_slice %37 {offsets = [0, 160], sizes = [16, 16], strides = [1, 1]} : vector<16x192xf32> to vector<16x16xf32>
    %81 = arith.truncf %78 : vector<16x16xf32> to vector<16x16xbf16>
    %82 = arith.truncf %79 : vector<16x16xf32> to vector<16x16xbf16>
    %cst_25 = arith.constant dense<0.000000e+00> : vector<16x16xf32>
    %83 = tpu.matmul %81, %82, %cst_25 {dimension_numbers = #tpu.dot_dimension_numbers<[1], [1], [0], [0], [0, 0, 1, 0], [], []>} : vector<16x16xbf16>, vector<16x16xbf16>, vector<16x16xf32> -> vector<16x16xf32>
    %84 = arith.addf %83, %6 : vector<16x16xf32>
    %cst_26 = arith.constant dense<0xFF800000> : vector<16xf32>
    %85 = vector.multi_reduction <maximumf>, %84, %cst_26 [1] : vector<16x16xf32> to vector<16xf32>
    %86 = vector.shape_cast %85 : vector<16xf32> to vector<16x1xf32>
    %87 = vector.broadcast %86 : vector<16x1xf32> to vector<16x16xf32>
    %88 = arith.subf %84, %87 : vector<16x16xf32>
    %89 = math.exp %88 : vector<16x16xf32>
    %cst_27 = arith.constant dense<0.000000e+00> : vector<16xf32>
    %90 = vector.multi_reduction <add>, %89, %cst_27 [1] : vector<16x16xf32> to vector<16xf32>
    %91 = vector.shape_cast %90 : vector<16xf32> to vector<16x1xf32>
    %92 = tpu.reciprocal %91 {approx = true} : vector<16x1xf32> -> vector<16x1xf32>
    %93 = vector.broadcast %92 : vector<16x1xf32> to vector<16x16xf32>
    %94 = arith.mulf %89, %93 : vector<16x16xf32>
    %95 = arith.truncf %94 : vector<16x16xf32> to vector<16x16xbf16>
    %96 = arith.truncf %80 : vector<16x16xf32> to vector<16x16xbf16>
    %cst_28 = arith.constant dense<0.000000e+00> : vector<16x16xf32>
    %97 = tpu.matmul %95, %96, %cst_28 {dimension_numbers = #tpu.dot_dimension_numbers<[1], [0], [0], [1], [0, 0, 1, 1], [], []>} : vector<16x16xbf16>, vector<16x16xbf16>, vector<16x16xf32> -> vector<16x16xf32>
    %98 = vector.extract_strided_slice %37 {offsets = [0, 48], sizes = [16, 16], strides = [1, 1]} : vector<16x192xf32> to vector<16x16xf32>
    %99 = vector.extract_strided_slice %37 {offsets = [0, 112], sizes = [16, 16], strides = [1, 1]} : vector<16x192xf32> to vector<16x16xf32>
    %100 = vector.extract_strided_slice %37 {offsets = [0, 176], sizes = [16, 16], strides = [1, 1]} : vector<16x192xf32> to vector<16x16xf32>
    %101 = arith.truncf %98 : vector<16x16xf32> to vector<16x16xbf16>
    %102 = arith.truncf %99 : vector<16x16xf32> to vector<16x16xbf16>
    %cst_29 = arith.constant dense<0.000000e+00> : vector<16x16xf32>
    %103 = tpu.matmul %101, %102, %cst_29 {dimension_numbers = #tpu.dot_dimension_numbers<[1], [1], [0], [0], [0, 0, 1, 0], [], []>} : vector<16x16xbf16>, vector<16x16xbf16>, vector<16x16xf32> -> vector<16x16xf32>
    %104 = arith.addf %103, %6 : vector<16x16xf32>
    %cst_30 = arith.constant dense<0xFF800000> : vector<16xf32>
    %105 = vector.multi_reduction <maximumf>, %104, %cst_30 [1] : vector<16x16xf32> to vector<16xf32>
    %106 = vector.shape_cast %105 : vector<16xf32> to vector<16x1xf32>
    %107 = vector.broadcast %106 : vector<16x1xf32> to vector<16x16xf32>
    %108 = arith.subf %104, %107 : vector<16x16xf32>
    %109 = math.exp %108 : vector<16x16xf32>
    %cst_31 = arith.constant dense<0.000000e+00> : vector<16xf32>
    %110 = vector.multi_reduction <add>, %109, %cst_31 [1] : vector<16x16xf32> to vector<16xf32>
    %111 = vector.shape_cast %110 : vector<16xf32> to vector<16x1xf32>
    %112 = tpu.reciprocal %111 {approx = true} : vector<16x1xf32> -> vector<16x1xf32>
    %113 = vector.broadcast %112 : vector<16x1xf32> to vector<16x16xf32>
    %114 = arith.mulf %109, %113 : vector<16x16xf32>
    %115 = arith.truncf %114 : vector<16x16xf32> to vector<16x16xbf16>
    %116 = arith.truncf %100 : vector<16x16xf32> to vector<16x16xbf16>
    %cst_32 = arith.constant dense<0.000000e+00> : vector<16x16xf32>
    %117 = tpu.matmul %115, %116, %cst_32 {dimension_numbers = #tpu.dot_dimension_numbers<[1], [0], [0], [1], [0, 0, 1, 1], [], []>} : vector<16x16xbf16>, vector<16x16xbf16>, vector<16x16xf32> -> vector<16x16xf32>
    %118 = tpu.concatenate %57, %77, %97, %117 in 1 : vector<16x16xf32>, vector<16x16xf32>, vector<16x16xf32>, vector<16x16xf32> -> vector<16x64xf32>
    %119 = vector.extract_strided_slice %36 {offsets = [16, 0], sizes = [16, 192], strides = [1, 1]} : vector<32x192xf32> to vector<16x192xf32>
    %120 = vector.extract_strided_slice %119 {offsets = [0, 0], sizes = [16, 16], strides = [1, 1]} : vector<16x192xf32> to vector<16x16xf32>
    %121 = vector.extract_strided_slice %119 {offsets = [0, 64], sizes = [16, 16], strides = [1, 1]} : vector<16x192xf32> to vector<16x16xf32>
    %122 = vector.extract_strided_slice %119 {offsets = [0, 128], sizes = [16, 16], strides = [1, 1]} : vector<16x192xf32> to vector<16x16xf32>
    %123 = arith.truncf %120 : vector<16x16xf32> to vector<16x16xbf16>
    %124 = arith.truncf %121 : vector<16x16xf32> to vector<16x16xbf16>
    %cst_33 = arith.constant dense<0.000000e+00> : vector<16x16xf32>
    %125 = tpu.matmul %123, %124, %cst_33 {dimension_numbers = #tpu.dot_dimension_numbers<[1], [1], [0], [0], [0, 0, 1, 0], [], []>} : vector<16x16xbf16>, vector<16x16xbf16>, vector<16x16xf32> -> vector<16x16xf32>
    %126 = arith.addf %125, %6 : vector<16x16xf32>
    %cst_34 = arith.constant dense<0xFF800000> : vector<16xf32>
    %127 = vector.multi_reduction <maximumf>, %126, %cst_34 [1] : vector<16x16xf32> to vector<16xf32>
    %128 = vector.shape_cast %127 : vector<16xf32> to vector<16x1xf32>
    %129 = vector.broadcast %128 : vector<16x1xf32> to vector<16x16xf32>
    %130 = arith.subf %126, %129 : vector<16x16xf32>
    %131 = math.exp %130 : vector<16x16xf32>
    %cst_35 = arith.constant dense<0.000000e+00> : vector<16xf32>
    %132 = vector.multi_reduction <add>, %131, %cst_35 [1] : vector<16x16xf32> to vector<16xf32>
    %133 = vector.shape_cast %132 : vector<16xf32> to vector<16x1xf32>
    %134 = tpu.reciprocal %133 {approx = true} : vector<16x1xf32> -> vector<16x1xf32>
    %135 = vector.broadcast %134 : vector<16x1xf32> to vector<16x16xf32>
    %136 = arith.mulf %131, %135 : vector<16x16xf32>
    %137 = arith.truncf %136 : vector<16x16xf32> to vector<16x16xbf16>
    %138 = arith.truncf %122 : vector<16x16xf32> to vector<16x16xbf16>
    %cst_36 = arith.constant dense<0.000000e+00> : vector<16x16xf32>
    %139 = tpu.matmul %137, %138, %cst_36 {dimension_numbers = #tpu.dot_dimension_numbers<[1], [0], [0], [1], [0, 0, 1, 1], [], []>} : vector<16x16xbf16>, vector<16x16xbf16>, vector<16x16xf32> -> vector<16x16xf32>
    %140 = vector.extract_strided_slice %119 {offsets = [0, 16], sizes = [16, 16], strides = [1, 1]} : vector<16x192xf32> to vector<16x16xf32>
    %141 = vector.extract_strided_slice %119 {offsets = [0, 80], sizes = [16, 16], strides = [1, 1]} : vector<16x192xf32> to vector<16x16xf32>
    %142 = vector.extract_strided_slice %119 {offsets = [0, 144], sizes = [16, 16], strides = [1, 1]} : vector<16x192xf32> to vector<16x16xf32>
    %143 = arith.truncf %140 : vector<16x16xf32> to vector<16x16xbf16>
    %144 = arith.truncf %141 : vector<16x16xf32> to vector<16x16xbf16>
    %cst_37 = arith.constant dense<0.000000e+00> : vector<16x16xf32>
    %145 = tpu.matmul %143, %144, %cst_37 {dimension_numbers = #tpu.dot_dimension_numbers<[1], [1], [0], [0], [0, 0, 1, 0], [], []>} : vector<16x16xbf16>, vector<16x16xbf16>, vector<16x16xf32> -> vector<16x16xf32>
    %146 = arith.addf %145, %6 : vector<16x16xf32>
    %cst_38 = arith.constant dense<0xFF800000> : vector<16xf32>
    %147 = vector.multi_reduction <maximumf>, %146, %cst_38 [1] : vector<16x16xf32> to vector<16xf32>
    %148 = vector.shape_cast %147 : vector<16xf32> to vector<16x1xf32>
    %149 = vector.broadcast %148 : vector<16x1xf32> to vector<16x16xf32>
    %150 = arith.subf %146, %149 : vector<16x16xf32>
    %151 = math.exp %150 : vector<16x16xf32>
    %cst_39 = arith.constant dense<0.000000e+00> : vector<16xf32>
    %152 = vector.multi_reduction <add>, %151, %cst_39 [1] : vector<16x16xf32> to vector<16xf32>
    %153 = vector.shape_cast %152 : vector<16xf32> to vector<16x1xf32>
    %154 = tpu.reciprocal %153 {approx = true} : vector<16x1xf32> -> vector<16x1xf32>
    %155 = vector.broadcast %154 : vector<16x1xf32> to vector<16x16xf32>
    %156 = arith.mulf %151, %155 : vector<16x16xf32>
    %157 = arith.truncf %156 : vector<16x16xf32> to vector<16x16xbf16>
    %158 = arith.truncf %142 : vector<16x16xf32> to vector<16x16xbf16>
    %cst_40 = arith.constant dense<0.000000e+00> : vector<16x16xf32>
    %159 = tpu.matmul %157, %158, %cst_40 {dimension_numbers = #tpu.dot_dimension_numbers<[1], [0], [0], [1], [0, 0, 1, 1], [], []>} : vector<16x16xbf16>, vector<16x16xbf16>, vector<16x16xf32> -> vector<16x16xf32>
    %160 = vector.extract_strided_slice %119 {offsets = [0, 32], sizes = [16, 16], strides = [1, 1]} : vector<16x192xf32> to vector<16x16xf32>
    %161 = vector.extract_strided_slice %119 {offsets = [0, 96], sizes = [16, 16], strides = [1, 1]} : vector<16x192xf32> to vector<16x16xf32>
    %162 = vector.extract_strided_slice %119 {offsets = [0, 160], sizes = [16, 16], strides = [1, 1]} : vector<16x192xf32> to vector<16x16xf32>
    %163 = arith.truncf %160 : vector<16x16xf32> to vector<16x16xbf16>
    %164 = arith.truncf %161 : vector<16x16xf32> to vector<16x16xbf16>
    %cst_41 = arith.constant dense<0.000000e+00> : vector<16x16xf32>
    %165 = tpu.matmul %163, %164, %cst_41 {dimension_numbers = #tpu.dot_dimension_numbers<[1], [1], [0], [0], [0, 0, 1, 0], [], []>} : vector<16x16xbf16>, vector<16x16xbf16>, vector<16x16xf32> -> vector<16x16xf32>
    %166 = arith.addf %165, %6 : vector<16x16xf32>
    %cst_42 = arith.constant dense<0xFF800000> : vector<16xf32>
    %167 = vector.multi_reduction <maximumf>, %166, %cst_42 [1] : vector<16x16xf32> to vector<16xf32>
    %168 = vector.shape_cast %167 : vector<16xf32> to vector<16x1xf32>
    %169 = vector.broadcast %168 : vector<16x1xf32> to vector<16x16xf32>
    %170 = arith.subf %166, %169 : vector<16x16xf32>
    %171 = math.exp %170 : vector<16x16xf32>
    %cst_43 = arith.constant dense<0.000000e+00> : vector<16xf32>
    %172 = vector.multi_reduction <add>, %171, %cst_43 [1] : vector<16x16xf32> to vector<16xf32>
    %173 = vector.shape_cast %172 : vector<16xf32> to vector<16x1xf32>
    %174 = tpu.reciprocal %173 {approx = true} : vector<16x1xf32> -> vector<16x1xf32>
    %175 = vector.broadcast %174 : vector<16x1xf32> to vector<16x16xf32>
    %176 = arith.mulf %171, %175 : vector<16x16xf32>
    %177 = arith.truncf %176 : vector<16x16xf32> to vector<16x16xbf16>
    %178 = arith.truncf %162 : vector<16x16xf32> to vector<16x16xbf16>
    %cst_44 = arith.constant dense<0.000000e+00> : vector<16x16xf32>
    %179 = tpu.matmul %177, %178, %cst_44 {dimension_numbers = #tpu.dot_dimension_numbers<[1], [0], [0], [1], [0, 0, 1, 1], [], []>} : vector<16x16xbf16>, vector<16x16xbf16>, vector<16x16xf32> -> vector<16x16xf32>
    %180 = vector.extract_strided_slice %119 {offsets = [0, 48], sizes = [16, 16], strides = [1, 1]} : vector<16x192xf32> to vector<16x16xf32>
    %181 = vector.extract_strided_slice %119 {offsets = [0, 112], sizes = [16, 16], strides = [1, 1]} : vector<16x192xf32> to vector<16x16xf32>
    %182 = vector.extract_strided_slice %119 {offsets = [0, 176], sizes = [16, 16], strides = [1, 1]} : vector<16x192xf32> to vector<16x16xf32>
    %183 = arith.truncf %180 : vector<16x16xf32> to vector<16x16xbf16>
    %184 = arith.truncf %181 : vector<16x16xf32> to vector<16x16xbf16>
    %cst_45 = arith.constant dense<0.000000e+00> : vector<16x16xf32>
    %185 = tpu.matmul %183, %184, %cst_45 {dimension_numbers = #tpu.dot_dimension_numbers<[1], [1], [0], [0], [0, 0, 1, 0], [], []>} : vector<16x16xbf16>, vector<16x16xbf16>, vector<16x16xf32> -> vector<16x16xf32>
    %186 = arith.addf %185, %6 : vector<16x16xf32>
    %cst_46 = arith.constant dense<0xFF800000> : vector<16xf32>
    %187 = vector.multi_reduction <maximumf>, %186, %cst_46 [1] : vector<16x16xf32> to vector<16xf32>
    %188 = vector.shape_cast %187 : vector<16xf32> to vector<16x1xf32>
    %189 = vector.broadcast %188 : vector<16x1xf32> to vector<16x16xf32>
    %190 = arith.subf %186, %189 : vector<16x16xf32>
    %191 = math.exp %190 : vector<16x16xf32>
    %cst_47 = arith.constant dense<0.000000e+00> : vector<16xf32>
    %192 = vector.multi_reduction <add>, %191, %cst_47 [1] : vector<16x16xf32> to vector<16xf32>
    %193 = vector.shape_cast %192 : vector<16xf32> to vector<16x1xf32>
    %194 = tpu.reciprocal %193 {approx = true} : vector<16x1xf32> -> vector<16x1xf32>
    %195 = vector.broadcast %194 : vector<16x1xf32> to vector<16x16xf32>
    %196 = arith.mulf %191, %195 : vector<16x16xf32>
    %197 = arith.truncf %196 : vector<16x16xf32> to vector<16x16xbf16>
    %198 = arith.truncf %182 : vector<16x16xf32> to vector<16x16xbf16>
    %cst_48 = arith.constant dense<0.000000e+00> : vector<16x16xf32>
    %199 = tpu.matmul %197, %198, %cst_48 {dimension_numbers = #tpu.dot_dimension_numbers<[1], [0], [0], [1], [0, 0, 1, 1], [], []>} : vector<16x16xbf16>, vector<16x16xbf16>, vector<16x16xf32> -> vector<16x16xf32>
    %200 = tpu.concatenate %139, %159, %179, %199 in 1 : vector<16x16xf32>, vector<16x16xf32>, vector<16x16xf32>, vector<16x16xf32> -> vector<16x64xf32>
    %201 = tpu.concatenate %118, %200 in 0 : vector<16x64xf32>, vector<16x64xf32> -> vector<32x64xf32>
    %c0_49 = arith.constant 0 : index
    %c0_50 = arith.constant 0 : index
    %c0_51 = arith.constant 0 : index
    %202 = vector.load %arg4[%c0_49, %c0_50, %c0_51] : memref<2x64x64xbf16, #tpu.memory_space<vmem>>, vector<1x64x64xbf16>
    %203 = vector.shape_cast %202 : vector<1x64x64xbf16> to vector<64x64xbf16>
    %204 = arith.truncf %201 : vector<32x64xf32> to vector<32x64xbf16>
    %cst_52 = arith.constant dense<0.000000e+00> : vector<32x64xf32>
    %205 = tpu.matmul %204, %203, %cst_52 {dimension_numbers = #tpu.dot_dimension_numbers<[1], [0], [0], [1], [0, 0, 1, 1], [], []>} : vector<32x64xbf16>, vector<64x64xbf16>, vector<32x64xf32> -> vector<32x64xf32>
    %c0_53 = arith.constant 0 : index
    %c0_54 = arith.constant 0 : index
    %c0_55 = arith.constant 0 : index
    %206 = vector.load %arg5[%c0_53, %c0_54, %c0_55] : memref<2x1x64xf32, #tpu.memory_space<vmem>>, vector<1x1x64xf32>
    %207 = vector.shape_cast %206 : vector<1x1x64xf32> to vector<1x64xf32>
    %208 = vector.broadcast %207 : vector<1x64xf32> to vector<32x64xf32>
    %209 = arith.addf %205, %208 : vector<32x64xf32>
    %210 = arith.addf %0, %209 : vector<32x64xf32>
    %c0_56 = arith.constant 0 : index
    %c0_57 = arith.constant 0 : index
    %c0_58 = arith.constant 0 : index
    %211 = vector.load %arg6[%c0_56, %c0_57, %c0_58] : memref<2x1x64xf32, #tpu.memory_space<vmem>>, vector<1x1x64xf32>
    %212 = vector.shape_cast %211 : vector<1x1x64xf32> to vector<1x64xf32>
    %c0_59 = arith.constant 0 : index
    %c0_60 = arith.constant 0 : index
    %c0_61 = arith.constant 0 : index
    %213 = vector.load %arg7[%c0_59, %c0_60, %c0_61] : memref<2x1x64xf32, #tpu.memory_space<vmem>>, vector<1x1x64xf32>
    %214 = vector.shape_cast %213 : vector<1x1x64xf32> to vector<1x64xf32>
    %cst_62 = arith.constant dense<0.000000e+00> : vector<32xf32>
    %215 = vector.multi_reduction <add>, %210, %cst_62 [1] : vector<32x64xf32> to vector<32xf32>
    %216 = vector.shape_cast %215 : vector<32xf32> to vector<32x1xf32>
    %cst_63 = arith.constant 6.400000e+01 : f32
    %217 = vector.broadcast %cst_63 : f32 to vector<32x1xf32>
    %218 = arith.divf %216, %217 : vector<32x1xf32>
    %219 = vector.broadcast %218 : vector<32x1xf32> to vector<32x64xf32>
    %220 = arith.subf %210, %219 : vector<32x64xf32>
    %221 = arith.mulf %220, %220 : vector<32x64xf32>
    %cst_64 = arith.constant dense<0.000000e+00> : vector<32xf32>
    %222 = vector.multi_reduction <add>, %221, %cst_64 [1] : vector<32x64xf32> to vector<32xf32>
    %223 = vector.shape_cast %222 : vector<32xf32> to vector<32x1xf32>
    %cst_65 = arith.constant 6.400000e+01 : f32
    %224 = vector.broadcast %cst_65 : f32 to vector<32x1xf32>
    %225 = arith.divf %223, %224 : vector<32x1xf32>
    %226 = vector.broadcast %218 : vector<32x1xf32> to vector<32x64xf32>
    %227 = arith.subf %210, %226 : vector<32x64xf32>
    %cst_66 = arith.constant 9.99999974E-6 : f32
    %228 = vector.broadcast %cst_66 : f32 to vector<32x1xf32>
    %229 = arith.addf %225, %228 : vector<32x1xf32>
    %230 = math.rsqrt %229 : vector<32x1xf32>
    %231 = vector.broadcast %230 : vector<32x1xf32> to vector<32x64xf32>
    %232 = arith.mulf %227, %231 : vector<32x64xf32>
    %233 = vector.broadcast %212 : vector<1x64xf32> to vector<32x64xf32>
    %234 = arith.mulf %232, %233 : vector<32x64xf32>
    %235 = vector.broadcast %214 : vector<1x64xf32> to vector<32x64xf32>
    %236 = arith.addf %234, %235 : vector<32x64xf32>
    %c0_67 = arith.constant 0 : index
    %c0_68 = arith.constant 0 : index
    %c0_69 = arith.constant 0 : index
    %237 = vector.load %arg8[%c0_67, %c0_68, %c0_69] : memref<2x64x256xbf16, #tpu.memory_space<vmem>>, vector<1x64x256xbf16>
    %238 = vector.shape_cast %237 : vector<1x64x256xbf16> to vector<64x256xbf16>
    %239 = arith.truncf %236 : vector<32x64xf32> to vector<32x64xbf16>
    %cst_70 = arith.constant dense<0.000000e+00> : vector<32x256xf32>
    %240 = tpu.matmul %239, %238, %cst_70 {dimension_numbers = #tpu.dot_dimension_numbers<[1], [0], [0], [1], [0, 0, 1, 1], [], []>} : vector<32x64xbf16>, vector<64x256xbf16>, vector<32x256xf32> -> vector<32x256xf32>
    %c0_71 = arith.constant 0 : index
    %c0_72 = arith.constant 0 : index
    %c0_73 = arith.constant 0 : index
    %241 = vector.load %arg9[%c0_71, %c0_72, %c0_73] : memref<2x1x256xf32, #tpu.memory_space<vmem>>, vector<1x1x256xf32>
    %242 = vector.shape_cast %241 : vector<1x1x256xf32> to vector<1x256xf32>
    %243 = vector.broadcast %242 : vector<1x256xf32> to vector<32x256xf32>
    %244 = arith.addf %240, %243 : vector<32x256xf32>
    %cst_74 = arith.constant 0.000000e+00 : f32
    %245 = vector.broadcast %cst_74 : f32 to vector<32x256xf32>
    %246 = arith.maximumf %244, %245 : vector<32x256xf32>
    %c0_75 = arith.constant 0 : index
    %c0_76 = arith.constant 0 : index
    %c0_77 = arith.constant 0 : index
    %247 = vector.load %arg10[%c0_75, %c0_76, %c0_77] : memref<2x256x64xbf16, #tpu.memory_space<vmem>>, vector<1x256x64xbf16>
    %248 = vector.shape_cast %247 : vector<1x256x64xbf16> to vector<256x64xbf16>
    %249 = arith.truncf %246 : vector<32x256xf32> to vector<32x256xbf16>
    %cst_78 = arith.constant dense<0.000000e+00> : vector<32x64xf32>
    %250 = tpu.matmul %249, %248, %cst_78 {dimension_numbers = #tpu.dot_dimension_numbers<[1], [0], [0], [1], [0, 0, 1, 1], [], []>} : vector<32x256xbf16>, vector<256x64xbf16>, vector<32x64xf32> -> vector<32x64xf32>
    %c0_79 = arith.constant 0 : index
    %c0_80 = arith.constant 0 : index
    %c0_81 = arith.constant 0 : index
    %251 = vector.load %arg11[%c0_79, %c0_80, %c0_81] : memref<2x1x64xf32, #tpu.memory_space<vmem>>, vector<1x1x64xf32>
    %252 = vector.shape_cast %251 : vector<1x1x64xf32> to vector<1x64xf32>
    %253 = vector.broadcast %252 : vector<1x64xf32> to vector<32x64xf32>
    %254 = arith.addf %250, %253 : vector<32x64xf32>
    %255 = arith.addf %210, %254 : vector<32x64xf32>
    %c1 = arith.constant 1 : index
    %c0_82 = arith.constant 0 : index
    %c0_83 = arith.constant 0 : index
    %256 = vector.load %arg1[%c1, %c0_82, %c0_83] : memref<2x1x64xf32, #tpu.memory_space<vmem>>, vector<1x1x64xf32>
    %257 = vector.shape_cast %256 : vector<1x1x64xf32> to vector<1x64xf32>
    %c1_84 = arith.constant 1 : index
    %c0_85 = arith.constant 0 : index
    %c0_86 = arith.constant 0 : index
    %258 = vector.load %arg2[%c1_84, %c0_85, %c0_86] : memref<2x1x64xf32, #tpu.memory_space<vmem>>, vector<1x1x64xf32>
    %259 = vector.shape_cast %258 : vector<1x1x64xf32> to vector<1x64xf32>
    %cst_87 = arith.constant dense<0.000000e+00> : vector<32xf32>
    %260 = vector.multi_reduction <add>, %255, %cst_87 [1] : vector<32x64xf32> to vector<32xf32>
    %261 = vector.shape_cast %260 : vector<32xf32> to vector<32x1xf32>
    %cst_88 = arith.constant 6.400000e+01 : f32
    %262 = vector.broadcast %cst_88 : f32 to vector<32x1xf32>
    %263 = arith.divf %261, %262 : vector<32x1xf32>
    %264 = vector.broadcast %263 : vector<32x1xf32> to vector<32x64xf32>
    %265 = arith.subf %255, %264 : vector<32x64xf32>
    %266 = arith.mulf %265, %265 : vector<32x64xf32>
    %cst_89 = arith.constant dense<0.000000e+00> : vector<32xf32>
    %267 = vector.multi_reduction <add>, %266, %cst_89 [1] : vector<32x64xf32> to vector<32xf32>
    %268 = vector.shape_cast %267 : vector<32xf32> to vector<32x1xf32>
    %cst_90 = arith.constant 6.400000e+01 : f32
    %269 = vector.broadcast %cst_90 : f32 to vector<32x1xf32>
    %270 = arith.divf %268, %269 : vector<32x1xf32>
    %271 = vector.broadcast %263 : vector<32x1xf32> to vector<32x64xf32>
    %272 = arith.subf %255, %271 : vector<32x64xf32>
    %cst_91 = arith.constant 9.99999974E-6 : f32
    %273 = vector.broadcast %cst_91 : f32 to vector<32x1xf32>
    %274 = arith.addf %270, %273 : vector<32x1xf32>
    %275 = math.rsqrt %274 : vector<32x1xf32>
    %276 = vector.broadcast %275 : vector<32x1xf32> to vector<32x64xf32>
    %277 = arith.mulf %272, %276 : vector<32x64xf32>
    %278 = vector.broadcast %257 : vector<1x64xf32> to vector<32x64xf32>
    %279 = arith.mulf %277, %278 : vector<32x64xf32>
    %280 = vector.broadcast %259 : vector<1x64xf32> to vector<32x64xf32>
    %281 = arith.addf %279, %280 : vector<32x64xf32>
    %c1_92 = arith.constant 1 : index
    %c0_93 = arith.constant 0 : index
    %c0_94 = arith.constant 0 : index
    %282 = vector.load %arg3[%c1_92, %c0_93, %c0_94] : memref<2x64x192xbf16, #tpu.memory_space<vmem>>, vector<1x64x192xbf16>
    %283 = vector.shape_cast %282 : vector<1x64x192xbf16> to vector<64x192xbf16>
    %284 = arith.truncf %281 : vector<32x64xf32> to vector<32x64xbf16>
    %cst_95 = arith.constant dense<0.000000e+00> : vector<32x192xf32>
    %285 = tpu.matmul %284, %283, %cst_95 {dimension_numbers = #tpu.dot_dimension_numbers<[1], [0], [0], [1], [0, 0, 1, 1], [], []>} : vector<32x64xbf16>, vector<64x192xbf16>, vector<32x192xf32> -> vector<32x192xf32>
    %286 = vector.extract_strided_slice %285 {offsets = [0, 0], sizes = [16, 192], strides = [1, 1]} : vector<32x192xf32> to vector<16x192xf32>
    %287 = vector.extract_strided_slice %286 {offsets = [0, 0], sizes = [16, 16], strides = [1, 1]} : vector<16x192xf32> to vector<16x16xf32>
    %288 = vector.extract_strided_slice %286 {offsets = [0, 64], sizes = [16, 16], strides = [1, 1]} : vector<16x192xf32> to vector<16x16xf32>
    %289 = vector.extract_strided_slice %286 {offsets = [0, 128], sizes = [16, 16], strides = [1, 1]} : vector<16x192xf32> to vector<16x16xf32>
    %290 = arith.truncf %287 : vector<16x16xf32> to vector<16x16xbf16>
    %291 = arith.truncf %288 : vector<16x16xf32> to vector<16x16xbf16>
    %cst_96 = arith.constant dense<0.000000e+00> : vector<16x16xf32>
    %292 = tpu.matmul %290, %291, %cst_96 {dimension_numbers = #tpu.dot_dimension_numbers<[1], [1], [0], [0], [0, 0, 1, 0], [], []>} : vector<16x16xbf16>, vector<16x16xbf16>, vector<16x16xf32> -> vector<16x16xf32>
    %293 = arith.addf %292, %6 : vector<16x16xf32>
    %cst_97 = arith.constant dense<0xFF800000> : vector<16xf32>
    %294 = vector.multi_reduction <maximumf>, %293, %cst_97 [1] : vector<16x16xf32> to vector<16xf32>
    %295 = vector.shape_cast %294 : vector<16xf32> to vector<16x1xf32>
    %296 = vector.broadcast %295 : vector<16x1xf32> to vector<16x16xf32>
    %297 = arith.subf %293, %296 : vector<16x16xf32>
    %298 = math.exp %297 : vector<16x16xf32>
    %cst_98 = arith.constant dense<0.000000e+00> : vector<16xf32>
    %299 = vector.multi_reduction <add>, %298, %cst_98 [1] : vector<16x16xf32> to vector<16xf32>
    %300 = vector.shape_cast %299 : vector<16xf32> to vector<16x1xf32>
    %301 = tpu.reciprocal %300 {approx = true} : vector<16x1xf32> -> vector<16x1xf32>
    %302 = vector.broadcast %301 : vector<16x1xf32> to vector<16x16xf32>
    %303 = arith.mulf %298, %302 : vector<16x16xf32>
    %304 = arith.truncf %303 : vector<16x16xf32> to vector<16x16xbf16>
    %305 = arith.truncf %289 : vector<16x16xf32> to vector<16x16xbf16>
    %cst_99 = arith.constant dense<0.000000e+00> : vector<16x16xf32>
    %306 = tpu.matmul %304, %305, %cst_99 {dimension_numbers = #tpu.dot_dimension_numbers<[1], [0], [0], [1], [0, 0, 1, 1], [], []>} : vector<16x16xbf16>, vector<16x16xbf16>, vector<16x16xf32> -> vector<16x16xf32>
    %307 = vector.extract_strided_slice %286 {offsets = [0, 16], sizes = [16, 16], strides = [1, 1]} : vector<16x192xf32> to vector<16x16xf32>
    %308 = vector.extract_strided_slice %286 {offsets = [0, 80], sizes = [16, 16], strides = [1, 1]} : vector<16x192xf32> to vector<16x16xf32>
    %309 = vector.extract_strided_slice %286 {offsets = [0, 144], sizes = [16, 16], strides = [1, 1]} : vector<16x192xf32> to vector<16x16xf32>
    %310 = arith.truncf %307 : vector<16x16xf32> to vector<16x16xbf16>
    %311 = arith.truncf %308 : vector<16x16xf32> to vector<16x16xbf16>
    %cst_100 = arith.constant dense<0.000000e+00> : vector<16x16xf32>
    %312 = tpu.matmul %310, %311, %cst_100 {dimension_numbers = #tpu.dot_dimension_numbers<[1], [1], [0], [0], [0, 0, 1, 0], [], []>} : vector<16x16xbf16>, vector<16x16xbf16>, vector<16x16xf32> -> vector<16x16xf32>
    %313 = arith.addf %312, %6 : vector<16x16xf32>
    %cst_101 = arith.constant dense<0xFF800000> : vector<16xf32>
    %314 = vector.multi_reduction <maximumf>, %313, %cst_101 [1] : vector<16x16xf32> to vector<16xf32>
    %315 = vector.shape_cast %314 : vector<16xf32> to vector<16x1xf32>
    %316 = vector.broadcast %315 : vector<16x1xf32> to vector<16x16xf32>
    %317 = arith.subf %313, %316 : vector<16x16xf32>
    %318 = math.exp %317 : vector<16x16xf32>
    %cst_102 = arith.constant dense<0.000000e+00> : vector<16xf32>
    %319 = vector.multi_reduction <add>, %318, %cst_102 [1] : vector<16x16xf32> to vector<16xf32>
    %320 = vector.shape_cast %319 : vector<16xf32> to vector<16x1xf32>
    %321 = tpu.reciprocal %320 {approx = true} : vector<16x1xf32> -> vector<16x1xf32>
    %322 = vector.broadcast %321 : vector<16x1xf32> to vector<16x16xf32>
    %323 = arith.mulf %318, %322 : vector<16x16xf32>
    %324 = arith.truncf %323 : vector<16x16xf32> to vector<16x16xbf16>
    %325 = arith.truncf %309 : vector<16x16xf32> to vector<16x16xbf16>
    %cst_103 = arith.constant dense<0.000000e+00> : vector<16x16xf32>
    %326 = tpu.matmul %324, %325, %cst_103 {dimension_numbers = #tpu.dot_dimension_numbers<[1], [0], [0], [1], [0, 0, 1, 1], [], []>} : vector<16x16xbf16>, vector<16x16xbf16>, vector<16x16xf32> -> vector<16x16xf32>
    %327 = vector.extract_strided_slice %286 {offsets = [0, 32], sizes = [16, 16], strides = [1, 1]} : vector<16x192xf32> to vector<16x16xf32>
    %328 = vector.extract_strided_slice %286 {offsets = [0, 96], sizes = [16, 16], strides = [1, 1]} : vector<16x192xf32> to vector<16x16xf32>
    %329 = vector.extract_strided_slice %286 {offsets = [0, 160], sizes = [16, 16], strides = [1, 1]} : vector<16x192xf32> to vector<16x16xf32>
    %330 = arith.truncf %327 : vector<16x16xf32> to vector<16x16xbf16>
    %331 = arith.truncf %328 : vector<16x16xf32> to vector<16x16xbf16>
    %cst_104 = arith.constant dense<0.000000e+00> : vector<16x16xf32>
    %332 = tpu.matmul %330, %331, %cst_104 {dimension_numbers = #tpu.dot_dimension_numbers<[1], [1], [0], [0], [0, 0, 1, 0], [], []>} : vector<16x16xbf16>, vector<16x16xbf16>, vector<16x16xf32> -> vector<16x16xf32>
    %333 = arith.addf %332, %6 : vector<16x16xf32>
    %cst_105 = arith.constant dense<0xFF800000> : vector<16xf32>
    %334 = vector.multi_reduction <maximumf>, %333, %cst_105 [1] : vector<16x16xf32> to vector<16xf32>
    %335 = vector.shape_cast %334 : vector<16xf32> to vector<16x1xf32>
    %336 = vector.broadcast %335 : vector<16x1xf32> to vector<16x16xf32>
    %337 = arith.subf %333, %336 : vector<16x16xf32>
    %338 = math.exp %337 : vector<16x16xf32>
    %cst_106 = arith.constant dense<0.000000e+00> : vector<16xf32>
    %339 = vector.multi_reduction <add>, %338, %cst_106 [1] : vector<16x16xf32> to vector<16xf32>
    %340 = vector.shape_cast %339 : vector<16xf32> to vector<16x1xf32>
    %341 = tpu.reciprocal %340 {approx = true} : vector<16x1xf32> -> vector<16x1xf32>
    %342 = vector.broadcast %341 : vector<16x1xf32> to vector<16x16xf32>
    %343 = arith.mulf %338, %342 : vector<16x16xf32>
    %344 = arith.truncf %343 : vector<16x16xf32> to vector<16x16xbf16>
    %345 = arith.truncf %329 : vector<16x16xf32> to vector<16x16xbf16>
    %cst_107 = arith.constant dense<0.000000e+00> : vector<16x16xf32>
    %346 = tpu.matmul %344, %345, %cst_107 {dimension_numbers = #tpu.dot_dimension_numbers<[1], [0], [0], [1], [0, 0, 1, 1], [], []>} : vector<16x16xbf16>, vector<16x16xbf16>, vector<16x16xf32> -> vector<16x16xf32>
    %347 = vector.extract_strided_slice %286 {offsets = [0, 48], sizes = [16, 16], strides = [1, 1]} : vector<16x192xf32> to vector<16x16xf32>
    %348 = vector.extract_strided_slice %286 {offsets = [0, 112], sizes = [16, 16], strides = [1, 1]} : vector<16x192xf32> to vector<16x16xf32>
    %349 = vector.extract_strided_slice %286 {offsets = [0, 176], sizes = [16, 16], strides = [1, 1]} : vector<16x192xf32> to vector<16x16xf32>
    %350 = arith.truncf %347 : vector<16x16xf32> to vector<16x16xbf16>
    %351 = arith.truncf %348 : vector<16x16xf32> to vector<16x16xbf16>
    %cst_108 = arith.constant dense<0.000000e+00> : vector<16x16xf32>
    %352 = tpu.matmul %350, %351, %cst_108 {dimension_numbers = #tpu.dot_dimension_numbers<[1], [1], [0], [0], [0, 0, 1, 0], [], []>} : vector<16x16xbf16>, vector<16x16xbf16>, vector<16x16xf32> -> vector<16x16xf32>
    %353 = arith.addf %352, %6 : vector<16x16xf32>
    %cst_109 = arith.constant dense<0xFF800000> : vector<16xf32>
    %354 = vector.multi_reduction <maximumf>, %353, %cst_109 [1] : vector<16x16xf32> to vector<16xf32>
    %355 = vector.shape_cast %354 : vector<16xf32> to vector<16x1xf32>
    %356 = vector.broadcast %355 : vector<16x1xf32> to vector<16x16xf32>
    %357 = arith.subf %353, %356 : vector<16x16xf32>
    %358 = math.exp %357 : vector<16x16xf32>
    %cst_110 = arith.constant dense<0.000000e+00> : vector<16xf32>
    %359 = vector.multi_reduction <add>, %358, %cst_110 [1] : vector<16x16xf32> to vector<16xf32>
    %360 = vector.shape_cast %359 : vector<16xf32> to vector<16x1xf32>
    %361 = tpu.reciprocal %360 {approx = true} : vector<16x1xf32> -> vector<16x1xf32>
    %362 = vector.broadcast %361 : vector<16x1xf32> to vector<16x16xf32>
    %363 = arith.mulf %358, %362 : vector<16x16xf32>
    %364 = arith.truncf %363 : vector<16x16xf32> to vector<16x16xbf16>
    %365 = arith.truncf %349 : vector<16x16xf32> to vector<16x16xbf16>
    %cst_111 = arith.constant dense<0.000000e+00> : vector<16x16xf32>
    %366 = tpu.matmul %364, %365, %cst_111 {dimension_numbers = #tpu.dot_dimension_numbers<[1], [0], [0], [1], [0, 0, 1, 1], [], []>} : vector<16x16xbf16>, vector<16x16xbf16>, vector<16x16xf32> -> vector<16x16xf32>
    %367 = tpu.concatenate %306, %326, %346, %366 in 1 : vector<16x16xf32>, vector<16x16xf32>, vector<16x16xf32>, vector<16x16xf32> -> vector<16x64xf32>
    %368 = vector.extract_strided_slice %285 {offsets = [16, 0], sizes = [16, 192], strides = [1, 1]} : vector<32x192xf32> to vector<16x192xf32>
    %369 = vector.extract_strided_slice %368 {offsets = [0, 0], sizes = [16, 16], strides = [1, 1]} : vector<16x192xf32> to vector<16x16xf32>
    %370 = vector.extract_strided_slice %368 {offsets = [0, 64], sizes = [16, 16], strides = [1, 1]} : vector<16x192xf32> to vector<16x16xf32>
    %371 = vector.extract_strided_slice %368 {offsets = [0, 128], sizes = [16, 16], strides = [1, 1]} : vector<16x192xf32> to vector<16x16xf32>
    %372 = arith.truncf %369 : vector<16x16xf32> to vector<16x16xbf16>
    %373 = arith.truncf %370 : vector<16x16xf32> to vector<16x16xbf16>
    %cst_112 = arith.constant dense<0.000000e+00> : vector<16x16xf32>
    %374 = tpu.matmul %372, %373, %cst_112 {dimension_numbers = #tpu.dot_dimension_numbers<[1], [1], [0], [0], [0, 0, 1, 0], [], []>} : vector<16x16xbf16>, vector<16x16xbf16>, vector<16x16xf32> -> vector<16x16xf32>
    %375 = arith.addf %374, %6 : vector<16x16xf32>
    %cst_113 = arith.constant dense<0xFF800000> : vector<16xf32>
    %376 = vector.multi_reduction <maximumf>, %375, %cst_113 [1] : vector<16x16xf32> to vector<16xf32>
    %377 = vector.shape_cast %376 : vector<16xf32> to vector<16x1xf32>
    %378 = vector.broadcast %377 : vector<16x1xf32> to vector<16x16xf32>
    %379 = arith.subf %375, %378 : vector<16x16xf32>
    %380 = math.exp %379 : vector<16x16xf32>
    %cst_114 = arith.constant dense<0.000000e+00> : vector<16xf32>
    %381 = vector.multi_reduction <add>, %380, %cst_114 [1] : vector<16x16xf32> to vector<16xf32>
    %382 = vector.shape_cast %381 : vector<16xf32> to vector<16x1xf32>
    %383 = tpu.reciprocal %382 {approx = true} : vector<16x1xf32> -> vector<16x1xf32>
    %384 = vector.broadcast %383 : vector<16x1xf32> to vector<16x16xf32>
    %385 = arith.mulf %380, %384 : vector<16x16xf32>
    %386 = arith.truncf %385 : vector<16x16xf32> to vector<16x16xbf16>
    %387 = arith.truncf %371 : vector<16x16xf32> to vector<16x16xbf16>
    %cst_115 = arith.constant dense<0.000000e+00> : vector<16x16xf32>
    %388 = tpu.matmul %386, %387, %cst_115 {dimension_numbers = #tpu.dot_dimension_numbers<[1], [0], [0], [1], [0, 0, 1, 1], [], []>} : vector<16x16xbf16>, vector<16x16xbf16>, vector<16x16xf32> -> vector<16x16xf32>
    %389 = vector.extract_strided_slice %368 {offsets = [0, 16], sizes = [16, 16], strides = [1, 1]} : vector<16x192xf32> to vector<16x16xf32>
    %390 = vector.extract_strided_slice %368 {offsets = [0, 80], sizes = [16, 16], strides = [1, 1]} : vector<16x192xf32> to vector<16x16xf32>
    %391 = vector.extract_strided_slice %368 {offsets = [0, 144], sizes = [16, 16], strides = [1, 1]} : vector<16x192xf32> to vector<16x16xf32>
    %392 = arith.truncf %389 : vector<16x16xf32> to vector<16x16xbf16>
    %393 = arith.truncf %390 : vector<16x16xf32> to vector<16x16xbf16>
    %cst_116 = arith.constant dense<0.000000e+00> : vector<16x16xf32>
    %394 = tpu.matmul %392, %393, %cst_116 {dimension_numbers = #tpu.dot_dimension_numbers<[1], [1], [0], [0], [0, 0, 1, 0], [], []>} : vector<16x16xbf16>, vector<16x16xbf16>, vector<16x16xf32> -> vector<16x16xf32>
    %395 = arith.addf %394, %6 : vector<16x16xf32>
    %cst_117 = arith.constant dense<0xFF800000> : vector<16xf32>
    %396 = vector.multi_reduction <maximumf>, %395, %cst_117 [1] : vector<16x16xf32> to vector<16xf32>
    %397 = vector.shape_cast %396 : vector<16xf32> to vector<16x1xf32>
    %398 = vector.broadcast %397 : vector<16x1xf32> to vector<16x16xf32>
    %399 = arith.subf %395, %398 : vector<16x16xf32>
    %400 = math.exp %399 : vector<16x16xf32>
    %cst_118 = arith.constant dense<0.000000e+00> : vector<16xf32>
    %401 = vector.multi_reduction <add>, %400, %cst_118 [1] : vector<16x16xf32> to vector<16xf32>
    %402 = vector.shape_cast %401 : vector<16xf32> to vector<16x1xf32>
    %403 = tpu.reciprocal %402 {approx = true} : vector<16x1xf32> -> vector<16x1xf32>
    %404 = vector.broadcast %403 : vector<16x1xf32> to vector<16x16xf32>
    %405 = arith.mulf %400, %404 : vector<16x16xf32>
    %406 = arith.truncf %405 : vector<16x16xf32> to vector<16x16xbf16>
    %407 = arith.truncf %391 : vector<16x16xf32> to vector<16x16xbf16>
    %cst_119 = arith.constant dense<0.000000e+00> : vector<16x16xf32>
    %408 = tpu.matmul %406, %407, %cst_119 {dimension_numbers = #tpu.dot_dimension_numbers<[1], [0], [0], [1], [0, 0, 1, 1], [], []>} : vector<16x16xbf16>, vector<16x16xbf16>, vector<16x16xf32> -> vector<16x16xf32>
    %409 = vector.extract_strided_slice %368 {offsets = [0, 32], sizes = [16, 16], strides = [1, 1]} : vector<16x192xf32> to vector<16x16xf32>
    %410 = vector.extract_strided_slice %368 {offsets = [0, 96], sizes = [16, 16], strides = [1, 1]} : vector<16x192xf32> to vector<16x16xf32>
    %411 = vector.extract_strided_slice %368 {offsets = [0, 160], sizes = [16, 16], strides = [1, 1]} : vector<16x192xf32> to vector<16x16xf32>
    %412 = arith.truncf %409 : vector<16x16xf32> to vector<16x16xbf16>
    %413 = arith.truncf %410 : vector<16x16xf32> to vector<16x16xbf16>
    %cst_120 = arith.constant dense<0.000000e+00> : vector<16x16xf32>
    %414 = tpu.matmul %412, %413, %cst_120 {dimension_numbers = #tpu.dot_dimension_numbers<[1], [1], [0], [0], [0, 0, 1, 0], [], []>} : vector<16x16xbf16>, vector<16x16xbf16>, vector<16x16xf32> -> vector<16x16xf32>
    %415 = arith.addf %414, %6 : vector<16x16xf32>
    %cst_121 = arith.constant dense<0xFF800000> : vector<16xf32>
    %416 = vector.multi_reduction <maximumf>, %415, %cst_121 [1] : vector<16x16xf32> to vector<16xf32>
    %417 = vector.shape_cast %416 : vector<16xf32> to vector<16x1xf32>
    %418 = vector.broadcast %417 : vector<16x1xf32> to vector<16x16xf32>
    %419 = arith.subf %415, %418 : vector<16x16xf32>
    %420 = math.exp %419 : vector<16x16xf32>
    %cst_122 = arith.constant dense<0.000000e+00> : vector<16xf32>
    %421 = vector.multi_reduction <add>, %420, %cst_122 [1] : vector<16x16xf32> to vector<16xf32>
    %422 = vector.shape_cast %421 : vector<16xf32> to vector<16x1xf32>
    %423 = tpu.reciprocal %422 {approx = true} : vector<16x1xf32> -> vector<16x1xf32>
    %424 = vector.broadcast %423 : vector<16x1xf32> to vector<16x16xf32>
    %425 = arith.mulf %420, %424 : vector<16x16xf32>
    %426 = arith.truncf %425 : vector<16x16xf32> to vector<16x16xbf16>
    %427 = arith.truncf %411 : vector<16x16xf32> to vector<16x16xbf16>
    %cst_123 = arith.constant dense<0.000000e+00> : vector<16x16xf32>
    %428 = tpu.matmul %426, %427, %cst_123 {dimension_numbers = #tpu.dot_dimension_numbers<[1], [0], [0], [1], [0, 0, 1, 1], [], []>} : vector<16x16xbf16>, vector<16x16xbf16>, vector<16x16xf32> -> vector<16x16xf32>
    %429 = vector.extract_strided_slice %368 {offsets = [0, 48], sizes = [16, 16], strides = [1, 1]} : vector<16x192xf32> to vector<16x16xf32>
    %430 = vector.extract_strided_slice %368 {offsets = [0, 112], sizes = [16, 16], strides = [1, 1]} : vector<16x192xf32> to vector<16x16xf32>
    %431 = vector.extract_strided_slice %368 {offsets = [0, 176], sizes = [16, 16], strides = [1, 1]} : vector<16x192xf32> to vector<16x16xf32>
    %432 = arith.truncf %429 : vector<16x16xf32> to vector<16x16xbf16>
    %433 = arith.truncf %430 : vector<16x16xf32> to vector<16x16xbf16>
    %cst_124 = arith.constant dense<0.000000e+00> : vector<16x16xf32>
    %434 = tpu.matmul %432, %433, %cst_124 {dimension_numbers = #tpu.dot_dimension_numbers<[1], [1], [0], [0], [0, 0, 1, 0], [], []>} : vector<16x16xbf16>, vector<16x16xbf16>, vector<16x16xf32> -> vector<16x16xf32>
    %435 = arith.addf %434, %6 : vector<16x16xf32>
    %cst_125 = arith.constant dense<0xFF800000> : vector<16xf32>
    %436 = vector.multi_reduction <maximumf>, %435, %cst_125 [1] : vector<16x16xf32> to vector<16xf32>
    %437 = vector.shape_cast %436 : vector<16xf32> to vector<16x1xf32>
    %438 = vector.broadcast %437 : vector<16x1xf32> to vector<16x16xf32>
    %439 = arith.subf %435, %438 : vector<16x16xf32>
    %440 = math.exp %439 : vector<16x16xf32>
    %cst_126 = arith.constant dense<0.000000e+00> : vector<16xf32>
    %441 = vector.multi_reduction <add>, %440, %cst_126 [1] : vector<16x16xf32> to vector<16xf32>
    %442 = vector.shape_cast %441 : vector<16xf32> to vector<16x1xf32>
    %443 = tpu.reciprocal %442 {approx = true} : vector<16x1xf32> -> vector<16x1xf32>
    %444 = vector.broadcast %443 : vector<16x1xf32> to vector<16x16xf32>
    %445 = arith.mulf %440, %444 : vector<16x16xf32>
    %446 = arith.truncf %445 : vector<16x16xf32> to vector<16x16xbf16>
    %447 = arith.truncf %431 : vector<16x16xf32> to vector<16x16xbf16>
    %cst_127 = arith.constant dense<0.000000e+00> : vector<16x16xf32>
    %448 = tpu.matmul %446, %447, %cst_127 {dimension_numbers = #tpu.dot_dimension_numbers<[1], [0], [0], [1], [0, 0, 1, 1], [], []>} : vector<16x16xbf16>, vector<16x16xbf16>, vector<16x16xf32> -> vector<16x16xf32>
    %449 = tpu.concatenate %388, %408, %428, %448 in 1 : vector<16x16xf32>, vector<16x16xf32>, vector<16x16xf32>, vector<16x16xf32> -> vector<16x64xf32>
    %450 = tpu.concatenate %367, %449 in 0 : vector<16x64xf32>, vector<16x64xf32> -> vector<32x64xf32>
    %c1_128 = arith.constant 1 : index
    %c0_129 = arith.constant 0 : index
    %c0_130 = arith.constant 0 : index
    %451 = vector.load %arg4[%c1_128, %c0_129, %c0_130] : memref<2x64x64xbf16, #tpu.memory_space<vmem>>, vector<1x64x64xbf16>
    %452 = vector.shape_cast %451 : vector<1x64x64xbf16> to vector<64x64xbf16>
    %453 = arith.truncf %450 : vector<32x64xf32> to vector<32x64xbf16>
    %cst_131 = arith.constant dense<0.000000e+00> : vector<32x64xf32>
    %454 = tpu.matmul %453, %452, %cst_131 {dimension_numbers = #tpu.dot_dimension_numbers<[1], [0], [0], [1], [0, 0, 1, 1], [], []>} : vector<32x64xbf16>, vector<64x64xbf16>, vector<32x64xf32> -> vector<32x64xf32>
    %c1_132 = arith.constant 1 : index
    %c0_133 = arith.constant 0 : index
    %c0_134 = arith.constant 0 : index
    %455 = vector.load %arg5[%c1_132, %c0_133, %c0_134] : memref<2x1x64xf32, #tpu.memory_space<vmem>>, vector<1x1x64xf32>
    %456 = vector.shape_cast %455 : vector<1x1x64xf32> to vector<1x64xf32>
    %457 = vector.broadcast %456 : vector<1x64xf32> to vector<32x64xf32>
    %458 = arith.addf %454, %457 : vector<32x64xf32>
    %459 = arith.addf %255, %458 : vector<32x64xf32>
    %c1_135 = arith.constant 1 : index
    %c0_136 = arith.constant 0 : index
    %c0_137 = arith.constant 0 : index
    %460 = vector.load %arg6[%c1_135, %c0_136, %c0_137] : memref<2x1x64xf32, #tpu.memory_space<vmem>>, vector<1x1x64xf32>
    %461 = vector.shape_cast %460 : vector<1x1x64xf32> to vector<1x64xf32>
    %c1_138 = arith.constant 1 : index
    %c0_139 = arith.constant 0 : index
    %c0_140 = arith.constant 0 : index
    %462 = vector.load %arg7[%c1_138, %c0_139, %c0_140] : memref<2x1x64xf32, #tpu.memory_space<vmem>>, vector<1x1x64xf32>
    %463 = vector.shape_cast %462 : vector<1x1x64xf32> to vector<1x64xf32>
    %cst_141 = arith.constant dense<0.000000e+00> : vector<32xf32>
    %464 = vector.multi_reduction <add>, %459, %cst_141 [1] : vector<32x64xf32> to vector<32xf32>
    %465 = vector.shape_cast %464 : vector<32xf32> to vector<32x1xf32>
    %cst_142 = arith.constant 6.400000e+01 : f32
    %466 = vector.broadcast %cst_142 : f32 to vector<32x1xf32>
    %467 = arith.divf %465, %466 : vector<32x1xf32>
    %468 = vector.broadcast %467 : vector<32x1xf32> to vector<32x64xf32>
    %469 = arith.subf %459, %468 : vector<32x64xf32>
    %470 = arith.mulf %469, %469 : vector<32x64xf32>
    %cst_143 = arith.constant dense<0.000000e+00> : vector<32xf32>
    %471 = vector.multi_reduction <add>, %470, %cst_143 [1] : vector<32x64xf32> to vector<32xf32>
    %472 = vector.shape_cast %471 : vector<32xf32> to vector<32x1xf32>
    %cst_144 = arith.constant 6.400000e+01 : f32
    %473 = vector.broadcast %cst_144 : f32 to vector<32x1xf32>
    %474 = arith.divf %472, %473 : vector<32x1xf32>
    %475 = vector.broadcast %467 : vector<32x1xf32> to vector<32x64xf32>
    %476 = arith.subf %459, %475 : vector<32x64xf32>
    %cst_145 = arith.constant 9.99999974E-6 : f32
    %477 = vector.broadcast %cst_145 : f32 to vector<32x1xf32>
    %478 = arith.addf %474, %477 : vector<32x1xf32>
    %479 = math.rsqrt %478 : vector<32x1xf32>
    %480 = vector.broadcast %479 : vector<32x1xf32> to vector<32x64xf32>
    %481 = arith.mulf %476, %480 : vector<32x64xf32>
    %482 = vector.broadcast %461 : vector<1x64xf32> to vector<32x64xf32>
    %483 = arith.mulf %481, %482 : vector<32x64xf32>
    %484 = vector.broadcast %463 : vector<1x64xf32> to vector<32x64xf32>
    %485 = arith.addf %483, %484 : vector<32x64xf32>
    %c1_146 = arith.constant 1 : index
    %c0_147 = arith.constant 0 : index
    %c0_148 = arith.constant 0 : index
    %486 = vector.load %arg8[%c1_146, %c0_147, %c0_148] : memref<2x64x256xbf16, #tpu.memory_space<vmem>>, vector<1x64x256xbf16>
    %487 = vector.shape_cast %486 : vector<1x64x256xbf16> to vector<64x256xbf16>
    %488 = arith.truncf %485 : vector<32x64xf32> to vector<32x64xbf16>
    %cst_149 = arith.constant dense<0.000000e+00> : vector<32x256xf32>
    %489 = tpu.matmul %488, %487, %cst_149 {dimension_numbers = #tpu.dot_dimension_numbers<[1], [0], [0], [1], [0, 0, 1, 1], [], []>} : vector<32x64xbf16>, vector<64x256xbf16>, vector<32x256xf32> -> vector<32x256xf32>
    %c1_150 = arith.constant 1 : index
    %c0_151 = arith.constant 0 : index
    %c0_152 = arith.constant 0 : index
    %490 = vector.load %arg9[%c1_150, %c0_151, %c0_152] : memref<2x1x256xf32, #tpu.memory_space<vmem>>, vector<1x1x256xf32>
    %491 = vector.shape_cast %490 : vector<1x1x256xf32> to vector<1x256xf32>
    %492 = vector.broadcast %491 : vector<1x256xf32> to vector<32x256xf32>
    %493 = arith.addf %489, %492 : vector<32x256xf32>
    %cst_153 = arith.constant 0.000000e+00 : f32
    %494 = vector.broadcast %cst_153 : f32 to vector<32x256xf32>
    %495 = arith.maximumf %493, %494 : vector<32x256xf32>
    %c1_154 = arith.constant 1 : index
    %c0_155 = arith.constant 0 : index
    %c0_156 = arith.constant 0 : index
    %496 = vector.load %arg10[%c1_154, %c0_155, %c0_156] : memref<2x256x64xbf16, #tpu.memory_space<vmem>>, vector<1x256x64xbf16>
    %497 = vector.shape_cast %496 : vector<1x256x64xbf16> to vector<256x64xbf16>
    %498 = arith.truncf %495 : vector<32x256xf32> to vector<32x256xbf16>
    %cst_157 = arith.constant dense<0.000000e+00> : vector<32x64xf32>
    %499 = tpu.matmul %498, %497, %cst_157 {dimension_numbers = #tpu.dot_dimension_numbers<[1], [0], [0], [1], [0, 0, 1, 1], [], []>} : vector<32x256xbf16>, vector<256x64xbf16>, vector<32x64xf32> -> vector<32x64xf32>
    %c1_158 = arith.constant 1 : index
    %c0_159 = arith.constant 0 : index
    %c0_160 = arith.constant 0 : index
    %500 = vector.load %arg11[%c1_158, %c0_159, %c0_160] : memref<2x1x64xf32, #tpu.memory_space<vmem>>, vector<1x1x64xf32>
    %501 = vector.shape_cast %500 : vector<1x1x64xf32> to vector<1x64xf32>
    %502 = vector.broadcast %501 : vector<1x64xf32> to vector<32x64xf32>
    %503 = arith.addf %499, %502 : vector<32x64xf32>
    %504 = arith.addf %459, %503 : vector<32x64xf32>
    %c0_161 = arith.constant 0 : index
    %c0_162 = arith.constant 0 : index
    %505 = vector.load %arg12[%c0_161, %c0_162] : memref<1x64xf32, #tpu.memory_space<vmem>>, vector<1x64xf32>
    %c0_163 = arith.constant 0 : index
    %c0_164 = arith.constant 0 : index
    %506 = vector.load %arg13[%c0_163, %c0_164] : memref<1x64xf32, #tpu.memory_space<vmem>>, vector<1x64xf32>
    %cst_165 = arith.constant dense<0.000000e+00> : vector<32xf32>
    %507 = vector.multi_reduction <add>, %504, %cst_165 [1] : vector<32x64xf32> to vector<32xf32>
    %508 = vector.shape_cast %507 : vector<32xf32> to vector<32x1xf32>
    %cst_166 = arith.constant 6.400000e+01 : f32
    %509 = vector.broadcast %cst_166 : f32 to vector<32x1xf32>
    %510 = arith.divf %508, %509 : vector<32x1xf32>
    %511 = vector.broadcast %510 : vector<32x1xf32> to vector<32x64xf32>
    %512 = arith.subf %504, %511 : vector<32x64xf32>
    %513 = arith.mulf %512, %512 : vector<32x64xf32>
    %cst_167 = arith.constant dense<0.000000e+00> : vector<32xf32>
    %514 = vector.multi_reduction <add>, %513, %cst_167 [1] : vector<32x64xf32> to vector<32xf32>
    %515 = vector.shape_cast %514 : vector<32xf32> to vector<32x1xf32>
    %cst_168 = arith.constant 6.400000e+01 : f32
    %516 = vector.broadcast %cst_168 : f32 to vector<32x1xf32>
    %517 = arith.divf %515, %516 : vector<32x1xf32>
    %518 = vector.broadcast %510 : vector<32x1xf32> to vector<32x64xf32>
    %519 = arith.subf %504, %518 : vector<32x64xf32>
    %cst_169 = arith.constant 9.99999974E-6 : f32
    %520 = vector.broadcast %cst_169 : f32 to vector<32x1xf32>
    %521 = arith.addf %517, %520 : vector<32x1xf32>
    %522 = math.rsqrt %521 : vector<32x1xf32>
    %523 = vector.broadcast %522 : vector<32x1xf32> to vector<32x64xf32>
    %524 = arith.mulf %519, %523 : vector<32x64xf32>
    %525 = vector.broadcast %505 : vector<1x64xf32> to vector<32x64xf32>
    %526 = arith.mulf %524, %525 : vector<32x64xf32>
    %527 = vector.broadcast %506 : vector<1x64xf32> to vector<32x64xf32>
    %528 = arith.addf %526, %527 : vector<32x64xf32>
    %c0_170 = arith.constant 0 : index
    %c0_171 = arith.constant 0 : index
    %529 = vector.load %arg14[%c0_170, %c0_171] : memref<64x256xbf16, #tpu.memory_space<vmem>>, vector<64x256xbf16>
    %530 = arith.truncf %528 : vector<32x64xf32> to vector<32x64xbf16>
    %cst_172 = arith.constant dense<0.000000e+00> : vector<32x256xf32>
    %531 = tpu.matmul %530, %529, %cst_172 {dimension_numbers = #tpu.dot_dimension_numbers<[1], [0], [0], [1], [0, 0, 1, 1], [], []>} : vector<32x64xbf16>, vector<64x256xbf16>, vector<32x256xf32> -> vector<32x256xf32>
    %c0_173 = arith.constant 0 : index
    %c0_174 = arith.constant 0 : index
    %532 = vector.load %arg15[%c0_173, %c0_174] : memref<1x256xf32, #tpu.memory_space<vmem>>, vector<1x256xf32>
    %533 = vector.broadcast %532 : vector<1x256xf32> to vector<32x256xf32>
    %534 = arith.addf %531, %533 : vector<32x256xf32>
    %cst_175 = arith.constant 0.000000e+00 : f32
    %535 = vector.broadcast %cst_175 : f32 to vector<32x256xf32>
    %536 = arith.maximumf %534, %535 : vector<32x256xf32>
    %c0_176 = arith.constant 0 : index
    %c0_177 = arith.constant 0 : index
    %537 = vector.load %arg16[%c0_176, %c0_177] : memref<256x64xbf16, #tpu.memory_space<vmem>>, vector<256x64xbf16>
    %538 = arith.truncf %536 : vector<32x256xf32> to vector<32x256xbf16>
    %cst_178 = arith.constant dense<0.000000e+00> : vector<32x64xf32>
    %539 = tpu.matmul %538, %537, %cst_178 {dimension_numbers = #tpu.dot_dimension_numbers<[1], [0], [0], [1], [0, 0, 1, 1], [], []>} : vector<32x256xbf16>, vector<256x64xbf16>, vector<32x64xf32> -> vector<32x64xf32>
    %c0_179 = arith.constant 0 : index
    %c0_180 = arith.constant 0 : index
    %540 = vector.load %arg17[%c0_179, %c0_180] : memref<1x64xf32, #tpu.memory_space<vmem>>, vector<1x64xf32>
    %541 = vector.broadcast %540 : vector<1x64xf32> to vector<32x64xf32>
    %542 = arith.addf %539, %541 : vector<32x64xf32>
    %c0_181 = arith.constant 0 : index
    %c0_182 = arith.constant 0 : index
    %543 = vector.load %arg18[%c0_181, %c0_182] : memref<64x128xbf16, #tpu.memory_space<vmem>>, vector<64x128xbf16>
    %544 = arith.truncf %542 : vector<32x64xf32> to vector<32x64xbf16>
    %cst_183 = arith.constant dense<0.000000e+00> : vector<32x128xf32>
    %545 = tpu.matmul %544, %543, %cst_183 {dimension_numbers = #tpu.dot_dimension_numbers<[1], [0], [0], [1], [0, 0, 1, 1], [], []>} : vector<32x64xbf16>, vector<64x128xbf16>, vector<32x128xf32> -> vector<32x128xf32>
    %c0_184 = arith.constant 0 : index
    %c0_185 = arith.constant 0 : index
    %546 = vector.load %arg19[%c0_184, %c0_185] : memref<1x128xf32, #tpu.memory_space<vmem>>, vector<1x128xf32>
    %547 = vector.broadcast %546 : vector<1x128xf32> to vector<32x128xf32>
    %548 = arith.addf %545, %547 : vector<32x128xf32>
    %c0_186 = arith.constant 0 : index
    %c0_187 = arith.constant 0 : index
    %549 = vector.load %arg20[%c0_186, %c0_187] : memref<32x128xf32, #tpu.memory_space<vmem>>, vector<32x128xf32>
    tpu.vector_store %arg20[%c0_186, %c0_187], %548 {strides = array<i32>} : memref<32x128xf32, #tpu.memory_space<vmem>>, vector<32x128xf32>,
    return
  }
}

</mosaic_0001>

<bundles_post_ra>
// kernel: tpu_custom_call.1
= control target key start
LH: loop header
LB: loop body
LE: loop exit
PB: predicated region body
PF: predicated region fallthrough
CT: control target
= control target key end

     0   :  { %s6309_s0 = inlined_call_operand.vmem [shape: f32[32,64], index: 0, kind: input, shape index: {}]   ;;  %s6310_s1 = inlined_call_operand.vmem [shape: f32[2,1,64], index: 1, kind: input, shape index: {}]   ;;  %s6311_s2 = inlined_call_operand.vmem [shape: f32[2,1,64], index: 2, kind: input, shape index: {}]   ;;  %s6312_s3 = inlined_call_operand.vmem [shape: bf16[2,64,192], index: 3, kind: input, shape index: {}]   ;;  %s6313_s4 = inlined_call_operand.vmem [shape: bf16[2,64,64], index: 4, kind: input, shape index: {}]   ;;  %s6314_s5 = inlined_call_operand.vmem [shape: f32[2,1,64], index: 5, kind: input, shape index: {}]   ;;  %s6315_s6 = inlined_call_operand.vmem [shape: f32[2,1,64], index: 6, kind: input, shape index: {}]   ;;  %s6316_s7 = inlined_call_operand.vmem [shape: f32[2,1,64], index: 7, kind: input, shape index: {}]   ;;  %s6317_s8 = inlined_call_operand.vmem [shape: bf16[2,64,256], index: 8, kind: input, shape index: {}]   ;;  %s6318_s9 = inlined_call_operand.vmem [shape: f32[2,1,256], index: 9, kind: input, shape index: {}]   ;;  %s6319_s10 = inlined_call_operand.vmem [shape: bf16[2,256,64], index: 10, kind: input, shape index: {}]   ;;  %s6320_s11 = inlined_call_operand.vmem [shape: f32[2,1,64], index: 11, kind: input, shape index: {}]   ;;  %s6321_s12 = inlined_call_operand.vmem [shape: f32[1,64], index: 12, kind: input, shape index: {}]   ;;  %s6322_s13 = inlined_call_operand.vmem [shape: f32[1,64], index: 13, kind: input, shape index: {}]   ;;  %s6323_s14 = inlined_call_operand.vmem [shape: bf16[64,256], index: 14, kind: input, shape index: {}]   ;;  %s6324_s15 = inlined_call_operand.vmem [shape: f32[1,256], index: 15, kind: input, shape index: {}]   ;;  %s6325_s16 = inlined_call_operand.vmem [shape: bf16[256,64], index: 16, kind: input, shape index: {}]   ;;  %s6326_s17 = inlined_call_operand.vmem [shape: f32[1,64], index: 17, kind: input, shape index: {}]   ;;  %s6327_s18 = inlined_call_operand.vmem [shape: bf16[64,128], index: 18, kind: input, shape index: {}]   ;;  %s6328_s19 = inlined_call_operand.vmem [shape: f32[1,128], index: 19, kind: input, shape index: {}]   ;;  %s6329_s20 = inlined_call_operand.hbm [shape: f32[32,128], index: 20, kind: output, shape index: {}]  }
   0x1   :  { %6347 = sst [smem:[#allocation5_spill]] %s6309_s0 }
   0x2   :  { %6348 = sst [smem:[#allocation6_spill]] %s6310_s1 }
   0x3   :  { %6349 = sst [smem:[#allocation7_spill]] %s6311_s2 }
   0x4   :  { %6350 = sst [smem:[#allocation8_spill]] %s6312_s3 }
   0x5   :  { %6351 = sst [smem:[#allocation9_spill]] %s6313_s4 }
   0x6   :  { %s6352_s23 = sld [smem:[#allocation5_spill]]  ;;  %vm82_vm0 = vcmask 523264  }
   0xc   :  { %v67_v0 = vld [vmem:[%s6352_s23] sm:$0xff]  ;;  %v68_v1 = vld [vmem:[%s6352_s23 + $0x8] sm:$0xff] }
   0xd   :  { %v83_v2 = vsel %vm82_vm0, %v67_v0, 0.0  ;;  %v86_v3 = vsel %vm82_vm0, %v68_v1, 0.0 }
   0xe   :  { %84 = vadd.xlane.f32.xlu0 %v83_v2 }
  0x12   :  { %87 = vadd.xlane.f32.xlu0 %v86_v3 }
  0x13   :  { %25 = vsyncpa [#allocation3], 0  ;;  %s6353_s26 = sld [smem:[#allocation8_spill]]  ;;  %v5021_v18 = vmov 0   ;;  %s6354_s29 = sld [smem:[#allocation6_spill]]  ;;  %v5022_v40 = vmov 0.0   ;;  %v71_v51 = vlaneseq }
  0x14   :  { %244 = vmatprep.mubr.bf16.mxu0 %v5021_v18  ;;  %s6355_s21 = sld [smem:[#allocation7_spill]]  ;;  %4404 = vmatprep.subr.bf16.mxu1 %v5022_v40  ;;  %vm5023_vm1 = vmmov 0   ;;  %s6345_s1 = smov 64   ;;  %vm269_vm2 = vcmask 130048   ;;  %v69_v49 = vld [vmem:[%s6352_s23 + $0x10] sm:$0xff]  ;;  %vm775_vm5 = vcmask 261120  }
  0x15   :  { %4406 = vmatprep.mubr.msk.bf16.mxu1 %vm5023_vm1, %v5022_v40  ;;  %s6339_s22 = smov 112   ;;  %v89_v50 = vsel %vm82_vm0, %v69_v49, 0.0  ;;  %v5215_v52 = vshrl.u32 %v71_v51, 7  ;;  %v75_v53 = vand.u32 127, %v71_v51  ;;  %v5026_v55 = vmov -1e+30  }
  0x16   :  { %s5027_s25 = smov 48   ;;  %s6337_s28 = smov 96   ;;  %vm778_vm6 = vcmask 392192  }
  0x17   :  { %v73_v54 = vadd.s32 8, %v5215_v52  ;;  %vm76_vm3 = vcmp.ge.s32.totalorder %v5215_v52, %v75_v53  ;;  %s6341_s4 = smov 16   ;;  %s6335_s30 = smov 80  }
  0x18   :  { %v5219_v56 = vsel %vm76_vm3, 0.0, %v5026_v55  ;;  %s6343_s0 = smov 32   ;;  %s6356_s3 = sld [smem:[#allocation9_spill]] }
  0x19   :  { %v4706_v14 = vld [vmem:[%s6353_s26 + $0x4] ss:$8 sps:$4 sm:$0xff]   ;;  %v4708_v15 = vld [vmem:[%s6353_s26] ss:$8 sps:$4 sm:$0xff]   ;;  %v4709_v16 = vld [vmem:[%s6353_s26 + $0x14] ss:$8 sps:$4 sm:$0xff]   ;;  %vm77_vm4 = vcmp.ge.s32.totalorder %v73_v54, %v75_v53 }
  0x1a   :  { %212 = vmatprep.subr.bf16.mxu0 %v4706_v14  ;;  %v4711_v17 = vld [vmem:[%s6353_s26 + $0x10] ss:$8 sps:$4 sm:$0xff]   ;;  %v4712_v19 = vld [vmem:[%s6353_s26 + $0x24] ss:$8 sps:$4 sm:$0xff]   ;;  %v4714_v20 = vld [vmem:[%s6353_s26 + $0x20] ss:$8 sps:$4 sm:$0xff]  }
  0x1b   :  { %213 = vmatpush1.bf16.msra.mxu0 %v4708_v15  ;;  %v4715_v21 = vld [vmem:[%s6353_s26 + $0x34] ss:$8 sps:$4 sm:$0xff]   ;;  %v4717_v22 = vld [vmem:[%s6353_s26 + $0x30] ss:$8 sps:$4 sm:$0xff]   ;;  %v5178_v31 = vld [vmem:[%s6354_s29] ss:$0 sm:$0xff] }
  0x1c   :  { %214 = vmatprep.subr.bf16.mxu0 %v4709_v16  ;;  %v5184_v35 = vld [vmem:[%s6355_s21] ss:$0 sm:$0xff]  ;;  %v5221_v58 = vsel %vm77_vm4, 0.0, %v5026_v55  ;;  %s5032_s27 = smov [#allocation2]  }
  0x1d   :  { %s4000_s24 = sshll.u32 %s5032_s27, 4  ;;  %s4001_s24 = int_to_ptr.vmem [resolvable:$true] %s4000_s24 }
  0x1e   :  { %s4997_s2 = scalar_lea.vmem %s4001_s24, 512  ;;  %p5002_p1 = scmp.lt.s32.totalorder %s4001_s24, %s4001_s24 }
  0x1f   :  { %215 = vmatpush1.bf16.msra.mxu0 %v4711_v17  ;;  %p4998_p0 = scmp.ne.s32.totalorder %s4001_s24, %s4997_s2  ;;  %p5003_p2 = scmp.lt.s32.totalorder %s4997_s2, %s4997_s2 }
  0x20   :  { %216 = vmatprep.subr.bf16.mxu0 %v4712_v19  ;;  %v5235_v19 = vld [vmem:[%s6352_s23 + $0x18] sm:$0xff] }
  0x21   :  { %p5004_p3 = por %p5003_p2, %p5002_p1 }
  0x23   :  { %217 = vmatpush1.bf16.msra.mxu0 %v4714_v20  ;;  %v92_v20 = vsel %vm82_vm0, %v5235_v19, 0.0  ;;  %p5005_p4 = pnand %p5004_p3, %p4998_p0 }
  0x24   :  { %218 = vmatprep.subr.bf16.mxu0 %v4715_v21 }
  0x27   :  { %219 = vmatpush1.bf16.msra.mxu0 %v4717_v22 }
  0x28   :  { %4434 = vmatprep.subr.bf16.mxu0 %v5022_v40 }
  0x9b   :  { %v85_v4 = vpop.xlane.xlu0 %84 }
  0x9c   :  { %v96_v5 = vmul.f32 0.015625, %v85_v4 }
  0x9e   :  { %v100_v6 = vsub.f32 %v67_v0, %v96_v5 }
  0x9f   :  { %v88_v7 = vpop.xlane.xlu0 %87 }
  0xa0   :  { %v97_v8 = vmul.f32 0.015625, %v88_v7  ;;  %v104_v9 = vmul.f32 %v100_v6, %v100_v6 }
  0xa2   :  { %v101_v10 = vsub.f32 %v68_v1, %v97_v8  ;;  %v108_v11 = vsel %vm82_vm0, %v104_v9, 0.0 }
  0xa3   :  { %109 = vadd.xlane.f32.xlu1 %v108_v11 }
  0xa4   :  { %v105_v12 = vmul.f32 %v101_v10, %v101_v10 }
  0xa6   :  { %v111_v13 = vsel %vm82_vm0, %v105_v12, 0.0 }
  0xa7   :  { %112 = vadd.xlane.f32.xlu1 %v111_v13 }
 0x130   :  { %v110_v23 = vpop.xlane.xlu1 %109 }
 0x131   :  { %v120_v24 = vmul.f32 0.015625, %v110_v23 }
 0x133   :  { %v124_v25 = vadd.f32 1e-05, %v120_v24 }
 0x134   :  { %v113_v26 = vpop.xlane.xlu1 %112 }
 0x135   :  { %4826 = vrsqrt.f32 %v124_v25  ;;  %v121_v27 = vmul.f32 0.015625, %v113_v26 }
 0x137   :  { %v125_v28 = vadd.f32 1e-05, %v121_v27 }
 0x139   :  { %4828 = vrsqrt.f32 %v125_v28 }
 0x13f   :  { %v4827_v29 = vpop.eup %4826 }
 0x140   :  { %v132_v30 = vmul.f32 %v4827_v29, %v100_v6 }
 0x142   :  { %v142_v34 = vmul.f32 %v5178_v31, %v132_v30 }
 0x143   :  { %v4829_v32 = vpop.eup %4828 }
 0x144   :  { %v133_v33 = vmul.f32 %v4829_v32, %v101_v10  ;;  %v152_v37 = vadd.f32 %v5184_v35, %v142_v34 }
 0x146   :  { %v143_v36 = vmul.f32 %v5178_v31, %v133_v33 }
 0x148   :  { %v153_v38 = vadd.f32 %v5184_v35, %v143_v36 }
 0x14a   :  { %v164_v39 = vpack.c.bf16 %v153_v38, %v152_v37 }
 0x14c   :  { %4021 = vmatmul.mubr.msk.bf16.vlgmr.msra.gmra.mrb[0].mxu0 %vm82_vm0, %v164_v39 }
 0x14d   :  { %254 = vmatprep.mubr.bf16.mxu0 %v5021_v18 }
 0x21f   :  { %v246_v41 = vpop.f32.mrb[0].mxu0 }
 0x220   :  { %v248_v42 = vpop.f32.mrb[1].mxu0 }
 0x221   :  { %v250_v43 = vpop.f32.mrb[2].mxu0 }
 0x222   :  { %v5195_v44 = vpack.c.bf16 %v250_v43, %v246_v41  ;;  %v252_v45 = vpop.f32.mrb[3].mxu0 }
 0x223   :  { %v5197_v46 = vpack.c.bf16 %v252_v45, %v248_v42 }
 0x224   :  { %267 = vrot.lane.b32.xlu0 %v5195_v44, %s6345_s1 }
 0x228   :  { %385 = vrot.lane.b32.xlu0 %v5195_v44, %s6339_s22 }
 0x247   :  { %90 = vadd.xlane.f32.xlu0 %v89_v50 }
 0x296   :  { %v268_v47 = vpop.permute.xlu0 %267 }
 0x297   :  { %v274_v48 = vsel %vm269_vm2, %v268_v47, 0 }
 0x298   :  { %4405 = vmatpush3.bf16.xpose.msra.mxu1 %v274_v48 }
 0x299   :  { %4410 = vmatprep.subr.bf16.mxu1 %v5022_v40 }
 0x29a   :  { %v386_v2 = vpop.permute.xlu0 %385 }
 0x29f   :  { %4407 = vmatmul.mubr.msk.bf16.vlgmr.msra.gmra.mrb[0].mxu1 %vm269_vm2, %v5195_v44 }
 0x2a0   :  { %4411 = vmatpush3.bf16.msra.mxu1 %v5197_v46  ;;  %4412 = vmatprep.mubr.msk.bf16.mxu1 %vm5023_vm1, %v5022_v40 }
 0x2a1   :  { %4416 = vmatprep.subr.bf16.mxu1 %v5022_v40 }
 0x2d4   :  { %v91_v3 = vpop.xlane.xlu0 %90 }
 0x2d5   :  { %v98_v4 = vmul.f32 0.015625, %v91_v3 }
 0x2d7   :  { %v102_v5 = vsub.f32 %v69_v49, %v98_v4 }
 0x2d9   :  { %v106_v6 = vmul.f32 %v102_v5, %v102_v5 }
 0x2db   :  { %v114_v7 = vsel %vm82_vm0, %v106_v6, 0.0 }
 0x2dc   :  { %115 = vadd.xlane.f32.xlu0 %v114_v7 }
 0x369   :  { %v116_v38 = vpop.xlane.xlu0 %115 }
 0x36a   :  { %v122_v39 = vmul.f32 0.015625, %v116_v38 }
 0x36c   :  { %v126_v41 = vadd.f32 1e-05, %v122_v39 }
 0x372   :  { %v310_v57 = vpop.f32.mrb[0].mxu1 }
 0x373   :  { %v311_v59 = vadd.f32 %v310_v57, %v5219_v56  ;;  %v4408_v60 = vpop.f32.mrb[1].mxu1 }
 0x374   :  { %v313_v61 = vpop.f32.mrb[2].mxu1 }
 0x375   :  { %v314_v62 = vadd.f32 %v313_v61, %v5221_v58  ;;  %v4409_v63 = vpop.f32.mrb[3].mxu1  ;;  %v317_v0 = vsel %vm269_vm2, %v311_v59, -inf }
 0x376   :  { %318 = vmax.xlane.f32.xlu1 %v317_v0 }
 0x377   :  { %v320_v1 = vsel %vm269_vm2, %v314_v62, -inf }
 0x37a   :  { %321 = vmax.xlane.f32.xlu1 %v320_v1 }
 0x403   :  { %v319_v8 = vpop.xlane.xlu1 %318 }
 0x404   :  { %v323_v9 = vsub.f32 %v311_v59, %v319_v8 }
 0x406   :  { %v325_v10 = vmul.f32 1.442695, %v323_v9 }
 0x407   :  { %v322_v11 = vpop.xlane.xlu1 %321 }
 0x408   :  { %4830 = vpow2.f32 %v325_v10  ;;  %v324_v12 = vsub.f32 %v314_v62, %v322_v11 }
 0x40a   :  { %v327_v13 = vmul.f32 1.442695, %v324_v12 }
 0x40c   :  { %4832 = vpow2.f32 %v327_v13 }
 0x412   :  { %v4831_v14 = vpop.eup %4830 }
 0x413   :  { %v329_v15 = vsel %vm269_vm2, %v4831_v14, 0.0 }
 0x414   :  { %330 = vadd.xlane.f32.xlu1 %v329_v15 }
 0x416   :  { %v4833_v16 = vpop.eup %4832 }
 0x417   :  { %v332_v17 = vsel %vm269_vm2, %v4833_v16, 0.0 }
 0x418   :  { %333 = vadd.xlane.f32.xlu1 %v332_v17 }
 0x429   :  { %387 = vrot.lane.b32.xlu1 %v5195_v44, %s5027_s25 }
 0x44d   :  { %93 = vadd.xlane.f32.xlu1 %v92_v20 }
 0x45e   :  { %460 = vrot.lane.b32.xlu1 %v5197_v46, %s6339_s22 }
 0x4a1   :  { %v331_v21 = vpop.xlane.xlu1 %330 }
 0x4a2   :  { %4834 = vrcp.f32 %v331_v21 }
 0x4a5   :  { %v334_v22 = vpop.xlane.xlu1 %333 }
 0x4a6   :  { %4836 = vrcp.f32 %v334_v22 }
 0x4a7   :  { %4838 = vrsqrt.f32 %v126_v41 }
 0x4a9   :  { %v388_v27 = vpop.permute.xlu1 %387 }
 0x4aa   :  { %v393_v29 = vsel %vm269_vm2, %v388_v27, 0 }
 0x4ac   :  { %v4835_v23 = vpop.eup %4834 }
 0x4ad   :  { %v337_v25 = vmul.f32 %v4835_v23, %v4831_v14 }
 0x4b0   :  { %v4837_v24 = vpop.eup %4836 }
 0x4b1   :  { %v338_v26 = vmul.f32 %v4837_v24, %v4833_v16  ;;  %v4839_v47 = vpop.eup %4838 }
 0x4b2   :  { %v134_v48 = vmul.f32 %v4839_v47, %v102_v5 }
 0x4b3   :  { %v339_v28 = vpack.c.bf16 %v338_v26, %v337_v25 }
 0x4b4   :  { %v144_v51 = vmul.f32 %v5178_v31, %v134_v48 }
 0x4b5   :  { %4413 = vmatmul.mubr.msk.bf16.vlgmr.msra.gmra.mrb[4].mxu1 %vm269_vm2, %v339_v28 }
 0x4b6   :  { %4417 = vmatpush3.bf16.xpose.msra.mxu1 %v393_v29  ;;  %4418 = vmatprep.mubr.msk.bf16.mxu1 %vm5023_vm1, %v5022_v40  ;;  %v154_v54 = vadd.f32 %v5184_v35, %v144_v51 }
 0x4b7   :  { %4422 = vmatprep.subr.bf16.mxu1 %v5022_v40 }
 0x4bd   :  { %4419 = vmatmul.mubr.msk.bf16.vlgmr.msra.gmra.mrb[8].mxu1 %vm269_vm2, %v386_v2 }
 0x4be   :  { %4424 = vmatprep.mubr.msk.bf16.mxu1 %vm5023_vm1, %v5022_v40 }
 0x4da   :  { %v94_v30 = vpop.xlane.xlu1 %93 }
 0x4db   :  { %v99_v32 = vmul.f32 0.015625, %v94_v30 }
 0x4dd   :  { %v103_v33 = vsub.f32 %v5235_v19, %v99_v32 }
 0x4de   :  { %v461_v34 = vpop.permute.xlu1 %460 }
 0x4df   :  { %4423 = vmatpush3.bf16.msra.mxu1 %v461_v34  ;;  %v107_v36 = vmul.f32 %v103_v33, %v103_v33 }
 0x4e0   :  { %4428 = vmatprep.subr.bf16.mxu1 %v5022_v40 }
 0x4e1   :  { %v117_v37 = vsel %vm82_vm0, %v107_v36, 0.0 }
 0x4e2   :  { %118 = vadd.xlane.f32.xlu0 %v117_v37 }
 0x56f   :  { %v119_v42 = vpop.xlane.xlu0 %118 }
 0x570   :  { %v123_v43 = vmul.f32 0.015625, %v119_v42 }
 0x572   :  { %v127_v45 = vadd.f32 1e-05, %v123_v43 }
 0x574   :  { %4840 = vrsqrt.f32 %v127_v45 }
 0x57e   :  { %v4841_v49 = vpop.eup %4840 }
 0x57f   :  { %v135_v50 = vmul.f32 %v4841_v49, %v103_v33 }
 0x581   :  { %v145_v53 = vmul.f32 %v5178_v31, %v135_v50 }
 0x583   :  { %v155_v55 = vadd.f32 %v5184_v35, %v145_v53 }
 0x585   :  { %v165_v57 = vpack.c.bf16 %v155_v55, %v154_v54 }
 0x587   :  { %4022 = vmatmul.mubr.msk.bf16.gmra.mrb[4].mxu0 %vm82_vm0, %v165_v57 }
 0x588   :  { %v5257_v59 = vpop.f32.mrb[4].mxu1  ;;  %4436 = vmatprep.mubr.msk.bf16.mxu0 %vm5023_vm1, %v5022_v40 }
 0x589   :  { %v4414_v60 = vpop.f32.mrb[5].mxu1 }
 0x58a   :  { %v5261_v61 = vpop.f32.mrb[6].mxu1 }
 0x58b   :  { %v4415_v62 = vpop.f32.mrb[7].mxu1 }
 0x590   :  { %v429_v63 = vpop.f32.mrb[8].mxu1 }
 0x591   :  { %v430_v0 = vadd.f32 %v429_v63, %v5219_v56  ;;  %v4420_v31 = vpop.f32.mrb[9].mxu1 }
 0x592   :  { %v432_v1 = vpop.f32.mrb[10].mxu1 }
 0x593   :  { %v433_v2 = vadd.f32 %v432_v1, %v5221_v58  ;;  %v4421_v35 = vpop.f32.mrb[11].mxu1  ;;  %v436_v3 = vsel %vm269_vm2, %v430_v0, -inf }
 0x594   :  { %437 = vmax.xlane.f32.xlu0 %v436_v3 }
 0x595   :  { %v439_v4 = vsel %vm269_vm2, %v433_v2, -inf }
 0x598   :  { %440 = vmax.xlane.f32.xlu0 %v439_v4 }
 0x621   :  { %v438_v5 = vpop.xlane.xlu0 %437 }
 0x622   :  { %v442_v6 = vsub.f32 %v430_v0, %v438_v5 }
 0x624   :  { %v444_v7 = vmul.f32 1.442695, %v442_v6 }
 0x625   :  { %v441_v8 = vpop.xlane.xlu0 %440 }
 0x626   :  { %4842 = vpow2.f32 %v444_v7  ;;  %v443_v9 = vsub.f32 %v433_v2, %v441_v8 }
 0x628   :  { %v446_v10 = vmul.f32 1.442695, %v443_v9 }
 0x62a   :  { %4844 = vpow2.f32 %v446_v10 }
 0x630   :  { %v4843_v11 = vpop.eup %4842 }
 0x631   :  { %v448_v12 = vsel %vm269_vm2, %v4843_v11, 0.0 }
 0x632   :  { %449 = vadd.xlane.f32.xlu1 %v448_v12 }
 0x634   :  { %v4845_v13 = vpop.eup %4844 }
 0x635   :  { %v451_v14 = vsel %vm269_vm2, %v4845_v13, 0.0 }
 0x636   :  { %452 = vadd.xlane.f32.xlu0 %v451_v14 }
 0x643   :  { %507 = vrot.lane.b32.xlu1 %v5195_v44, %s6337_s28 }
 0x647   :  { %630 = vrot.lane.b32.xlu1 %v5195_v44, %s6341_s4 }
 0x64b   :  { %628 = vrot.lane.b32.xlu1 %v5195_v44, %s6335_s30 }
 0x64c   :  { %509 = vrot.lane.b32.xlu0 %v5195_v44, %s6343_s0 }
 0x65a   :  { %v256_v15 = vpop.f32.mrb[4].mxu0 }
 0x65b   :  { %v258_v16 = vpop.f32.mrb[5].mxu0 }
 0x65c   :  { %v260_v17 = vpop.f32.mrb[6].mxu0 }
 0x65d   :  { %v781_v20 = vpack.c.bf16 %v260_v17, %v256_v15  ;;  %v262_v21 = vpop.f32.mrb[7].mxu0 }
 0x65e   :  { %v5277_v22 = vpack.c.bf16 %v262_v21, %v258_v16 }
 0x65f   :  { %902 = vrot.lane.b32.xlu1 %v781_v20, %s5027_s25  ;;  %783 = vrot.lane.b32.xlu0 %v781_v20, %s6345_s1  ;;  %s6362_s1 = smov 16  }
 0x663   :  { %1024 = vrot.lane.b32.xlu1 %v781_v20, %s6343_s0  ;;  %900 = vrot.lane.b32.xlu0 %v781_v20, %s6339_s22 }
 0x667   :  { %1145 = vrot.lane.b32.xlu1 %v781_v20, %s6341_s4  ;;  %1022 = vrot.lane.b32.xlu0 %v781_v20, %s6337_s28 }
 0x66b   :  { %1143 = vrot.lane.b32.xlu0 %v781_v20, %s6335_s30 }
 0x6bf   :  { %v450_v44 = vpop.xlane.xlu1 %449 }
 0x6c0   :  { %4846 = vrcp.f32 %v450_v44 }
 0x6c3   :  { %v453_v23 = vpop.xlane.xlu0 %452  ;;  %v508_v30 = vpop.permute.xlu1 %507 }
 0x6c4   :  { %4848 = vrcp.f32 %v453_v23 }
 0x6c7   :  { %v510_v28 = vpop.permute.xlu0 %509  ;;  %v631_v33 = vpop.permute.xlu1 %630 }
 0x6c8   :  { %v515_v32 = vsel %vm269_vm2, %v510_v28, 0  ;;  %v636_v34 = vsel %vm269_vm2, %v631_v33, 0 }
 0x6ca   :  { %v4847_v24 = vpop.eup %4846 }
 0x6cb   :  { %v456_v26 = vmul.f32 %v4847_v24, %v4843_v11  ;;  %v629_v37 = vpop.permute.xlu1 %628 }
 0x6ce   :  { %v4849_v25 = vpop.eup %4848 }
 0x6cf   :  { %v457_v27 = vmul.f32 %v4849_v25, %v4845_v13 }
 0x6d1   :  { %v458_v29 = vpack.c.bf16 %v457_v27, %v456_v26  ;;  %v784_v36 = vpop.permute.xlu0 %783  ;;  %v903_v39 = vpop.permute.xlu1 %902 }
 0x6d2   :  { %v789_v38 = vsel %vm269_vm2, %v784_v36, 0  ;;  %v908_v41 = vsel %vm269_vm2, %v903_v39, 0 }
 0x6d3   :  { %4425 = vmatmul.mubr.msk.bf16.vlgmr.msra.gmra.mrb[12].mxu1 %vm269_vm2, %v458_v29 }
 0x6d4   :  { %4429 = vmatpush3.bf16.xpose.msra.mxu1 %v515_v32  ;;  %4430 = vmatprep.mubr.msk.bf16.mxu1 %vm5023_vm1, %v5022_v40 }
 0x6d5   :  { %4440 = vmatprep.subr.bf16.mxu1 %v5022_v40  ;;  %v1025_v42 = vpop.permute.xlu1 %1024  ;;  %v901_v43 = vpop.permute.xlu0 %900 }
 0x6d6   :  { %v1030_v45 = vsel %vm269_vm2, %v1025_v42, 0 }
 0x6d9   :  { %v1146_v47 = vpop.permute.xlu1 %1145  ;;  %v1023_v48 = vpop.permute.xlu0 %1022 }
 0x6da   :  { %v1151_v49 = vsel %vm269_vm2, %v1146_v47, 0 }
 0x6db   :  { %4431 = vmatmul.mubr.msk.bf16.vlgmr.msra.gmra.mrb[16].mxu1 %vm269_vm2, %v508_v30 }
 0x6dc   :  { %4441 = vmatpush3.bf16.xpose.msra.mxu1 %v636_v34  ;;  %4442 = vmatprep.mubr.msk.bf16.mxu1 %vm5023_vm1, %v5022_v40 }
 0x6dd   :  { %4452 = vmatprep.subr.bf16.mxu1 %v5022_v40  ;;  %v1144_v50 = vpop.permute.xlu0 %1143 }
 0x6e3   :  { %4443 = vmatmul.mubr.msk.bf16.vlgmr.msra.gmra.mrb[20].mxu1 %vm269_vm2, %v629_v37 }
 0x6e4   :  { %4453 = vmatpush3.bf16.xpose.msra.mxu1 %v789_v38  ;;  %4454 = vmatprep.mubr.msk.bf16.mxu1 %vm5023_vm1, %v5022_v40 }
 0x6e5   :  { %4464 = vmatprep.subr.bf16.mxu1 %v5022_v40 }
 0x6eb   :  { %4455 = vmatmul.mubr.msk.bf16.vlgmr.msra.gmra.mrb[24].mxu1 %vm269_vm2, %v781_v20 }
 0x6ec   :  { %4465 = vmatpush3.bf16.xpose.msra.mxu1 %v908_v41  ;;  %4466 = vmatprep.mubr.msk.bf16.mxu1 %vm5023_vm1, %v5022_v40 }
 0x6ed   :  { %4476 = vmatprep.subr.bf16.mxu1 %v5022_v40 }
 0x6f3   :  { %4467 = vmatmul.mubr.msk.bf16.vlgmr.msra.gmra.mrb[28].mxu1 %vm269_vm2, %v901_v43 }
 0x6f4   :  { %4477 = vmatpush3.bf16.xpose.msra.mxu1 %v1030_v45  ;;  %4478 = vmatprep.mubr.msk.bf16.mxu1 %vm5023_vm1, %v5022_v40 }
 0x6f5   :  { %4488 = vmatprep.subr.bf16.mxu1 %v5022_v40 }
 0x6fb   :  { %4479 = vmatmul.mubr.msk.bf16.vlgmr.msra.gmra.mrb[32].mxu1 %vm269_vm2, %v1023_v48 }
 0x6fc   :  { %4489 = vmatpush3.bf16.xpose.msra.mxu1 %v1151_v49  ;;  %4490 = vmatprep.mubr.msk.bf16.mxu1 %vm5023_vm1, %v5022_v40 }
 0x703   :  { %4491 = vmatmul.mubr.msk.bf16.vlgmr.msra.gmra.mrb[36].mxu1 %vm269_vm2, %v1144_v50 }
 0x7a6   :  { %v5316_v51 = vpop.f32.mrb[12].mxu1 }
 0x7a7   :  { %v4426_v53 = vpop.f32.mrb[13].mxu1 }
 0x7a8   :  { %v5318_v54 = vpop.f32.mrb[14].mxu1 }
 0x7a9   :  { %v4646_v55 = vpack.i.bf16 %v5318_v54, %v5316_v51  ;;  %v4427_v57 = vpop.f32.mrb[15].mxu1 }
 0x7ae   :  { %v551_v60 = vpop.f32.mrb[16].mxu1 }
 0x7af   :  { %v5323_v62 = vadd.f32 %v551_v60, %v5219_v56  ;;  %v4432_v63 = vpop.f32.mrb[17].mxu1 }
 0x7b0   :  { %v554_v0 = vpop.f32.mrb[18].mxu1 }
 0x7b1   :  { %v5326_v31 = vadd.f32 %v554_v0, %v5221_v58  ;;  %v4433_v1 = vpop.f32.mrb[19].mxu1  ;;  %v558_v2 = vsel %vm269_vm2, %v5323_v62, -inf }
 0x7b2   :  { %559 = vmax.xlane.f32.xlu1 %v558_v2 }
 0x7b3   :  { %v561_v35 = vsel %vm269_vm2, %v5326_v31, -inf }
 0x7b4   :  { %562 = vmax.xlane.f32.xlu0 %v561_v35 }
 0x7b6   :  { %v672_v3 = vpop.f32.mrb[20].mxu1 }
 0x7b7   :  { %v673_v4 = vadd.f32 %v672_v3, %v5219_v56  ;;  %v4444_v5 = vpop.f32.mrb[21].mxu1 }
 0x7b8   :  { %v675_v6 = vpop.f32.mrb[22].mxu1 }
 0x7b9   :  { %v5334_v7 = vadd.f32 %v675_v6, %v5221_v58  ;;  %v4445_v8 = vpop.f32.mrb[23].mxu1  ;;  %v679_v9 = vsel %vm269_vm2, %v673_v4, -inf }
 0x7ba   :  { %680 = vmax.xlane.f32.xlu0 %v679_v9 }
 0x7bb   :  { %v682_v10 = vsel %vm269_vm2, %v5334_v7, -inf }
 0x7be   :  { %683 = vmax.xlane.f32.xlu0 %v682_v10  ;;  %v825_v11 = vpop.f32.mrb[24].mxu1 }
 0x7bf   :  { %v826_v12 = vadd.f32 %v825_v11, %v5219_v56  ;;  %v4456_v13 = vpop.f32.mrb[25].mxu1 }
 0x7c0   :  { %v828_v14 = vpop.f32.mrb[26].mxu1 }
 0x7c1   :  { %v5341_v15 = vadd.f32 %v828_v14, %v5221_v58  ;;  %v4457_v16 = vpop.f32.mrb[27].mxu1  ;;  %v832_v17 = vsel %vm269_vm2, %v826_v12, -inf }
 0x7c2   :  { %833 = vmax.xlane.f32.xlu1 %v832_v17 }
 0x7c3   :  { %v835_v20 = vsel %vm269_vm2, %v5341_v15, -inf }
 0x7c4   :  { %836 = vmax.xlane.f32.xlu0 %v835_v20 }
 0x7c6   :  { %v944_v21 = vpop.f32.mrb[28].mxu1 }
 0x7c7   :  { %v945_v44 = vadd.f32 %v944_v21, %v5219_v56  ;;  %v4468_v23 = vpop.f32.mrb[29].mxu1 }
 0x7c8   :  { %v947_v24 = vpop.f32.mrb[30].mxu1 }
 0x7c9   :  { %v5348_v25 = vadd.f32 %v947_v24, %v5221_v58  ;;  %v4469_v26 = vpop.f32.mrb[31].mxu1  ;;  %v951_v27 = vsel %vm269_vm2, %v945_v44, -inf }
 0x7ca   :  { %952 = vmax.xlane.f32.xlu1 %v951_v27 }
 0x7cb   :  { %v954_v28 = vsel %vm269_vm2, %v5348_v25, -inf }
 0x7cc   :  { %955 = vmax.xlane.f32.xlu0 %v954_v28 }
 0x7ce   :  { %v1066_v29 = vpop.f32.mrb[32].mxu1 }
 0x7cf   :  { %v5354_v30 = vadd.f32 %v1066_v29, %v5219_v56  ;;  %v4480_v32 = vpop.f32.mrb[33].mxu1 }
 0x7d0   :  { %v1069_v33 = vpop.f32.mrb[34].mxu1 }
 0x7d1   :  { %v5357_v34 = vadd.f32 %v1069_v33, %v5221_v58  ;;  %v4481_v36 = vpop.f32.mrb[35].mxu1  ;;  %v1073_v37 = vsel %vm269_vm2, %v5354_v30, -inf }
 0x7d2   :  { %1074 = vmax.xlane.f32.xlu1 %v1073_v37 }
 0x7d3   :  { %v1076_v38 = vsel %vm269_vm2, %v5357_v34, -inf }
 0x7d4   :  { %1077 = vmax.xlane.f32.xlu0 %v1076_v38 }
 0x7d6   :  { %v1187_v39 = vpop.f32.mrb[36].mxu1 }
 0x7d7   :  { %v5364_v41 = vadd.f32 %v1187_v39, %v5219_v56  ;;  %v4492_v42 = vpop.f32.mrb[37].mxu1 }
 0x7d8   :  { %v1190_v43 = vpop.f32.mrb[38].mxu1 }
 0x7d9   :  { %v5367_v45 = vadd.f32 %v1190_v43, %v5221_v58  ;;  %v4493_v47 = vpop.f32.mrb[39].mxu1  ;;  %v1194_v48 = vsel %vm269_vm2, %v5364_v41, -inf }
 0x7da   :  { %1195 = vmax.xlane.f32.xlu1 %v1194_v48 }
 0x7db   :  { %v1197_v49 = vsel %vm269_vm2, %v5367_v45, -inf }
 0x7dc   :  { %1198 = vmax.xlane.f32.xlu0 %v1197_v49 }
 0x7eb   :  { %581 = vrot.lane.b32.xlu1 %v5197_v46, %s6337_s28 }
 0x83f   :  { %v560_v50 = vpop.xlane.xlu1 %559 }
 0x840   :  { %v564_v53 = vsub.f32 %v5323_v62, %v560_v50 }
 0x841   :  { %v563_v57 = vpop.xlane.xlu0 %562 }
 0x842   :  { %v566_v60 = vmul.f32 1.442695, %v564_v53  ;;  %v565_v63 = vsub.f32 %v5326_v31, %v563_v57 }
 0x844   :  { %4850 = vpow2.f32 %v566_v60  ;;  %v568_v0 = vmul.f32 1.442695, %v565_v63 }
 0x846   :  { %4852 = vpow2.f32 %v568_v0 }
 0x847   :  { %v681_v1 = vpop.xlane.xlu0 %680 }
 0x848   :  { %v685_v2 = vsub.f32 %v673_v4, %v681_v1 }
 0x84a   :  { %v687_v35 = vmul.f32 1.442695, %v685_v2 }
 0x84b   :  { %v684_v24 = vpop.xlane.xlu0 %683 }
 0x84c   :  { %4854 = vpow2.f32 %v687_v35  ;;  %v686_v26 = vsub.f32 %v5334_v7, %v684_v24 }
 0x84e   :  { %v5377_v3 = vpop.eup %4850  ;;  %v689_v28 = vmul.f32 1.442695, %v686_v26 }
 0x84f   :  { %v834_v5 = vpop.xlane.xlu1 %833  ;;  %v570_v6 = vsel %vm269_vm2, %v5377_v3, 0.0 }
 0x850   :  { %v5381_v8 = vpop.eup %4852  ;;  %v838_v62 = vsub.f32 %v826_v12, %v834_v5  ;;  %571 = vadd.xlane.f32.xlu1 %v570_v6 }
 0x851   :  { %v573_v31 = vsel %vm269_vm2, %v5381_v8, 0.0  ;;  %v837_v27 = vpop.xlane.xlu0 %836 }
 0x852   :  { %v840_v9 = vmul.f32 1.442695, %v838_v62  ;;  %574 = vadd.xlane.f32.xlu0 %v573_v31  ;;  %v839_v29 = vsub.f32 %v5341_v15, %v837_v27 }
 0x854   :  { %4856 = vpow2.f32 %v840_v9  ;;  %v842_v33 = vmul.f32 1.442695, %v839_v29 }
 0x856   :  { %v5385_v10 = vpop.eup %4854 }
 0x857   :  { %v953_v4 = vpop.xlane.xlu1 %952  ;;  %v691_v11 = vsel %vm269_vm2, %v5385_v10, 0.0 }
 0x858   :  { %v957_v13 = vsub.f32 %v945_v44, %v953_v4  ;;  %692 = vadd.xlane.f32.xlu1 %v691_v11 }
 0x859   :  { %v956_v32 = vpop.xlane.xlu0 %955 }
 0x85a   :  { %v959_v14 = vmul.f32 1.442695, %v957_v13  ;;  %v958_v36 = vsub.f32 %v5348_v25, %v956_v32 }
 0x85c   :  { %4858 = vpow2.f32 %v959_v14 }
 0x85d   :  { %4860 = vpow2.f32 %v689_v28 }
 0x85e   :  { %v5389_v16 = vpop.eup %4856  ;;  %4862 = vpow2.f32 %v842_v33 }
 0x85f   :  { %v844_v12 = vsel %vm269_vm2, %v5389_v16, 0.0  ;;  %v1075_v17 = vpop.xlane.xlu1 %1074 }
 0x860   :  { %845 = vadd.xlane.f32.xlu1 %v844_v12  ;;  %v1079_v37 = vsub.f32 %v5354_v30, %v1075_v17 }
 0x861   :  { %v1078_v38 = vpop.xlane.xlu0 %1077 }
 0x862   :  { %v1081_v39 = vmul.f32 1.442695, %v1079_v37  ;;  %v1080_v7 = vsub.f32 %v5357_v34, %v1078_v38 }
 0x864   :  { %v1083_v15 = vmul.f32 1.442695, %v1080_v7 }
 0x866   :  { %v5393_v20 = vpop.eup %4858 }
 0x867   :  { %v1196_v21 = vpop.xlane.xlu1 %1195  ;;  %v963_v23 = vsel %vm269_vm2, %v5393_v20, 0.0  ;;  %v4861_v43 = vpop.eup %4860 }
 0x868   :  { %702 = vrot.lane.b32.xlu0 %v5197_v46, %s6335_s30  ;;  %964 = vadd.xlane.f32.xlu1 %v963_v23  ;;  %v961_v46 = vmul.f32 1.442695, %v958_v36  ;;  %v694_v25 = vsel %vm269_vm2, %v4861_v43, 0.0  ;;  %v5409_v48 = vpop.eup %4862  ;;  %v1200_v49 = vsub.f32 %v5364_v41, %v1196_v21 }
 0x869   :  { %v1199_v42 = vpop.xlane.xlu0 %1198  ;;  %v847_v50 = vsel %vm269_vm2, %v5409_v48, 0.0 }
 0x86a   :  { %4864 = vpow2.f32 %v961_v46  ;;  %v1201_v47 = vsub.f32 %v5367_v45, %v1199_v42  ;;  %v1202_v34 = vmul.f32 1.442695, %v1200_v49 }
 0x86b   :  { %v582_v44 = vpop.permute.xlu1 %581  ;;  %4866 = vpow2.f32 %v1081_v39 }
 0x86c   :  { %4435 = vmatpush3.bf16.msra.mxu0 %v582_v44  ;;  %4868 = vpow2.f32 %v1083_v15  ;;  %v1204_v30 = vmul.f32 1.442695, %v1201_v47 }
 0x86d   :  { %4446 = vmatprep.subr.bf16.mxu0 %v5022_v40 }
 0x86e   :  { %4870 = vpow2.f32 %v1204_v30 }
 0x86f   :  { %4872 = vpow2.f32 %v1202_v34 }
 0x874   :  { %v5414_v53 = vpop.eup %4864 }
 0x875   :  { %v966_v45 = vsel %vm269_vm2, %v5414_v53, 0.0  ;;  %v5418_v57 = vpop.eup %4866 }
 0x876   :  { %v1085_v41 = vsel %vm269_vm2, %v5418_v57, 0.0  ;;  %v5422_v60 = vpop.eup %4868 }
 0x877   :  { %v1088_v63 = vsel %vm269_vm2, %v5422_v60, 0.0 }
 0x878   :  { %v5426_v0 = vpop.eup %4870 }
 0x879   :  { %975 = vrot.lane.b32.xlu1 %v5277_v22, %s6339_s22  ;;  %v5428_v1 = vpop.eup %4872  ;;  %v1209_v2 = vsel %vm269_vm2, %v5426_v0, 0.0  ;;  %s6359_s22 = smov 96  }
 0x87a   :  { %v1206_v35 = vsel %vm269_vm2, %v5428_v1, 0.0 }
 0x887   :  { %695 = vadd.xlane.f32.xlu0 %v694_v25 }
 0x88b   :  { %848 = vadd.xlane.f32.xlu0 %v847_v50 }
 0x88f   :  { %967 = vadd.xlane.f32.xlu0 %v966_v45 }
 0x893   :  { %1086 = vadd.xlane.f32.xlu0 %v1085_v41 }
 0x897   :  { %1089 = vadd.xlane.f32.xlu0 %v1088_v63 }
 0x89b   :  { %1210 = vadd.xlane.f32.xlu0 %v1209_v2 }
 0x89d   :  { %1207 = vadd.xlane.f32.xlu1 %v1206_v35 }
 0x8ae   :  { %1217 = vrot.lane.b32.xlu1 %v5277_v22, %s6335_s30 }
 0x8b1   :  { %1096 = vrot.lane.b32.xlu0 %v5277_v22, %s6337_s28  ;;  %s6361_s28 = smov 80  }
 0x8b2   :  { %4647 = vrot.lane.b32.xlu1 %v4646_v55, %s6341_s4 }
 0x8dd   :  { %v572_v5 = vpop.xlane.xlu1 %571 }
 0x8de   :  { %4874 = vrcp.f32 %v572_v5 }
 0x8df   :  { %v575_v6 = vpop.xlane.xlu0 %574 }
 0x8e0   :  { %4876 = vrcp.f32 %v575_v6 }
 0x8e3   :  { %v703_v13 = vpop.permute.xlu0 %702 }
 0x8e5   :  { %v693_v51 = vpop.xlane.xlu1 %692 }
 0x8e6   :  { %4878 = vrcp.f32 %v693_v51 }
 0x8e8   :  { %v4875_v62 = vpop.eup %4874 }
 0x8e9   :  { %v578_v9 = vmul.f32 %v4875_v62, %v5377_v3 }
 0x8ea   :  { %v4877_v31 = vpop.eup %4876 }
 0x8eb   :  { %v579_v4 = vmul.f32 %v4877_v31, %v5381_v8  ;;  %v4718_v31 = vld [vmem:[%s6356_s3] sm:$0xff]  }
 0x8ec   :  { %4500 = vmatprep.subr.bf16.mxu1 %v4718_v31 }
 0x8ed   :  { %v580_v11 = vpack.c.bf16 %v579_v4, %v578_v9  ;;  %v846_v55 = vpop.xlane.xlu1 %845  ;;  %4501 = vmatpush3.bf16.msra.mxu1 %v4718_v31 }
 0x8ef   :  { %4437 = vmatmul.mubr.msk.bf16.vlgmr.msra.gmra.mrb[8].mxu0 %vm269_vm2, %v580_v11  ;;  %v4719_v11 = vld [vmem:[%s6356_s3 + $0x8] sm:$0xff]  }
 0x8f0   :  { %4447 = vmatpush3.bf16.msra.mxu0 %v703_v13  ;;  %4448 = vmatprep.mubr.msk.bf16.mxu0 %vm5023_vm1, %v5022_v40  ;;  %v4879_v8 = vpop.eup %4878 }
 0x8f1   :  { %4458 = vmatprep.subr.bf16.mxu0 %v5022_v40  ;;  %v699_v17 = vmul.f32 %v4879_v8, %v5385_v10  ;;  %4502 = vmatprep.subr.bf16.mxu1 %v4719_v11  ;;  %v4721_v8 = vld [vmem:[%s6356_s3 + $0x18] sm:$0xff]  }
 0x8f2   :  { %4503 = vmatpush3.bf16.msra.mxu1 %v4719_v11 }
 0x8f5   :  { %v965_v21 = vpop.xlane.xlu1 %964 }
 0x8f9   :  { %v976_v32 = vpop.permute.xlu1 %975 }
 0x914   :  { %v696_v54 = vpop.xlane.xlu0 %695 }
 0x915   :  { %4880 = vrcp.f32 %v696_v54  ;;  %v4720_v54 = vld [vmem:[%s6356_s3 + $0x10] sm:$0xff]  }
 0x916   :  { %4504 = vmatprep.subr.bf16.mxu1 %v4720_v54 }
 0x917   :  { %4505 = vmatpush3.bf16.msra.mxu1 %v4720_v54 }
 0x918   :  { %v849_v14 = vpop.xlane.xlu0 %848  ;;  %4506 = vmatprep.subr.bf16.mxu1 %v4721_v8 }
 0x919   :  { %4882 = vrcp.f32 %v849_v14 }
 0x91a   :  { %4884 = vrcp.f32 %v846_v55 }
 0x91b   :  { %4507 = vmatpush3.bf16.msra.mxu1 %v4721_v8 }
 0x91c   :  { %v968_v3 = vpop.xlane.xlu0 %967 }
 0x91d   :  { %4886 = vrcp.f32 %v968_v3 }
 0x91e   :  { %4888 = vrcp.f32 %v965_v21 }
 0x91f   :  { %v4881_v12 = vpop.eup %4880 }
 0x920   :  { %v700_v23 = vmul.f32 %v4881_v12, %v4861_v43  ;;  %v1087_v44 = vpop.xlane.xlu0 %1086 }
 0x922   :  { %v701_v24 = vpack.c.bf16 %v700_v23, %v699_v17 }
 0x923   :  { %v4883_v26 = vpop.eup %4882 }
 0x924   :  { %4449 = vmatmul.mubr.msk.bf16.vlgmr.msra.gmra.mrb[12].mxu0 %vm269_vm2, %v701_v24  ;;  %v4885_v27 = vpop.eup %4884  ;;  %v853_v28 = vmul.f32 %v4883_v26, %v5409_v48  ;;  %v1090_v29 = vpop.xlane.xlu0 %1089 }
 0x925   :  { %4459 = vmatpush3.bf16.msra.mxu0 %v5277_v22  ;;  %4460 = vmatprep.mubr.msk.bf16.mxu0 %vm5023_vm1, %v5022_v40  ;;  %v852_v10 = vmul.f32 %v4885_v27, %v5389_v16  ;;  %4890 = vrcp.f32 %v1090_v29 }
 0x926   :  { %4470 = vmatprep.subr.bf16.mxu0 %v5022_v40  ;;  %4892 = vrcp.f32 %v1087_v44 }
 0x927   :  { %v854_v33 = vpack.c.bf16 %v853_v28, %v852_v10  ;;  %v4887_v36 = vpop.eup %4886 }
 0x928   :  { %v4889_v46 = vpop.eup %4888  ;;  %v972_v22 = vmul.f32 %v4887_v36, %v5414_v53  ;;  %v1211_v37 = vpop.xlane.xlu0 %1210 }
 0x929   :  { %v971_v16 = vmul.f32 %v4889_v46, %v5393_v20 }
 0x92a   :  { %v1208_v38 = vpop.xlane.xlu1 %1207 }
 0x92b   :  { %4894 = vrcp.f32 %v1208_v38  ;;  %v973_v39 = vpack.c.bf16 %v972_v22, %v971_v16 }
 0x92c   :  { %4461 = vmatmul.mubr.msk.bf16.vlgmr.msra.gmra.mrb[16].mxu0 %vm269_vm2, %v854_v33  ;;  %4896 = vrcp.f32 %v1211_v37  ;;  %v1097_v42 = vpop.permute.xlu0 %1096 }
 0x92d   :  { %4471 = vmatpush3.bf16.msra.mxu0 %v976_v32  ;;  %4472 = vmatprep.mubr.msk.bf16.mxu0 %vm5023_vm1, %v5022_v40 }
 0x92e   :  { %4482 = vmatprep.subr.bf16.mxu0 %v5022_v40  ;;  %v1218_v48 = vpop.permute.xlu1 %1217 }
 0x92f   :  { %v4891_v7 = vpop.eup %4890 }
 0x930   :  { %v4893_v43 = vpop.eup %4892  ;;  %v1094_v15 = vmul.f32 %v4891_v7, %v5422_v60 }
 0x931   :  { %v1093_v47 = vmul.f32 %v4893_v43, %v5418_v57 }
 0x932   :  { %v4648_v29 = vpop.permute.xlu1 %4647 }
 0x933   :  { %v1095_v25 = vpack.c.bf16 %v1094_v15, %v1093_v47  ;;  %v4650_v32 = vunpack.i.h.bf16 %v4648_v29  ;;  %v4649_v33 = vunpack.i.l.bf16 %v4648_v29 }
 0x934   :  { %4473 = vmatmul.mubr.msk.bf16.vlgmr.msra.gmra.mrb[20].mxu0 %vm269_vm2, %v973_v39 }
 0x935   :  { %4483 = vmatpush3.bf16.msra.mxu0 %v1097_v42  ;;  %4484 = vmatprep.mubr.msk.bf16.mxu0 %vm5023_vm1, %v5022_v40  ;;  %v4895_v20 = vpop.eup %4894  ;;  %v774_v37 = vsel %vm269_vm2, %v5261_v61, %v4650_v32  ;;  %v773_v38 = vsel %vm269_vm2, %v5257_v59, %v4649_v33 }
 0x936   :  { %4494 = vmatprep.subr.bf16.mxu0 %v5022_v40  ;;  %v4897_v49 = vpop.eup %4896  ;;  %v1214_v30 = vmul.f32 %v4895_v20, %v5428_v1 }
 0x937   :  { %v1215_v50 = vmul.f32 %v4897_v49, %v5426_v0 }
 0x939   :  { %v1216_v53 = vpack.c.bf16 %v1215_v50, %v1214_v30 }
 0x93c   :  { %4485 = vmatmul.mubr.msk.bf16.vlgmr.msra.gmra.mrb[24].mxu0 %vm269_vm2, %v1095_v25 }
 0x93d   :  { %4495 = vmatpush3.bf16.msra.mxu0 %v1218_v48  ;;  %4496 = vmatprep.mubr.msk.bf16.mxu0 %vm5023_vm1, %v5022_v40 }
 0x944   :  { %4497 = vmatmul.mubr.msk.bf16.vlgmr.msra.gmra.mrb[28].mxu0 %vm269_vm2, %v1216_v53 }
 0x945   :  { %1568 = vmatprep.mubr.bf16.mxu0 %v5021_v18 }
 0x9c2   :  { %v621_v34 = vpop.f32.mrb[8].mxu0 }
 0x9c3   :  { %v4438_v45 = vpop.f32.mrb[9].mxu0 }
 0x9c4   :  { %v624_v57 = vpop.f32.mrb[10].mxu0 }
 0x9c5   :  { %v4651_v41 = vpack.i.bf16 %v624_v57, %v621_v34  ;;  %v4439_v60 = vpop.f32.mrb[11].mxu0 }
 0x9c7   :  { %4652 = vrot.lane.b32.xlu1 %v4651_v41, %s6343_s0 }
 0x9f7   :  { %v742_v63 = vpop.f32.mrb[12].mxu0 }
 0x9f8   :  { %v4450_v2 = vpop.f32.mrb[13].mxu0 }
 0x9f9   :  { %v745_v35 = vpop.f32.mrb[14].mxu0 }
 0x9fa   :  { %v4656_v5 = vpack.i.bf16 %v745_v35, %v742_v63  ;;  %v4451_v6 = vpop.f32.mrb[15].mxu0  ;;  %v4039_v35 = vld [vmem:[%s6314_s5] ss:$0 sm:$0xff] }
 0x9fc   :  { %4657 = vrot.lane.b32.xlu1 %v4656_v5, %s5027_s25 }
 0x9ff   :  { %v893_v0 = vpop.f32.mrb[16].mxu0 }
 0xa00   :  { %v4462_v1 = vpop.f32.mrb[17].mxu0 }
 0xa01   :  { %v896_v62 = vpop.f32.mrb[18].mxu0 }
 0xa02   :  { %v4463_v9 = vpop.f32.mrb[19].mxu0 }
 0xa03   :  { %v4994_v9 = vld [vmem:[%s6352_s23] sm:$0xff] }
 0xa07   :  { %v1015_v4 = vpop.f32.mrb[20].mxu0 }
 0xa08   :  { %v4474_v13 = vpop.f32.mrb[21].mxu0 }
 0xa09   :  { %v1018_v51 = vpop.f32.mrb[22].mxu0  ;;  %v4995_v13 = vld [vmem:[%s6352_s23 + $0x10] sm:$0xff] }
 0xa0a   :  { %v4661_v55 = vpack.i.bf16 %v1018_v51, %v1015_v4  ;;  %v4475_v14 = vpop.f32.mrb[23].mxu0 }
 0xa0c   :  { %4662 = vrot.lane.b32.xlu1 %v4661_v55, %s6341_s4  ;;  %v4996_v55 = vld [vmem:[%s6352_s23 + $0x8] sm:$0xff]  ;;  %s6360_s4 = smov 32  }
 0xa0f   :  { %v1136_v3 = vpop.f32.mrb[24].mxu0 }
 0xa10   :  { %v4486_v12 = vpop.f32.mrb[25].mxu0 }
 0xa11   :  { %v1139_v17 = vpop.f32.mrb[26].mxu0 }
 0xa12   :  { %v4666_v21 = vpack.i.bf16 %v1139_v17, %v1136_v3  ;;  %v4487_v23 = vpop.f32.mrb[27].mxu0 }
 0xa14   :  { %4667 = vrot.lane.b32.xlu0 %v4666_v21, %s6343_s0 }
 0xa17   :  { %v1257_v44 = vpop.f32.mrb[28].mxu0 }
 0xa18   :  { %v4498_v24 = vpop.f32.mrb[29].mxu0 }
 0xa19   :  { %v1260_v26 = vpop.f32.mrb[30].mxu0 }
 0xa1a   :  { %v4671_v27 = vpack.i.bf16 %v1260_v26, %v1257_v44  ;;  %v4499_v28 = vpop.f32.mrb[31].mxu0 }
 0xa1c   :  { %4672 = vrot.lane.b32.xlu1 %v4671_v27, %s5027_s25 }
 0xa39   :  { %v4653_v10 = vpop.permute.xlu1 %4652 }
 0xa3a   :  { %v4655_v36 = vunpack.i.h.bf16 %v4653_v10  ;;  %v4654_v46 = vunpack.i.l.bf16 %v4653_v10 }
 0xa3c   :  { %v777_v7 = vsel %vm775_vm5, %v774_v37, %v4655_v36  ;;  %v776_v42 = vsel %vm775_vm5, %v773_v38, %v4654_v46 }
 0xa6e   :  { %v4658_v22 = vpop.permute.xlu1 %4657 }
 0xa6f   :  { %v4660_v16 = vunpack.i.h.bf16 %v4658_v22  ;;  %v4659_v39 = vunpack.i.l.bf16 %v4658_v22 }
 0xa71   :  { %v780_v43 = vsel %vm778_vm6, %v777_v7, %v4660_v16  ;;  %v779_v15 = vsel %vm778_vm6, %v776_v42, %v4659_v39 }
 0xa72   :  { %v1302_v47 = vpack.c.bf16 %v780_v43, %v779_v15  ;;  %v4724_v43 = vld [vmem:[%s6317_s8 + $0x4] ss:$8 sps:$4 sm:$0xff]   ;;  %v4722_v15 = vld [vmem:[%s6317_s8] ss:$8 sps:$4 sm:$0xff]  }
 0xa73   :  { %1536 = vmatprep.subr.bf16.mxu0 %v4724_v43  ;;  %v4749_v43 = vld [vmem:[%s6319_s10 + $0x38] sm:$0xff]  }
 0xa74   :  { %4508 = vmatprep.mubr.msk.bf16.mxu1 %vm82_vm0, %v1302_v47  ;;  %1537 = vmatpush1.bf16.msra.mxu0 %v4722_v15  ;;  %v4727_v47 = vld [vmem:[%s6317_s8 + $0x14] ss:$8 sps:$4 sm:$0xff]   ;;  %v5649_v15 = vsub.s32 0, %v5215_v52 }
 0xa75   :  { %1538 = vmatprep.subr.bf16.mxu0 %v4727_v47  ;;  %v1478_v47 = vld [vmem:[%s6318_s9] sm:$0x3] }
 0xa7e   :  { %v4663_v25 = vpop.permute.xlu1 %4662 }
 0xa7f   :  { %v4665_v48 = vunpack.i.h.bf16 %v4663_v25  ;;  %v4664_v61 = vunpack.i.l.bf16 %v4663_v25  ;;  %v4725_v25 = vld [vmem:[%s6317_s8 + $0x10] ss:$8 sps:$4 sm:$0xff]  }
 0xa80   :  { %1539 = vmatpush1.bf16.msra.mxu0 %v4725_v25  ;;  %v5655_v25 = vsub.s32 1, %v5215_v52 }
 0xa81   :  { %v1289_v50 = vsel %vm269_vm2, %v896_v62, %v4665_v48  ;;  %v1288_v53 = vsel %vm269_vm2, %v893_v0, %v4664_v61  ;;  %v4728_v48 = vld [vmem:[%s6317_s8 + $0x20] ss:$8 sps:$4 sm:$0xff]   ;;  %v4733_v61 = vld [vmem:[%s6317_s8 + $0x34] ss:$8 sps:$4 sm:$0xff]  }
 0xa86   :  { %v4668_v20 = vpop.permute.xlu0 %4667 }
 0xa87   :  { %v4670_v49 = vunpack.i.h.bf16 %v4668_v20  ;;  %v4669_v30 = vunpack.i.l.bf16 %v4668_v20  ;;  %v4730_v20 = vld [vmem:[%s6317_s8 + $0x24] ss:$8 sps:$4 sm:$0xff]  }
 0xa88   :  { %1540 = vmatprep.subr.bf16.mxu0 %v4730_v20  ;;  %v1483_v20 = vrot.slane %v1478_v47, %v5649_v15 }
 0xa89   :  { %v1291_v57 = vsel %vm775_vm5, %v1289_v50, %v4670_v49  ;;  %v1290_v41 = vsel %vm775_vm5, %v1288_v53, %v4669_v30  ;;  %1541 = vmatpush1.bf16.msra.mxu0 %v4728_v48  ;;  %v4731_v49 = vld [vmem:[%s6317_s8 + $0x30] ss:$8 sps:$4 sm:$0xff]   ;;  %v4734_v30 = vld [vmem:[%s6319_s10 + $0x40] sm:$0xff]   ;;  %v4736_v50 = vld [vmem:[%s6319_s10 + $0x48] sm:$0xff]   ;;  %v1487_v48 = vrot.slane %v1478_v47, %v5655_v25 }
 0xa8a   :  { %1542 = vmatprep.subr.bf16.mxu0 %v4733_v61  ;;  %4276 = vmatprep.subr.bf16.mxu1 %v4734_v30  ;;  %v4737_v53 = vld [vmem:[%s6319_s10 + $0x8] sm:$0xff]  }
 0xa8d   :  { %1543 = vmatpush1.bf16.msra.mxu0 %v4731_v49 }
 0xa8e   :  { %v4673_v59 = vpop.permute.xlu1 %4672 }
 0xa8f   :  { %v4675_v34 = vunpack.i.h.bf16 %v4673_v59  ;;  %v4674_v45 = vunpack.i.l.bf16 %v4673_v59  ;;  %v4735_v59 = vld [vmem:[%s6319_s10] sm:$0xff]  }
 0xa91   :  { %v1293_v60 = vsel %vm778_vm6, %v1291_v57, %v4675_v34  ;;  %v1292_v63 = vsel %vm778_vm6, %v1290_v41, %v4674_v45  ;;  %v4738_v34 = vld [vmem:[%s6319_s10 + $0x50] sm:$0xff]   ;;  %v4740_v57 = vld [vmem:[%s6319_s10 + $0x58] sm:$0xff]  }
 0xa92   :  { %v1303_v2 = vpack.c.bf16 %v1293_v60, %v1292_v63  ;;  %v4739_v45 = vld [vmem:[%s6319_s10 + $0x10] sm:$0xff]   ;;  %v4741_v41 = vld [vmem:[%s6319_s10 + $0x18] sm:$0xff]   ;;  %v4742_v60 = vld [vmem:[%s6319_s10 + $0x60] sm:$0xff]  }
 0xa93   :  { %v4743_v63 = vld [vmem:[%s6319_s10 + $0x20] sm:$0xff]  }
 0xa94   :  { %4509 = vmatmul.mubr.msk.bf16.vlgmr.msra.gmra.mrb[40].mxu1 %vm82_vm0, %v1303_v2  ;;  %v4744_v2 = vld [vmem:[%s6319_s10 + $0x68] sm:$0xff]  }
 0xa95   :  { %4277 = vmatpush3.bf16.msra.mxu1 %v4735_v59 }
 0xa96   :  { %4278 = vmatprep.subr.bf16.mxu1 %v4736_v50 }
 0xa99   :  { %4279 = vmatpush3.bf16.msra.mxu1 %v4737_v53 }
 0xa9a   :  { %4280 = vmatprep.subr.bf16.mxu1 %v4738_v34 }
 0xa9d   :  { %4281 = vmatpush3.bf16.msra.mxu1 %v4739_v45 }
 0xa9e   :  { %4282 = vmatprep.subr.bf16.mxu1 %v4740_v57 }
 0xaa1   :  { %4283 = vmatpush3.bf16.msra.mxu1 %v4741_v41 }
 0xaa2   :  { %4284 = vmatprep.subr.bf16.mxu1 %v4742_v60 }
 0xaa5   :  { %4285 = vmatpush3.bf16.msra.mxu1 %v4743_v63 }
 0xaa6   :  { %4286 = vmatprep.subr.bf16.mxu1 %v4744_v2 }
 0xb67   :  { %v4510_v5 = vpop.f32.mrb[40].mxu1 }
 0xb68   :  { %v1375_v6 = vpop.f32.mrb[41].mxu1  ;;  %v1384_v0 = vadd.f32 %v4510_v5, %v4039_v35 }
 0xb69   :  { %v1376_v1 = vadd.f32 %v4039_v35, %v1375_v6  ;;  %v4511_v62 = vpop.f32.mrb[42].mxu1 }
 0xb6a   :  { %v1378_v31 = vpop.f32.mrb[43].mxu1  ;;  %v5519_v51 = vadd.f32 %v4995_v13, %v1384_v0  ;;  %v1387_v54 = vadd.f32 %v4511_v62, %v4039_v35 }
 0xb6b   :  { %v5514_v4 = vadd.f32 %v4994_v9, %v1376_v1  ;;  %v1379_v11 = vadd.f32 %v4039_v35, %v1378_v31 }
 0xb6c   :  { %v5531_v12 = vadd.f32 %v1387_v54, %v5235_v19  ;;  %v1402_v17 = vsel %vm82_vm0, %v5519_v51, 0.0 }
 0xb6d   :  { %v5524_v14 = vadd.f32 %v4996_v55, %v1379_v11  ;;  %v1396_v3 = vsel %vm82_vm0, %v5514_v4, 0.0 }
 0xb6e   :  { %1397 = vadd.xlane.f32.xlu0 %v1396_v3  ;;  %v1405_v21 = vsel %vm82_vm0, %v5531_v12, 0.0 }
 0xb6f   :  { %v1399_v8 = vsel %vm82_vm0, %v5524_v14, 0.0 }
 0xb70   :  { %1400 = vadd.xlane.f32.xlu1 %v1399_v8  ;;  %v4046_v8 = vld [vmem:[%s6315_s6] ss:$0 sm:$0xff] }
 0xb72   :  { %1403 = vadd.xlane.f32.xlu0 %v1402_v17 }
 0xb76   :  { %1406 = vadd.xlane.f32.xlu0 %v1405_v21 }
 0xbfb   :  { %v1398_v23 = vpop.xlane.xlu0 %1397 }
 0xbfc   :  { %v1408_v44 = vmul.f32 0.015625, %v1398_v23 }
 0xbfd   :  { %v1401_v24 = vpop.xlane.xlu1 %1400 }
 0xbfe   :  { %v5538_v26 = vsub.f32 %v5514_v4, %v1408_v44  ;;  %v1409_v27 = vmul.f32 0.015625, %v1401_v24 }
 0xbff   :  { %v1404_v28 = vpop.xlane.xlu0 %1403 }
 0xc00   :  { %v5541_v29 = vsub.f32 %v5524_v14, %v1409_v27  ;;  %v1410_v19 = vmul.f32 0.015625, %v1404_v28  ;;  %v1416_v10 = vmul.f32 %v5538_v26, %v5538_v26  ;;  %v4047_v27 = vld [vmem:[%s6316_s7] ss:$0 sm:$0xff] }
 0xc02   :  { %v5546_v32 = vsub.f32 %v5519_v51, %v1410_v19  ;;  %v1420_v33 = vsel %vm82_vm0, %v1416_v10, 0.0  ;;  %v1417_v36 = vmul.f32 %v5541_v29, %v5541_v29 }
 0xc03   :  { %1421 = vadd.xlane.f32.xlu0 %v1420_v33  ;;  %v1407_v46 = vpop.xlane.xlu0 %1406 }
 0xc04   :  { %v1411_v22 = vmul.f32 0.015625, %v1407_v46  ;;  %v1423_v37 = vsel %vm82_vm0, %v1417_v36, 0.0  ;;  %v1418_v38 = vmul.f32 %v5546_v32, %v5546_v32 }
 0xc05   :  { %1424 = vadd.xlane.f32.xlu1 %v1423_v37 }
 0xc06   :  { %v5555_v16 = vsub.f32 %v5531_v12, %v1411_v22  ;;  %v1426_v39 = vsel %vm82_vm0, %v1418_v38, 0.0 }
 0xc07   :  { %1427 = vadd.xlane.f32.xlu0 %v1426_v39 }
 0xc08   :  { %v1419_v7 = vmul.f32 %v5555_v16, %v5555_v16 }
 0xc0a   :  { %v1429_v42 = vsel %vm82_vm0, %v1419_v7, 0.0  ;;  %v4747_v7 = vld [vmem:[%s6319_s10 + $0x30] sm:$0xff]  }
 0xc0b   :  { %1430 = vadd.xlane.f32.xlu1 %v1429_v42  ;;  %v4748_v42 = vld [vmem:[%s6319_s10 + $0x78] sm:$0xff]  }
 0xc90   :  { %v1422_v35 = vpop.xlane.xlu0 %1421 }
 0xc91   :  { %v1432_v5 = vmul.f32 0.015625, %v1422_v35 }
 0xc92   :  { %v1425_v6 = vpop.xlane.xlu1 %1424 }
 0xc93   :  { %v1436_v0 = vadd.f32 1e-05, %v1432_v5  ;;  %v1433_v1 = vmul.f32 0.015625, %v1425_v6 }
 0xc94   :  { %v1428_v62 = vpop.xlane.xlu0 %1427 }
 0xc95   :  { %4898 = vrsqrt.f32 %v1436_v0  ;;  %v1437_v31 = vadd.f32 1e-05, %v1433_v1  ;;  %v1434_v9 = vmul.f32 0.015625, %v1428_v62 }
 0xc97   :  { %4900 = vrsqrt.f32 %v1437_v31  ;;  %v1438_v11 = vadd.f32 1e-05, %v1434_v9 }
 0xc98   :  { %v1431_v13 = vpop.xlane.xlu1 %1430 }
 0xc99   :  { %4902 = vrsqrt.f32 %v1438_v11  ;;  %v1435_v54 = vmul.f32 0.015625, %v1431_v13 }
 0xc9b   :  { %v1439_v55 = vadd.f32 1e-05, %v1435_v54 }
 0xc9d   :  { %4904 = vrsqrt.f32 %v1439_v55 }
 0xc9f   :  { %v4899_v3 = vpop.eup %4898 }
 0xca0   :  { %v1444_v17 = vmul.f32 %v4899_v3, %v5538_v26 }
 0xca1   :  { %v4901_v21 = vpop.eup %4900 }
 0xca2   :  { %v1454_v23 = vmul.f32 %v4046_v8, %v1444_v17  ;;  %v1445_v44 = vmul.f32 %v4901_v21, %v5541_v29  ;;  %v4058_v21 = vld [vmem:[%s6320_s11] ss:$0 sm:$0xff] }
 0xca3   :  { %v4903_v24 = vpop.eup %4902 }
 0xca4   :  { %v1455_v28 = vmul.f32 %v4046_v8, %v1445_v44  ;;  %v1446_v19 = vmul.f32 %v4903_v24, %v5546_v32  ;;  %v1464_v10 = vadd.f32 %v4047_v27, %v1454_v23  ;;  %v4745_v32 = vld [vmem:[%s6319_s10 + $0x28] sm:$0xff]  }
 0xca5   :  { %4287 = vmatpush3.bf16.msra.mxu1 %v4745_v32 }
 0xca6   :  { %v1465_v33 = vadd.f32 %v4047_v27, %v1455_v28  ;;  %v1456_v26 = vmul.f32 %v4046_v8, %v1446_v19 }
 0xca7   :  { %v4905_v36 = vpop.eup %4904 }
 0xca8   :  { %v1447_v46 = vmul.f32 %v4905_v36, %v5555_v16  ;;  %v1476_v22 = vpack.c.bf16 %v1465_v33, %v1464_v10  ;;  %v1466_v38 = vadd.f32 %v4047_v27, %v1456_v26  ;;  %v4746_v16 = vld [vmem:[%s6319_s10 + $0x70] sm:$0xff]  }
 0xca9   :  { %4288 = vmatprep.subr.bf16.mxu1 %v4746_v16 }
 0xcaa   :  { %4056 = vmatmul.mubr.msk.bf16.vlgmr.msra.gmra.mrb[32].mxu0 %vm82_vm0, %v1476_v22  ;;  %v1457_v37 = vmul.f32 %v4046_v8, %v1447_v46  ;;  %4289 = vmatpush3.bf16.msra.mxu1 %v4747_v7 }
 0xcab   :  { %1578 = vmatprep.mubr.bf16.mxu0 %v5021_v18  ;;  %4290 = vmatprep.subr.bf16.mxu1 %v4748_v42 }
 0xcac   :  { %v1467_v29 = vadd.f32 %v4047_v27, %v1457_v37 }
 0xcae   :  { %v1477_v39 = vpack.c.bf16 %v1467_v29, %v1466_v38  ;;  %4291 = vmatpush3.bf16.msra.mxu1 %v4749_v43 }
 0xcaf   :  { %4524 = vmatprep.subr.bf16.mxu1 %v5022_v40 }
 0xcb2   :  { %4057 = vmatmul.mubr.msk.bf16.gmra.mrb[36].mxu0 %vm82_vm0, %v1477_v39 }
 0xcb3   :  { %1954 = vmatprep.mubr.bf16.mxu0 %v5021_v18 }
 0xd7d   :  { %v1570_v61 = vpop.f32.mrb[32].mxu0 }
 0xd7e   :  { %v1571_v49 = vadd.f32 %v1570_v61, %v1483_v20  ;;  %v1572_v30 = vpop.f32.mrb[33].mxu0 }
 0xd7f   :  { %v1573_v59 = vadd.f32 %v1572_v30, %v1487_v48  ;;  %v1574_v50 = vpop.f32.mrb[34].mxu0 }
 0xd80   :  { %v1575_v53 = vadd.f32 %v1574_v50, %v1483_v20  ;;  %v1576_v34 = vpop.f32.mrb[35].mxu0  ;;  %v1589_v57 = vmax.f32 %v1571_v49, 0.0 }
 0xd81   :  { %v1577_v45 = vadd.f32 %v1576_v34, %v1487_v48  ;;  %v1590_v60 = vmax.f32 %v1573_v59, 0.0 }
 0xd82   :  { %v1591_v41 = vmax.f32 %v1575_v53, 0.0 }
 0xd83   :  { %v1592_v63 = vmax.f32 %v1577_v45, 0.0 }
 0xd84   :  { %v1629_v2 = vpack.c.bf16 %v1591_v41, %v1589_v57 }
 0xd85   :  { %v1630_v35 = vpack.c.bf16 %v1592_v63, %v1590_v60  ;;  %v1580_v52 = vpop.f32.mrb[36].mxu0 }
 0xd86   :  { %v1581_v5 = vadd.f32 %v1580_v52, %v1483_v20  ;;  %v1582_v6 = vpop.f32.mrb[37].mxu0 }
 0xd87   :  { %v1583_v0 = vadd.f32 %v1582_v6, %v1487_v48  ;;  %v1584_v1 = vpop.f32.mrb[38].mxu0  ;;  %1768 = vmatprep.mubr.bf16.mxu1 %v1630_v35  ;;  %v4750_v6 = vld [vmem:[%s6353_s26 + $0x40] ss:$8 sps:$4 sm:$0xff]  }
 0xd88   :  { %v1585_v62 = vadd.f32 %v1584_v1, %v1483_v20  ;;  %v1586_v31 = vpop.f32.mrb[39].mxu0  ;;  %1769 = vmatmul.mubr.bf16.vlgmr.msra.gmra.mrb[44].mxu1 %v1629_v2  ;;  %v1593_v11 = vmax.f32 %v1581_v5, 0.0  ;;  %v4752_v5 = vld [vmem:[%s6353_s26 + $0x44] ss:$8 sps:$4 sm:$0xff]   ;;  %v4753_v1 = vld [vmem:[%s6353_s26 + $0x50] ss:$8 sps:$4 sm:$0xff]  }
 0xd89   :  { %v1587_v9 = vadd.f32 %v1586_v31, %v1487_v48  ;;  %v1594_v54 = vmax.f32 %v1583_v0, 0.0  ;;  %1922 = vmatprep.subr.bf16.mxu0 %v4752_v5  ;;  %v4755_v0 = vld [vmem:[%s6353_s26 + $0x54] ss:$8 sps:$4 sm:$0xff]   ;;  %v4756_v31 = vld [vmem:[%s6353_s26 + $0x60] ss:$8 sps:$4 sm:$0xff]  }
 0xd8a   :  { %v1595_v13 = vmax.f32 %v1585_v62, 0.0  ;;  %1923 = vmatpush1.bf16.msra.mxu0 %v4750_v6  ;;  %v4758_v62 = vld [vmem:[%s6353_s26 + $0x64] ss:$8 sps:$4 sm:$0xff]  }
 0xd8b   :  { %v1596_v55 = vmax.f32 %v1587_v9, 0.0  ;;  %1924 = vmatprep.subr.bf16.mxu0 %v4755_v0  ;;  %v4761_v9 = vld [vmem:[%s6353_s26 + $0x74] ss:$8 sps:$4 sm:$0xff]  }
 0xd8c   :  { %v1631_v3 = vpack.c.bf16 %v1595_v13, %v1593_v11  ;;  %v4759_v11 = vld [vmem:[%s6353_s26 + $0x70] ss:$8 sps:$4 sm:$0xff]  }
 0xd8d   :  { %v1632_v8 = vpack.c.bf16 %v1596_v55, %v1594_v54 }
 0xd8e   :  { %1925 = vmatpush1.bf16.msra.mxu0 %v4753_v1 }
 0xd8f   :  { %1776 = vmatprep.mubr.bf16.mxu1 %v1632_v8  ;;  %1926 = vmatprep.subr.bf16.mxu0 %v4758_v62 }
 0xd90   :  { %1777 = vmatmul.mubr.bf16.gmra.mrb[48].mxu1 %v1631_v3 }
 0xd91   :  { %4526 = vmatprep.mubr.msk.bf16.mxu1 %vm5023_vm1, %v5022_v40 }
 0xd92   :  { %1927 = vmatpush1.bf16.msra.mxu0 %v4756_v31 }
 0xd93   :  { %1928 = vmatprep.subr.bf16.mxu0 %v4761_v9 }
 0xd96   :  { %1929 = vmatpush1.bf16.msra.mxu0 %v4759_v11 }
 0xd97   :  { %4512 = vmatprep.subr.bf16.mxu0 %v5022_v40 }
 0xe5b   :  { %v4292_v17 = vpop.f32.mrb[44].mxu1 }
 0xe5c   :  { %v4293_v23 = vpop.f32.mrb[45].mxu1 }
 0xe5d   :  { %v4294_v44 = vadd.f32 %v4293_v23, %v4292_v17  ;;  %v4295_v24 = vpop.f32.mrb[46].mxu1 }
 0xe5e   :  { %v4296_v27 = vpop.f32.mrb[47].mxu1 }
 0xe5f   :  { %v1771_v28 = vadd.f32 %v4294_v44, %v4058_v21  ;;  %v4297_v19 = vadd.f32 %v4296_v27, %v4295_v24 }
 0xe61   :  { %v5665_v10 = vadd.f32 %v1771_v28, %v5514_v4  ;;  %v1774_v33 = vadd.f32 %v4297_v19, %v4058_v21 }
 0xe63   :  { %v5668_v36 = vadd.f32 %v1774_v33, %v5524_v14  ;;  %v4298_v46 = vpop.f32.mrb[48].mxu1  ;;  %v1793_v22 = vsel %vm82_vm0, %v5665_v10, 0.0  ;;  %v4077_v33 = vld [vmem:[%s6354_s29 + $0x1] ss:$0 sm:$0xff]  ;;  %s6357_s29 = smov 64  }
 0xe64   :  { %v4299_v26 = vpop.f32.mrb[49].mxu1  ;;  %1794 = vadd.xlane.f32.xlu0 %v1793_v22 }
 0xe65   :  { %v4300_v37 = vadd.f32 %v4299_v26, %v4298_v46  ;;  %v4301_v29 = vpop.f32.mrb[50].mxu1  ;;  %v1796_v38 = vsel %vm82_vm0, %v5668_v36, 0.0 }
 0xe66   :  { %v4302_v39 = vpop.f32.mrb[51].mxu1  ;;  %1797 = vadd.xlane.f32.xlu1 %v1796_v38 }
 0xe67   :  { %v1779_v32 = vadd.f32 %v4300_v37, %v4058_v21  ;;  %v4303_v4 = vadd.f32 %v4302_v39, %v4301_v29  ;;  %v4078_v29 = vld [vmem:[%s6355_s21 + $0x1] ss:$0 sm:$0xff]  ;;  %s6358_s21 = smov 112  }
 0xe69   :  { %v5675_v16 = vadd.f32 %v1779_v32, %v5519_v51  ;;  %v1782_v14 = vadd.f32 %v4303_v4, %v4058_v21 }
 0xe6b   :  { %v5678_v7 = vadd.f32 %v1782_v14, %v5531_v12  ;;  %v1799_v42 = vsel %vm82_vm0, %v5675_v16, 0.0 }
 0xe6c   :  { %1800 = vadd.xlane.f32.xlu0 %v1799_v42 }
 0xe6d   :  { %v1802_v43 = vsel %vm82_vm0, %v5678_v7, 0.0 }
 0xe6e   :  { %1803 = vadd.xlane.f32.xlu1 %v1802_v43 }
 0xef1   :  { %v1795_v47 = vpop.xlane.xlu0 %1794 }
 0xef2   :  { %v1805_v20 = vmul.f32 0.015625, %v1795_v47 }
 0xef3   :  { %v1798_v48 = vpop.xlane.xlu1 %1797 }
 0xef4   :  { %v1809_v61 = vsub.f32 %v5665_v10, %v1805_v20  ;;  %v1806_v49 = vmul.f32 0.015625, %v1798_v48 }
 0xef6   :  { %v1810_v51 = vsub.f32 %v5668_v36, %v1806_v49  ;;  %v1813_v30 = vmul.f32 %v1809_v61, %v1809_v61 }
 0xef8   :  { %v1817_v12 = vsel %vm82_vm0, %v1813_v30, 0.0  ;;  %v1814_v59 = vmul.f32 %v1810_v51, %v1810_v51 }
 0xef9   :  { %1818 = vadd.xlane.f32.xlu0 %v1817_v12  ;;  %v1801_v50 = vpop.xlane.xlu0 %1800 }
 0xefa   :  { %v1807_v53 = vmul.f32 0.015625, %v1801_v50  ;;  %v1820_v34 = vsel %vm82_vm0, %v1814_v59, 0.0 }
 0xefb   :  { %1821 = vadd.xlane.f32.xlu1 %v1820_v34  ;;  %v1804_v45 = vpop.xlane.xlu1 %1803 }
 0xefc   :  { %v1811_v57 = vsub.f32 %v5675_v16, %v1807_v53  ;;  %v1808_v41 = vmul.f32 0.015625, %v1804_v45 }
 0xefe   :  { %v1812_v60 = vsub.f32 %v5678_v7, %v1808_v41  ;;  %v1815_v63 = vmul.f32 %v1811_v57, %v1811_v57 }
 0xf00   :  { %v1823_v2 = vsel %vm82_vm0, %v1815_v63, 0.0  ;;  %v1816_v35 = vmul.f32 %v1812_v60, %v1812_v60 }
 0xf01   :  { %1824 = vadd.xlane.f32.xlu0 %v1823_v2 }
 0xf02   :  { %v1826_v52 = vsel %vm82_vm0, %v1816_v35, 0.0 }
 0xf03   :  { %1827 = vadd.xlane.f32.xlu1 %v1826_v52 }
 0xf86   :  { %v1819_v13 = vpop.xlane.xlu0 %1818 }
 0xf87   :  { %v1829_v54 = vmul.f32 0.015625, %v1819_v13 }
 0xf88   :  { %v1822_v55 = vpop.xlane.xlu1 %1821 }
 0xf89   :  { %v1833_v3 = vadd.f32 1e-05, %v1829_v54  ;;  %v1830_v8 = vmul.f32 0.015625, %v1822_v55 }
 0xf8b   :  { %4906 = vrsqrt.f32 %v1833_v3  ;;  %v1834_v17 = vadd.f32 1e-05, %v1830_v8 }
 0xf8d   :  { %4908 = vrsqrt.f32 %v1834_v17 }
 0xf8e   :  { %v1825_v21 = vpop.xlane.xlu0 %1824 }
 0xf8f   :  { %v1831_v23 = vmul.f32 0.015625, %v1825_v21 }
 0xf90   :  { %v1828_v44 = vpop.xlane.xlu1 %1827 }
 0xf91   :  { %v1835_v24 = vadd.f32 1e-05, %v1831_v23  ;;  %v1832_v27 = vmul.f32 0.015625, %v1828_v44 }
 0xf93   :  { %4910 = vrsqrt.f32 %v1835_v24  ;;  %v1836_v28 = vadd.f32 1e-05, %v1832_v27 }
 0xf95   :  { %v4907_v19 = vpop.eup %4906  ;;  %4912 = vrsqrt.f32 %v1836_v28 }
 0xf96   :  { %v1841_v46 = vmul.f32 %v4907_v19, %v1809_v61 }
 0xf97   :  { %v4909_v22 = vpop.eup %4908 }
 0xf98   :  { %v1851_v26 = vmul.f32 %v4077_v33, %v1841_v46  ;;  %v1842_v37 = vmul.f32 %v4909_v22, %v1810_v51 }
 0xf9a   :  { %v1852_v38 = vmul.f32 %v4077_v33, %v1842_v37  ;;  %v1861_v39 = vadd.f32 %v4078_v29, %v1851_v26 }
 0xf9c   :  { %v1862_v32 = vadd.f32 %v4078_v29, %v1852_v38 }
 0xf9d   :  { %v4911_v4 = vpop.eup %4910 }
 0xf9e   :  { %v1843_v14 = vmul.f32 %v4911_v4, %v1811_v57  ;;  %v1874_v42 = vpack.c.bf16 %v1862_v32, %v1861_v39 }
 0xf9f   :  { %v4913_v43 = vpop.eup %4912 }
 0xfa0   :  { %v1844_v47 = vmul.f32 %v4913_v43, %v1812_v60  ;;  %4095 = vmatmul.mubr.msk.bf16.vlgmr.msra.gmra.mrb[40].mxu0 %vm82_vm0, %v1874_v42  ;;  %v1853_v20 = vmul.f32 %v4077_v33, %v1843_v14 }
 0xfa1   :  { %1964 = vmatprep.mubr.bf16.mxu0 %v5021_v18 }
 0xfa2   :  { %v1854_v48 = vmul.f32 %v4077_v33, %v1844_v47  ;;  %v1863_v61 = vadd.f32 %v4078_v29, %v1853_v20 }
 0xfa4   :  { %v1864_v49 = vadd.f32 %v4078_v29, %v1854_v48 }
 0xfa6   :  { %v1875_v51 = vpack.c.bf16 %v1864_v49, %v1863_v61 }
 0xfa8   :  { %4096 = vmatmul.mubr.msk.bf16.gmra.mrb[44].mxu0 %vm82_vm0, %v1875_v51 }
 0xfa9   :  { %4514 = vmatprep.mubr.msk.bf16.mxu0 %vm5023_vm1, %v5022_v40 }
0x1073   :  { %v1956_v30 = vpop.f32.mrb[40].mxu0 }
0x1074   :  { %v1958_v12 = vpop.f32.mrb[41].mxu0 }
0x1075   :  { %v1960_v59 = vpop.f32.mrb[42].mxu0 }
0x1076   :  { %v1975_v50 = vpack.c.bf16 %v1960_v59, %v1956_v30  ;;  %v1962_v53 = vpop.f32.mrb[43].mxu0 }
0x1077   :  { %v5728_v34 = vpack.c.bf16 %v1962_v53, %v1958_v12 }
0x1078   :  { %2096 = vrot.lane.b32.xlu1 %v1975_v50, %s5027_s25  ;;  %1977 = vrot.lane.b32.xlu0 %v1975_v50, %s6357_s29 }
0x107b   :  { %v1966_v45 = vpop.f32.mrb[44].mxu0 }
0x107c   :  { %2094 = vrot.lane.b32.xlu1 %v1975_v50, %s6358_s21  ;;  %2216 = vrot.lane.b32.xlu0 %v1975_v50, %s6359_s22  ;;  %v1968_v57 = vpop.f32.mrb[45].mxu0 }
0x107d   :  { %v1970_v41 = vpop.f32.mrb[46].mxu0 }
0x107e   :  { %v2488_v60 = vpack.c.bf16 %v1970_v41, %v1966_v45  ;;  %v1972_v63 = vpop.f32.mrb[47].mxu0 }
0x107f   :  { %v5734_v2 = vpack.c.bf16 %v1972_v63, %v1968_v57 }
0x1080   :  { %2218 = vrot.lane.b32.xlu1 %v1975_v50, %s6360_s4  ;;  %2337 = vrot.lane.b32.xlu0 %v1975_v50, %s6361_s28 }
0x1084   :  { %2339 = vrot.lane.b32.xlu1 %v1975_v50, %s6362_s1  ;;  %2609 = vrot.lane.b32.xlu0 %v2488_v60, %s5027_s25 }
0x1088   :  { %2731 = vrot.lane.b32.xlu0 %v2488_v60, %s6360_s4  ;;  %2490 = vrot.lane.b32.xlu1 %v2488_v60, %s6357_s29 }
0x108c   :  { %2852 = vrot.lane.b32.xlu0 %v2488_v60, %s6362_s1  ;;  %2607 = vrot.lane.b32.xlu1 %v2488_v60, %s6358_s21 }
0x1090   :  { %2729 = vrot.lane.b32.xlu1 %v2488_v60, %s6359_s22 }
0x1094   :  { %2850 = vrot.lane.b32.xlu1 %v2488_v60, %s6361_s28 }
0x10ea   :  { %v2097_v35 = vpop.permute.xlu1 %2096  ;;  %v1978_v52 = vpop.permute.xlu0 %1977 }
0x10eb   :  { %v2102_v5 = vsel %vm269_vm2, %v2097_v35, 0  ;;  %v1983_v6 = vsel %vm269_vm2, %v1978_v52, 0 }
0x10ec   :  { %4513 = vmatpush3.bf16.xpose.msra.mxu0 %v1983_v6  ;;  %4525 = vmatpush3.bf16.xpose.msra.mxu1 %v2102_v5 }
0x10ed   :  { %4518 = vmatprep.subr.bf16.mxu0 %v5022_v40  ;;  %4536 = vmatprep.subr.bf16.mxu1 %v5022_v40 }
0x10ee   :  { %v2095_v0 = vpop.permute.xlu1 %2094  ;;  %v2217_v9 = vpop.permute.xlu0 %2216 }
0x10f2   :  { %v2219_v1 = vpop.permute.xlu1 %2218  ;;  %v2338_v54 = vpop.permute.xlu0 %2337 }
0x10f3   :  { %v2224_v62 = vsel %vm269_vm2, %v2219_v1, 0  ;;  %4515 = vmatmul.mubr.msk.bf16.vlgmr.msra.gmra.mrb[48].mxu0 %vm269_vm2, %v1975_v50  ;;  %4527 = vmatmul.mubr.msk.bf16.vlgmr.msra.gmra.mrb[52].mxu1 %vm269_vm2, %v2095_v0 }
0x10f4   :  { %4519 = vmatpush3.bf16.msra.mxu0 %v5728_v34  ;;  %4537 = vmatpush3.bf16.xpose.msra.mxu1 %v2224_v62 }
0x10f5   :  { %4538 = vmatprep.mubr.msk.bf16.mxu1 %vm5023_vm1, %v5022_v40  ;;  %4548 = vmatprep.subr.bf16.mxu1 %v5022_v40 }
0x10f6   :  { %4520 = vmatprep.mubr.msk.bf16.mxu0 %vm5023_vm1, %v5022_v40  ;;  %4530 = vmatprep.subr.bf16.mxu0 %v5022_v40  ;;  %v2340_v31 = vpop.permute.xlu1 %2339  ;;  %v2610_v3 = vpop.permute.xlu0 %2609 }
0x10f7   :  { %v2345_v11 = vsel %vm269_vm2, %v2340_v31, 0  ;;  %v2615_v8 = vsel %vm269_vm2, %v2610_v3, 0 }
0x10fa   :  { %v2491_v13 = vpop.permute.xlu1 %2490  ;;  %v2732_v17 = vpop.permute.xlu0 %2731 }
0x10fb   :  { %4539 = vmatmul.mubr.msk.bf16.vlgmr.msra.gmra.mrb[56].mxu1 %vm269_vm2, %v2217_v9  ;;  %v2496_v55 = vsel %vm269_vm2, %v2491_v13, 0  ;;  %v2737_v23 = vsel %vm269_vm2, %v2732_v17, 0 }
0x10fc   :  { %4549 = vmatpush3.bf16.xpose.msra.mxu1 %v2345_v11  ;;  %4550 = vmatprep.mubr.msk.bf16.mxu1 %vm5023_vm1, %v5022_v40 }
0x10fd   :  { %4560 = vmatprep.subr.bf16.mxu1 %v5022_v40 }
0x10fe   :  { %v2608_v21 = vpop.permute.xlu1 %2607  ;;  %v2853_v44 = vpop.permute.xlu0 %2852 }
0x10ff   :  { %v2858_v27 = vsel %vm269_vm2, %v2853_v44, 0 }
0x1102   :  { %v2730_v24 = vpop.permute.xlu1 %2729 }
0x1103   :  { %4551 = vmatmul.mubr.msk.bf16.vlgmr.msra.gmra.mrb[60].mxu1 %vm269_vm2, %v2338_v54 }
0x1104   :  { %4561 = vmatpush3.bf16.xpose.msra.mxu1 %v2496_v55  ;;  %4562 = vmatprep.mubr.msk.bf16.mxu1 %vm5023_vm1, %v5022_v40 }
0x1105   :  { %4572 = vmatprep.subr.bf16.mxu1 %v5022_v40 }
0x1106   :  { %v2851_v28 = vpop.permute.xlu1 %2850 }
0x110b   :  { %4563 = vmatmul.mubr.msk.bf16.vlgmr.msra.gmra.mrb[64].mxu1 %vm269_vm2, %v2488_v60 }
0x110c   :  { %4573 = vmatpush3.bf16.xpose.msra.mxu1 %v2615_v8  ;;  %4574 = vmatprep.mubr.msk.bf16.mxu1 %vm5023_vm1, %v5022_v40 }
0x110d   :  { %4584 = vmatprep.subr.bf16.mxu1 %v5022_v40 }
0x1113   :  { %4575 = vmatmul.mubr.msk.bf16.vlgmr.msra.gmra.mrb[68].mxu1 %vm269_vm2, %v2608_v21 }
0x1114   :  { %4585 = vmatpush3.bf16.xpose.msra.mxu1 %v2737_v23  ;;  %4586 = vmatprep.mubr.msk.bf16.mxu1 %vm5023_vm1, %v5022_v40 }
0x1115   :  { %4596 = vmatprep.subr.bf16.mxu1 %v5022_v40 }
0x111b   :  { %4587 = vmatmul.mubr.msk.bf16.vlgmr.msra.gmra.mrb[72].mxu1 %vm269_vm2, %v2730_v24 }
0x111c   :  { %4597 = vmatpush3.bf16.xpose.msra.mxu1 %v2858_v27  ;;  %4598 = vmatprep.mubr.msk.bf16.mxu1 %vm5023_vm1, %v5022_v40 }
0x1123   :  { %4599 = vmatmul.mubr.msk.bf16.vlgmr.msra.gmra.mrb[76].mxu1 %vm269_vm2, %v2851_v28 }
0x11c6   :  { %v2019_v19 = vpop.f32.mrb[48].mxu0  ;;  %v2138_v33 = vpop.f32.mrb[52].mxu1 }
0x11c7   :  { %v5786_v46 = vadd.f32 %v2019_v19, %v5219_v56  ;;  %v4516_v22 = vpop.f32.mrb[49].mxu0  ;;  %v4528_v26 = vpop.f32.mrb[53].mxu1  ;;  %v5789_v38 = vadd.f32 %v2138_v33, %v5219_v56 }
0x11c8   :  { %v2022_v37 = vpop.f32.mrb[50].mxu0  ;;  %v2141_v29 = vpop.f32.mrb[54].mxu1 }
0x11c9   :  { %v5792_v39 = vadd.f32 %v2022_v37, %v5221_v58  ;;  %v4517_v32 = vpop.f32.mrb[51].mxu0  ;;  %v4529_v4 = vpop.f32.mrb[55].mxu1  ;;  %v2026_v14 = vsel %vm269_vm2, %v5786_v46, -inf  ;;  %v5799_v43 = vadd.f32 %v2141_v29, %v5221_v58  ;;  %v2145_v47 = vsel %vm269_vm2, %v5789_v38, -inf }
0x11ca   :  { %2027 = vmax.xlane.f32.xlu0 %v2026_v14 }
0x11cb   :  { %v2029_v42 = vsel %vm269_vm2, %v5792_v39, -inf  ;;  %v2148_v12 = vsel %vm269_vm2, %v5799_v43, -inf }
0x11cc   :  { %2030 = vmax.xlane.f32.xlu1 %v2029_v42 }
0x11ce   :  { %2146 = vmax.xlane.f32.xlu0 %v2145_v47  ;;  %v2260_v20 = vpop.f32.mrb[56].mxu1 }
0x11cf   :  { %v4540_v48 = vpop.f32.mrb[57].mxu1  ;;  %v5804_v49 = vadd.f32 %v2260_v20, %v5219_v56 }
0x11d0   :  { %v2263_v61 = vpop.f32.mrb[58].mxu1 }
0x11d1   :  { %v5807_v51 = vadd.f32 %v2263_v61, %v5221_v58  ;;  %v4541_v30 = vpop.f32.mrb[59].mxu1  ;;  %v2267_v50 = vsel %vm269_vm2, %v5804_v49, -inf }
0x11d2   :  { %2149 = vmax.xlane.f32.xlu0 %v2148_v12 }
0x11d3   :  { %v2270_v59 = vsel %vm269_vm2, %v5807_v51, -inf }
0x11d4   :  { %2271 = vmax.xlane.f32.xlu1 %v2270_v59 }
0x11d6   :  { %2268 = vmax.xlane.f32.xlu0 %v2267_v50  ;;  %v2381_v53 = vpop.f32.mrb[60].mxu1 }
0x11d7   :  { %v5816_v45 = vadd.f32 %v2381_v53, %v5219_v56  ;;  %v4552_v57 = vpop.f32.mrb[61].mxu1 }
0x11d8   :  { %v2384_v41 = vpop.f32.mrb[62].mxu1 }
0x11d9   :  { %v5819_v60 = vadd.f32 %v2384_v41, %v5221_v58  ;;  %v4553_v63 = vpop.f32.mrb[63].mxu1  ;;  %v2388_v35 = vsel %vm269_vm2, %v5816_v45, -inf }
0x11da   :  { %2389 = vmax.xlane.f32.xlu0 %v2388_v35 }
0x11db   :  { %v2391_v52 = vsel %vm269_vm2, %v5819_v60, -inf }
0x11dc   :  { %2392 = vmax.xlane.f32.xlu1 %v2391_v52 }
0x11de   :  { %v2532_v5 = vpop.f32.mrb[64].mxu1 }
0x11df   :  { %v5826_v6 = vadd.f32 %v2532_v5, %v5219_v56  ;;  %v4564_v0 = vpop.f32.mrb[65].mxu1 }
0x11e0   :  { %v2535_v1 = vpop.f32.mrb[66].mxu1 }
0x11e1   :  { %v5829_v62 = vadd.f32 %v2535_v1, %v5221_v58  ;;  %v4565_v31 = vpop.f32.mrb[67].mxu1  ;;  %v2539_v9 = vsel %vm269_vm2, %v5826_v6, -inf }
0x11e2   :  { %2540 = vmax.xlane.f32.xlu0 %v2539_v9 }
0x11e3   :  { %v2542_v11 = vsel %vm269_vm2, %v5829_v62, -inf }
0x11e4   :  { %2543 = vmax.xlane.f32.xlu1 %v2542_v11 }
0x11e6   :  { %v2651_v13 = vpop.f32.mrb[68].mxu1 }
0x11e7   :  { %v5836_v54 = vadd.f32 %v2651_v13, %v5219_v56  ;;  %v4576_v55 = vpop.f32.mrb[69].mxu1 }
0x11e8   :  { %v2654_v3 = vpop.f32.mrb[70].mxu1 }
0x11e9   :  { %v5839_v8 = vadd.f32 %v2654_v3, %v5221_v58  ;;  %v4577_v17 = vpop.f32.mrb[71].mxu1  ;;  %v2658_v21 = vsel %vm269_vm2, %v5836_v54, -inf }
0x11ea   :  { %2659 = vmax.xlane.f32.xlu0 %v2658_v21 }
0x11eb   :  { %v2661_v23 = vsel %vm269_vm2, %v5839_v8, -inf }
0x11ec   :  { %2662 = vmax.xlane.f32.xlu1 %v2661_v23 }
0x11ee   :  { %v2773_v44 = vpop.f32.mrb[72].mxu1 }
0x11ef   :  { %v5846_v24 = vadd.f32 %v2773_v44, %v5219_v56  ;;  %v4588_v27 = vpop.f32.mrb[73].mxu1 }
0x11f0   :  { %v2776_v28 = vpop.f32.mrb[74].mxu1 }
0x11f1   :  { %v5849_v19 = vadd.f32 %v2776_v28, %v5221_v58  ;;  %v4589_v33 = vpop.f32.mrb[75].mxu1  ;;  %v2780_v22 = vsel %vm269_vm2, %v5846_v24, -inf }
0x11f2   :  { %2781 = vmax.xlane.f32.xlu0 %v2780_v22 }
0x11f3   :  { %v2783_v26 = vsel %vm269_vm2, %v5849_v19, -inf }
0x11f4   :  { %2784 = vmax.xlane.f32.xlu1 %v2783_v26 }
0x11f6   :  { %v2894_v37 = vpop.f32.mrb[76].mxu1 }
0x11f7   :  { %v5856_v29 = vadd.f32 %v2894_v37, %v5219_v56  ;;  %v4600_v32 = vpop.f32.mrb[77].mxu1 }
0x11f8   :  { %v2897_v4 = vpop.f32.mrb[78].mxu1 }
0x11f9   :  { %v5859_v14 = vadd.f32 %v2897_v4, %v5221_v58  ;;  %v4601_v42 = vpop.f32.mrb[79].mxu1  ;;  %v2901_v47 = vsel %vm269_vm2, %v5856_v29, -inf }
0x11fa   :  { %2902 = vmax.xlane.f32.xlu0 %v2901_v47 }
0x11fb   :  { %v2904_v20 = vsel %vm269_vm2, %v5859_v14, -inf }
0x11fc   :  { %2905 = vmax.xlane.f32.xlu1 %v2904_v20 }
0x120d   :  { %2290 = vrot.lane.b32.xlu1 %v5728_v34, %s6359_s22 }
0x1210   :  { %2169 = vrot.lane.b32.xlu0 %v5728_v34, %s6358_s21 }
0x1257   :  { %v2028_v56 = vpop.xlane.xlu0 %2027 }
0x1258   :  { %v2032_v48 = vsub.f32 %v5786_v46, %v2028_v56 }
0x1259   :  { %v2031_v58 = vpop.xlane.xlu1 %2030 }
0x125a   :  { %v2034_v61 = vmul.f32 1.442695, %v2032_v48  ;;  %v2033_v30 = vsub.f32 %v5792_v39, %v2031_v58 }
0x125b   :  { %v2147_v12 = vpop.xlane.xlu0 %2146 }
0x125c   :  { %4914 = vpow2.f32 %v2034_v61  ;;  %v2036_v59 = vmul.f32 1.442695, %v2033_v30  ;;  %v2151_v50 = vsub.f32 %v5789_v38, %v2147_v12 }
0x125e   :  { %4916 = vpow2.f32 %v2036_v59  ;;  %v2153_v53 = vmul.f32 1.442695, %v2151_v50 }
0x125f   :  { %v2150_v57 = vpop.xlane.xlu0 %2149 }
0x1260   :  { %4918 = vpow2.f32 %v2153_v53  ;;  %v2152_v41 = vsub.f32 %v5799_v43, %v2150_v57 }
0x1261   :  { %v2272_v63 = vpop.xlane.xlu1 %2271 }
0x1262   :  { %v2155_v35 = vmul.f32 1.442695, %v2152_v41  ;;  %v2274_v52 = vsub.f32 %v5807_v51, %v2272_v63 }
0x1263   :  { %v2269_v46 = vpop.xlane.xlu0 %2268 }
0x1264   :  { %4920 = vpow2.f32 %v2155_v35  ;;  %v2277_v5 = vmul.f32 1.442695, %v2274_v52  ;;  %v2273_v39 = vsub.f32 %v5804_v49, %v2269_v46 }
0x1266   :  { %v5875_v0 = vpop.eup %4914  ;;  %4922 = vpow2.f32 %v2277_v5  ;;  %v2275_v1 = vmul.f32 1.442695, %v2273_v39 }
0x1267   :  { %v2390_v38 = vpop.xlane.xlu0 %2389  ;;  %v2038_v31 = vsel %vm269_vm2, %v5875_v0, 0.0 }
0x1268   :  { %v5879_v9 = vpop.eup %4916  ;;  %4924 = vpow2.f32 %v2275_v1  ;;  %v2394_v43 = vsub.f32 %v5816_v45, %v2390_v38  ;;  %2039 = vadd.xlane.f32.xlu0 %v2038_v31 }
0x1269   :  { %v2393_v51 = vpop.xlane.xlu1 %2392  ;;  %v2041_v11 = vsel %vm269_vm2, %v5879_v9, 0.0 }
0x126a   :  { %v5884_v13 = vpop.eup %4918  ;;  %v2396_v49 = vmul.f32 1.442695, %v2394_v43  ;;  %v2395_v55 = vsub.f32 %v5819_v60, %v2393_v51  ;;  %2042 = vadd.xlane.f32.xlu1 %v2041_v11 }
0x126b   :  { %v2157_v3 = vsel %vm269_vm2, %v5884_v13, 0.0 }
0x126c   :  { %4926 = vpow2.f32 %v2396_v49  ;;  %v2398_v17 = vmul.f32 1.442695, %v2395_v55  ;;  %2158 = vadd.xlane.f32.xlu0 %v2157_v3 }
0x126e   :  { %v5889_v21 = vpop.eup %4920  ;;  %4928 = vpow2.f32 %v2398_v17 }
0x126f   :  { %v2541_v45 = vpop.xlane.xlu0 %2540  ;;  %v2160_v23 = vsel %vm269_vm2, %v5889_v21, 0.0 }
0x1270   :  { %v5893_v44 = vpop.eup %4922  ;;  %v2545_v27 = vsub.f32 %v5826_v6, %v2541_v45  ;;  %2161 = vadd.xlane.f32.xlu1 %v2160_v23 }
0x1271   :  { %v2544_v60 = vpop.xlane.xlu1 %2543  ;;  %v2282_v26 = vsel %vm269_vm2, %v5893_v44, 0.0 }
0x1272   :  { %v5896_v28 = vpop.eup %4924  ;;  %v2547_v33 = vmul.f32 1.442695, %v2545_v27  ;;  %v2546_v22 = vsub.f32 %v5829_v62, %v2544_v60 }
0x1273   :  { %v2279_v37 = vsel %vm269_vm2, %v5896_v28, 0.0 }
0x1274   :  { %4930 = vpow2.f32 %v2547_v33  ;;  %v2549_v32 = vmul.f32 1.442695, %v2546_v22  ;;  %2283 = vadd.xlane.f32.xlu1 %v2282_v26  ;;  %2280 = vadd.xlane.f32.xlu0 %v2279_v37 }
0x1276   :  { %v5903_v4 = vpop.eup %4926  ;;  %4932 = vpow2.f32 %v2549_v32 }
0x1277   :  { %v2660_v6 = vpop.xlane.xlu0 %2659  ;;  %v2400_v42 = vsel %vm269_vm2, %v5903_v4, 0.0 }
0x1278   :  { %v5907_v47 = vpop.eup %4928  ;;  %v2664_v62 = vsub.f32 %v5836_v54, %v2660_v6  ;;  %2401 = vadd.xlane.f32.xlu0 %v2400_v42 }
0x1279   :  { %v2663_v20 = vpop.xlane.xlu1 %2662  ;;  %v2403_v56 = vsel %vm269_vm2, %v5907_v47, 0.0 }
0x127a   :  { %v2666_v48 = vmul.f32 1.442695, %v2664_v62  ;;  %v2665_v58 = vsub.f32 %v5839_v8, %v2663_v20  ;;  %2404 = vadd.xlane.f32.xlu1 %v2403_v56 }
0x127c   :  { %4934 = vpow2.f32 %v2666_v48  ;;  %v2668_v61 = vmul.f32 1.442695, %v2665_v58 }
0x127e   :  { %v5913_v30 = vpop.eup %4930  ;;  %4936 = vpow2.f32 %v2668_v61 }
0x127f   :  { %v2551_v12 = vsel %vm269_vm2, %v5913_v30, 0.0  ;;  %v2782_v8 = vpop.xlane.xlu0 %2781 }
0x1280   :  { %v5917_v59 = vpop.eup %4932  ;;  %2552 = vadd.xlane.f32.xlu0 %v2551_v12  ;;  %v2786_v49 = vsub.f32 %v5846_v24, %v2782_v8 }
0x1281   :  { %v2785_v54 = vpop.xlane.xlu1 %2784  ;;  %v2554_v50 = vsel %vm269_vm2, %v5917_v59, 0.0 }
0x1282   :  { %v2787_v53 = vsub.f32 %v5849_v19, %v2785_v54  ;;  %2555 = vadd.xlane.f32.xlu1 %v2554_v50  ;;  %v2788_v55 = vmul.f32 1.442695, %v2786_v49 }
0x1284   :  { %v2790_v57 = vmul.f32 1.442695, %v2787_v53 }
0x1286   :  { %v5922_v41 = vpop.eup %4934  ;;  %4938 = vpow2.f32 %v2790_v57 }
0x1287   :  { %v2903_v63 = vpop.xlane.xlu0 %2902  ;;  %v2670_v35 = vsel %vm269_vm2, %v5922_v41, 0.0 }
0x1288   :  { %v5926_v52 = vpop.eup %4936  ;;  %v2907_v46 = vsub.f32 %v5856_v29, %v2903_v63  ;;  %2671 = vadd.xlane.f32.xlu1 %v2670_v35 }
0x1289   :  { %v2906_v5 = vpop.xlane.xlu1 %2905  ;;  %v2673_v19 = vsel %vm269_vm2, %v5926_v52, 0.0 }
0x128a   :  { %v2909_v39 = vmul.f32 1.442695, %v2907_v46  ;;  %v2908_v1 = vsub.f32 %v5859_v14, %v2906_v5 }
0x128b   :  { %v2170_v17 = vpop.permute.xlu0 %2169 }
0x128c   :  { %4940 = vpow2.f32 %v2909_v39  ;;  %v2911_v38 = vmul.f32 1.442695, %v2908_v1  ;;  %2674 = vadd.xlane.f32.xlu1 %v2673_v19 }
0x128d   :  { %v2291_v45 = vpop.permute.xlu1 %2290 }
0x128e   :  { %4942 = vpow2.f32 %v2911_v38 }
0x128f   :  { %4944 = vpow2.f32 %v2788_v55 }
0x1290   :  { %v5932_v31 = vpop.eup %4938 }
0x1291   :  { %v2795_v43 = vsel %vm269_vm2, %v5932_v31, 0.0 }
0x1292   :  { %2796 = vadd.xlane.f32.xlu1 %v2795_v43 }
0x1296   :  { %v5936_v51 = vpop.eup %4940  ;;  %2411 = vrot.lane.b32.xlu0 %v5728_v34, %s6361_s28 }
0x1297   :  { %v2913_v29 = vsel %vm269_vm2, %v5936_v51, 0.0 }
0x1298   :  { %v5942_v14 = vpop.eup %4942  ;;  %2914 = vadd.xlane.f32.xlu1 %v2913_v29 }
0x1299   :  { %v2916_v11 = vsel %vm269_vm2, %v5942_v14, 0.0  ;;  %v5949_v3 = vpop.eup %4944 }
0x129a   :  { %v2792_v34 = vsel %vm269_vm2, %v5949_v3, 0.0 }
0x129c   :  { %2917 = vadd.xlane.f32.xlu1 %v2916_v11 }
0x12ad   :  { %2682 = vrot.lane.b32.xlu1 %v5734_v2, %s6358_s21 }
0x12b5   :  { %2793 = vadd.xlane.f32.xlu0 %v2792_v34 }
0x12cb   :  { %2803 = vrot.lane.b32.xlu0 %v5734_v2, %s6359_s22 }
0x12cf   :  { %2924 = vrot.lane.b32.xlu0 %v5734_v2, %s6361_s28 }
0x12f5   :  { %v2040_v24 = vpop.xlane.xlu0 %2039 }
0x12f6   :  { %4946 = vrcp.f32 %v2040_v24 }
0x12f7   :  { %v2043_v23 = vpop.xlane.xlu1 %2042 }
0x12f8   :  { %4948 = vrcp.f32 %v2043_v23 }
0x12f9   :  { %v2159_v27 = vpop.xlane.xlu0 %2158 }
0x12fa   :  { %4950 = vrcp.f32 %v2159_v27 }
0x12fd   :  { %v2162_v60 = vpop.xlane.xlu1 %2161 }
0x12fe   :  { %4952 = vrcp.f32 %v2162_v60 }
0x1300   :  { %v4947_v33 = vpop.eup %4946 }
0x1301   :  { %v2284_v22 = vpop.xlane.xlu1 %2283  ;;  %v2281_v26 = vpop.xlane.xlu0 %2280  ;;  %v2046_v32 = vmul.f32 %v4947_v33, %v5875_v0 }
0x1302   :  { %v4949_v37 = vpop.eup %4948  ;;  %4954 = vrcp.f32 %v2284_v22 }
0x1303   :  { %v2047_v6 = vmul.f32 %v4949_v37, %v5879_v9  ;;  %4956 = vrcp.f32 %v2281_v26 }
0x1304   :  { %v4951_v62 = vpop.eup %4950 }
0x1305   :  { %v2048_v42 = vpack.c.bf16 %v2047_v6, %v2046_v32  ;;  %v2165_v0 = vmul.f32 %v4951_v62, %v5884_v13  ;;  %v2402_v58 = vpop.xlane.xlu0 %2401 }
0x1307   :  { %4521 = vmatmul.mubr.msk.bf16.vlgmr.msra.gmra.mrb[52].mxu0 %vm269_vm2, %v2048_v42  ;;  %v2405_v48 = vpop.xlane.xlu1 %2404 }
0x1308   :  { %v4953_v20 = vpop.eup %4952  ;;  %4531 = vmatpush3.bf16.msra.mxu0 %v2170_v17  ;;  %4532 = vmatprep.mubr.msk.bf16.mxu0 %vm5023_vm1, %v5022_v40  ;;  %4958 = vrcp.f32 %v2405_v48 }
0x1309   :  { %v2166_v56 = vmul.f32 %v4953_v20, %v5889_v21  ;;  %4542 = vmatprep.subr.bf16.mxu0 %v5022_v40  ;;  %4960 = vrcp.f32 %v2402_v58 }
0x130b   :  { %v2167_v61 = vpack.c.bf16 %v2166_v56, %v2165_v0 }
0x130c   :  { %v4955_v9 = vpop.eup %4954 }
0x130d   :  { %v4957_v12 = vpop.eup %4956  ;;  %v2288_v54 = vmul.f32 %v4955_v9, %v5893_v44  ;;  %v2553_v50 = vpop.xlane.xlu0 %2552 }
0x130e   :  { %v2287_v21 = vmul.f32 %v4957_v12, %v5896_v28 }
0x130f   :  { %4533 = vmatmul.mubr.msk.bf16.vlgmr.msra.gmra.mrb[56].mxu0 %vm269_vm2, %v2167_v61  ;;  %v2556_v53 = vpop.xlane.xlu1 %2555 }
0x1310   :  { %4543 = vmatpush3.bf16.msra.mxu0 %v2291_v45  ;;  %4544 = vmatprep.mubr.msk.bf16.mxu0 %vm5023_vm1, %v5022_v40  ;;  %4962 = vrcp.f32 %v2556_v53  ;;  %v2289_v8 = vpack.c.bf16 %v2288_v54, %v2287_v21 }
0x1311   :  { %4554 = vmatprep.subr.bf16.mxu0 %v5022_v40  ;;  %4964 = vrcp.f32 %v2553_v50  ;;  %v2412_v63 = vpop.permute.xlu0 %2411 }
0x1312   :  { %v4959_v57 = vpop.eup %4958 }
0x1313   :  { %v4961_v35 = vpop.eup %4960  ;;  %v2409_v44 = vmul.f32 %v4959_v57, %v5907_v47  ;;  %v4762_v57 = vld [vmem:[%s6356_s3 + $0x20] sm:$0xff]  }
0x1314   :  { %v2408_v28 = vmul.f32 %v4961_v35, %v5903_v4  ;;  %4608 = vmatprep.subr.bf16.mxu1 %v4762_v57 }
0x1315   :  { %v2672_v13 = vpop.xlane.xlu1 %2671  ;;  %4609 = vmatpush3.bf16.msra.mxu1 %v4762_v57 }
0x1316   :  { %v2410_v5 = vpack.c.bf16 %v2409_v44, %v2408_v28 }
0x1317   :  { %4545 = vmatmul.mubr.msk.bf16.vlgmr.msra.gmra.mrb[60].mxu0 %vm269_vm2, %v2289_v8 }
0x1318   :  { %4555 = vmatpush3.bf16.msra.mxu0 %v2412_v63  ;;  %4556 = vmatprep.mubr.msk.bf16.mxu0 %vm5023_vm1, %v5022_v40 }
0x1319   :  { %4566 = vmatprep.subr.bf16.mxu0 %v5022_v40  ;;  %v2675_v46 = vpop.xlane.xlu1 %2674 }
0x131a   :  { %v4963_v39 = vpop.eup %4962  ;;  %4966 = vrcp.f32 %v2675_v46 }
0x131b   :  { %v4965_v1 = vpop.eup %4964  ;;  %4968 = vrcp.f32 %v2672_v13  ;;  %v2560_v19 = vmul.f32 %v4963_v39, %v5917_v59  ;;  %v4764_v39 = vld [vmem:[%s6356_s3 + $0x30] sm:$0xff]  }
0x131c   :  { %v2559_v4 = vmul.f32 %v4965_v1, %v5913_v30 }
0x131e   :  { %v2561_v43 = vpack.c.bf16 %v2560_v19, %v2559_v4  ;;  %v4765_v19 = vld [vmem:[%s6356_s3 + $0x38] sm:$0xff]  }
0x131f   :  { %4557 = vmatmul.mubr.msk.bf16.vlgmr.msra.gmra.mrb[64].mxu0 %vm269_vm2, %v2410_v5  ;;  %v2797_v47 = vpop.xlane.xlu1 %2796  ;;  %v4763_v5 = vld [vmem:[%s6356_s3 + $0x28] sm:$0xff]  }
0x1320   :  { %4567 = vmatpush3.bf16.msra.mxu0 %v5734_v2  ;;  %4568 = vmatprep.mubr.msk.bf16.mxu0 %vm5023_vm1, %v5022_v40  ;;  %4970 = vrcp.f32 %v2797_v47 }
0x1321   :  { %4578 = vmatprep.subr.bf16.mxu0 %v5022_v40  ;;  %4610 = vmatprep.subr.bf16.mxu1 %v4763_v5 }
0x1322   :  { %4611 = vmatpush3.bf16.msra.mxu1 %v4763_v5 }
0x1323   :  { %4612 = vmatprep.subr.bf16.mxu1 %v4764_v39 }
0x1324   :  { %v4967_v29 = vpop.eup %4966 }
0x1325   :  { %v2915_v38 = vpop.xlane.xlu1 %2914  ;;  %v4969_v2 = vpop.eup %4968  ;;  %v2679_v49 = vmul.f32 %v4967_v29, %v5926_v52 }
0x1326   :  { %v2678_v55 = vmul.f32 %v4969_v2, %v5922_v41  ;;  %4613 = vmatpush3.bf16.msra.mxu1 %v4764_v39 }
0x1327   :  { %4569 = vmatmul.mubr.msk.bf16.vlgmr.msra.gmra.mrb[68].mxu0 %vm269_vm2, %v2561_v43  ;;  %4614 = vmatprep.subr.bf16.mxu1 %v4765_v19 }
0x1328   :  { %4580 = vmatprep.mubr.msk.bf16.mxu0 %vm5023_vm1, %v5022_v40  ;;  %v2680_v34 = vpack.c.bf16 %v2679_v49, %v2678_v55 }
0x1329   :  { %v2918_v11 = vpop.xlane.xlu1 %2917 }
0x132a   :  { %v4971_v41 = vpop.eup %4970  ;;  %4615 = vmatpush3.bf16.msra.mxu1 %v4765_v19 }
0x132b   :  { %v2801_v45 = vmul.f32 %v4971_v41, %v5932_v31 }
0x132d   :  { %v2683_v59 = vpop.permute.xlu1 %2682 }
0x132e   :  { %4579 = vmatpush3.bf16.msra.mxu0 %v2683_v59 }
0x132f   :  { %4590 = vmatprep.subr.bf16.mxu0 %v5022_v40 }
0x1331   :  { %4581 = vmatmul.mubr.msk.bf16.vlgmr.msra.gmra.mrb[72].mxu0 %vm269_vm2, %v2680_v34 }
0x1332   :  { %4592 = vmatprep.mubr.msk.bf16.mxu0 %vm5023_vm1, %v5022_v40 }
0x1342   :  { %v2794_v30 = vpop.xlane.xlu0 %2793 }
0x1343   :  { %4972 = vrcp.f32 %v2794_v30 }
0x1344   :  { %4974 = vrcp.f32 %v2918_v11 }
0x1345   :  { %4976 = vrcp.f32 %v2915_v38 }
0x1346   :  { %v2804_v17 = vpop.permute.xlu0 %2803 }
0x1347   :  { %4591 = vmatpush3.bf16.msra.mxu0 %v2804_v17 }
0x1348   :  { %4602 = vmatprep.subr.bf16.mxu0 %v5022_v40 }
0x134a   :  { %v2925_v60 = vpop.permute.xlu0 %2924 }
0x134d   :  { %v4973_v52 = vpop.eup %4972 }
0x134e   :  { %v2800_v24 = vmul.f32 %v4973_v52, %v5949_v3  ;;  %v4975_v27 = vpop.eup %4974 }
0x134f   :  { %v4977_v33 = vpop.eup %4976  ;;  %v2922_v22 = vmul.f32 %v4975_v27, %v5942_v14 }
0x1350   :  { %v2802_v23 = vpack.c.bf16 %v2801_v45, %v2800_v24  ;;  %v2921_v26 = vmul.f32 %v4977_v33, %v5936_v51 }
0x1352   :  { %4593 = vmatmul.mubr.msk.bf16.vlgmr.msra.gmra.mrb[76].mxu0 %vm269_vm2, %v2802_v23  ;;  %v2923_v37 = vpack.c.bf16 %v2922_v22, %v2921_v26 }
0x1353   :  { %4603 = vmatpush3.bf16.msra.mxu0 %v2925_v60  ;;  %4604 = vmatprep.mubr.msk.bf16.mxu0 %vm5023_vm1, %v5022_v40 }
0x135a   :  { %4605 = vmatmul.mubr.msk.bf16.vlgmr.msra.gmra.mrb[80].mxu0 %vm269_vm2, %v2923_v37 }
0x135b   :  { %3281 = vmatprep.mubr.bf16.mxu0 %v5021_v18 }
0x13da   :  { %v6003_v31 = vpop.f32.mrb[52].mxu0 }
0x13db   :  { %v4522_v3 = vpop.f32.mrb[53].mxu0 }
0x13dc   :  { %v2090_v32 = vpop.f32.mrb[54].mxu0 }
0x13dd   :  { %v4523_v6 = vpop.f32.mrb[55].mxu0 }
0x13e2   :  { %v2209_v42 = vpop.f32.mrb[56].mxu0 }
0x13e3   :  { %v4534_v62 = vpop.f32.mrb[57].mxu0 }
0x13e4   :  { %v2212_v20 = vpop.f32.mrb[58].mxu0 }
0x13e5   :  { %v4676_v56 = vpack.i.bf16 %v2212_v20, %v2209_v42  ;;  %v4535_v48 = vpop.f32.mrb[59].mxu0 }
0x13e7   :  { %4677 = vrot.lane.b32.xlu0 %v4676_v56, %s6362_s1 }
0x13ea   :  { %v2330_v40 = vpop.f32.mrb[60].mxu0 }
0x13eb   :  { %v4546_v14 = vpop.f32.mrb[61].mxu0 }
0x13ec   :  { %v2333_v51 = vpop.f32.mrb[62].mxu0 }
0x13ed   :  { %v4681_v0 = vpack.i.bf16 %v2333_v51, %v2330_v40  ;;  %v4547_v58 = vpop.f32.mrb[63].mxu0 }
0x13ef   :  { %4682 = vrot.lane.b32.xlu1 %v4681_v0, %s6360_s4 }
0x13f2   :  { %v2451_v9 = vpop.f32.mrb[64].mxu0 }
0x13f3   :  { %v4558_v61 = vpop.f32.mrb[65].mxu0 }
0x13f4   :  { %v2454_v12 = vpop.f32.mrb[66].mxu0 }
0x13f5   :  { %v4686_v54 = vpack.i.bf16 %v2454_v12, %v2451_v9  ;;  %v4559_v21 = vpop.f32.mrb[67].mxu0 }
0x13f7   :  { %4687 = vrot.lane.b32.xlu1 %v4686_v54, %s5027_s25  ;;  %v4122_v54 = vld [vmem:[%s6314_s5 + $0x1] ss:$0 sm:$0xff] }
0x13fa   :  { %v2600_v50 = vpop.f32.mrb[68].mxu0 }
0x13fb   :  { %v4570_v53 = vpop.f32.mrb[69].mxu0 }
0x13fc   :  { %v2603_v13 = vpop.f32.mrb[70].mxu0 }
0x13fd   :  { %v4571_v8 = vpop.f32.mrb[71].mxu0 }
0x1404   :  { %v2722_v63 = vpop.f32.mrb[72].mxu0 }
0x1405   :  { %v4582_v35 = vpop.f32.mrb[73].mxu0 }
0x1406   :  { %v2725_v44 = vpop.f32.mrb[74].mxu0 }
0x1407   :  { %v4691_v28 = vpack.i.bf16 %v2725_v44, %v2722_v63  ;;  %v4583_v46 = vpop.f32.mrb[75].mxu0 }
0x1409   :  { %4692 = vrot.lane.b32.xlu0 %v4691_v28, %s6362_s1 }
0x1425   :  { %v2843_v1 = vpop.f32.mrb[76].mxu0 }
0x1426   :  { %v4594_v47 = vpop.f32.mrb[77].mxu0 }
0x1427   :  { %v2846_v4 = vpop.f32.mrb[78].mxu0 }
0x1428   :  { %v4696_v38 = vpack.i.bf16 %v2846_v4, %v2843_v1  ;;  %v4595_v43 = vpop.f32.mrb[79].mxu0 }
0x142a   :  { %4697 = vrot.lane.b32.xlu0 %v4696_v38, %s6360_s4 }
0x142d   :  { %v2964_v29 = vpop.f32.mrb[80].mxu0 }
0x142e   :  { %v4606_v11 = vpop.f32.mrb[81].mxu0 }
0x142f   :  { %v2967_v2 = vpop.f32.mrb[82].mxu0 }
0x1430   :  { %v4701_v49 = vpack.i.bf16 %v2967_v2, %v2964_v29  ;;  %v4607_v55 = vpop.f32.mrb[83].mxu0 }
0x1432   :  { %4702 = vrot.lane.b32.xlu1 %v4701_v49, %s5027_s25 }
0x1459   :  { %v4678_v59 = vpop.permute.xlu0 %4677 }
0x145a   :  { %v4680_v30 = vunpack.i.h.bf16 %v4678_v59  ;;  %v4679_v17 = vunpack.i.l.bf16 %v4678_v59 }
0x145c   :  { %v2483_v24 = vsel %vm269_vm2, %v2090_v32, %v4680_v30  ;;  %v2482_v23 = vsel %vm269_vm2, %v6003_v31, %v4679_v17 }
0x1461   :  { %v4683_v34 = vpop.permute.xlu1 %4682 }
0x1462   :  { %v4685_v41 = vunpack.i.h.bf16 %v4683_v34  ;;  %v4684_v52 = vunpack.i.l.bf16 %v4683_v34 }
0x1464   :  { %v2484_v33 = vsel %vm775_vm5, %v2482_v23, %v4684_v52  ;;  %v2485_v22 = vsel %vm775_vm5, %v2483_v24, %v4685_v41  ;;  %v4768_v23 = vld [vmem:[%s6317_s8 + $0x44] ss:$8 sps:$4 sm:$0xff]  }
0x1465   :  { %3249 = vmatprep.subr.bf16.mxu0 %v4768_v23 }
0x1469   :  { %v4688_v45 = vpop.permute.xlu1 %4687 }
0x146a   :  { %v4690_v27 = vunpack.i.h.bf16 %v4688_v45  ;;  %v4689_v60 = vunpack.i.l.bf16 %v4688_v45 }
0x146c   :  { %v2486_v26 = vsel %vm778_vm6, %v2484_v33, %v4689_v60  ;;  %v2487_v37 = vsel %vm778_vm6, %v2485_v22, %v4690_v27  ;;  %v4766_v27 = vld [vmem:[%s6317_s8 + $0x40] ss:$8 sps:$4 sm:$0xff]   ;;  %v4771_v60 = vld [vmem:[%s6317_s8 + $0x54] ss:$8 sps:$4 sm:$0xff]   ;;  %v4769_v33 = vld [vmem:[%s6317_s8 + $0x50] ss:$8 sps:$4 sm:$0xff]  }
0x146d   :  { %v3010_v3 = vpack.c.bf16 %v2487_v37, %v2486_v26  ;;  %3250 = vmatpush1.bf16.msra.mxu0 %v4766_v27  ;;  %v4774_v22 = vld [vmem:[%s6317_s8 + $0x64] ss:$8 sps:$4 sm:$0xff]   ;;  %v4772_v26 = vld [vmem:[%s6317_s8 + $0x60] ss:$8 sps:$4 sm:$0xff]   ;;  %v4777_v37 = vld [vmem:[%s6317_s8 + $0x74] ss:$8 sps:$4 sm:$0xff]  }
0x146e   :  { %3251 = vmatprep.subr.bf16.mxu0 %v4771_v60 }
0x146f   :  { %4616 = vmatprep.mubr.msk.bf16.mxu1 %vm82_vm0, %v3010_v3  ;;  %v4775_v3 = vld [vmem:[%s6317_s8 + $0x70] ss:$8 sps:$4 sm:$0xff]  }
0x1471   :  { %3252 = vmatpush1.bf16.msra.mxu0 %v4769_v33 }
0x1472   :  { %3253 = vmatprep.subr.bf16.mxu0 %v4774_v22 }
0x1475   :  { %3254 = vmatpush1.bf16.msra.mxu0 %v4772_v26 }
0x1476   :  { %3255 = vmatprep.subr.bf16.mxu0 %v4777_v37 }
0x1479   :  { %3256 = vmatpush1.bf16.msra.mxu0 %v4775_v3 }
0x147b   :  { %v4693_v6 = vpop.permute.xlu0 %4692 }
0x147c   :  { %v4695_v62 = vunpack.i.h.bf16 %v4693_v6  ;;  %v4694_v32 = vunpack.i.l.bf16 %v4693_v6  ;;  %v4778_v6 = vld [vmem:[%s6319_s10 + $0xc0] sm:$0xff]  }
0x147d   :  { %4342 = vmatprep.subr.bf16.mxu1 %v4778_v6 }
0x147e   :  { %v2996_v48 = vsel %vm269_vm2, %v2603_v13, %v4695_v62  ;;  %v2995_v40 = vsel %vm269_vm2, %v2600_v50, %v4694_v32  ;;  %v4780_v62 = vld [vmem:[%s6319_s10 + $0xc8] sm:$0xff]  }
0x147f   :  { %v4781_v32 = vld [vmem:[%s6319_s10 + $0x88] sm:$0xff]  }
0x149c   :  { %v4698_v42 = vpop.permute.xlu0 %4697 }
0x149d   :  { %v4700_v20 = vunpack.i.h.bf16 %v4698_v42  ;;  %v4699_v56 = vunpack.i.l.bf16 %v4698_v42  ;;  %v4779_v42 = vld [vmem:[%s6319_s10 + $0x80] sm:$0xff]  }
0x149f   :  { %v2997_v0 = vsel %vm775_vm5, %v2995_v40, %v4699_v56  ;;  %v2998_v58 = vsel %vm775_vm5, %v2996_v48, %v4700_v20  ;;  %v4782_v20 = vld [vmem:[%s6319_s10 + $0xd0] sm:$0xff]   ;;  %v4785_v48 = vld [vmem:[%s6319_s10 + $0x98] sm:$0xff]   ;;  %v4786_v40 = vld [vmem:[%s6319_s10 + $0xe0] sm:$0xff]  }
0x14a0   :  { %v4783_v56 = vld [vmem:[%s6319_s10 + $0x90] sm:$0xff]  }
0x14a4   :  { %v4703_v31 = vpop.permute.xlu1 %4702 }
0x14a5   :  { %v4705_v14 = vunpack.i.h.bf16 %v4703_v31  ;;  %v4704_v51 = vunpack.i.l.bf16 %v4703_v31  ;;  %v4784_v31 = vld [vmem:[%s6319_s10 + $0xd8] sm:$0xff]  }
0x14a7   :  { %v2999_v9 = vsel %vm778_vm6, %v2997_v0, %v4704_v51  ;;  %v3000_v61 = vsel %vm778_vm6, %v2998_v58, %v4705_v14  ;;  %v4787_v14 = vld [vmem:[%s6319_s10 + $0xa0] sm:$0xff]   ;;  %v4788_v51 = vld [vmem:[%s6319_s10 + $0xe8] sm:$0xff]  }
0x14a8   :  { %v3011_v12 = vpack.c.bf16 %v3000_v61, %v2999_v9 }
0x14aa   :  { %4617 = vmatmul.mubr.msk.bf16.vlgmr.msra.gmra.mrb[80].mxu1 %vm82_vm0, %v3011_v12 }
0x14ab   :  { %4343 = vmatpush3.bf16.msra.mxu1 %v4779_v42 }
0x14ac   :  { %4344 = vmatprep.subr.bf16.mxu1 %v4780_v62 }
0x14af   :  { %4345 = vmatpush3.bf16.msra.mxu1 %v4781_v32 }
0x14b0   :  { %4346 = vmatprep.subr.bf16.mxu1 %v4782_v20 }
0x14b3   :  { %4347 = vmatpush3.bf16.msra.mxu1 %v4783_v56 }
0x14b4   :  { %4348 = vmatprep.subr.bf16.mxu1 %v4784_v31 }
0x14b7   :  { %4349 = vmatpush3.bf16.msra.mxu1 %v4785_v48 }
0x14b8   :  { %4350 = vmatprep.subr.bf16.mxu1 %v4786_v40 }
0x14bb   :  { %4351 = vmatpush3.bf16.msra.mxu1 %v4787_v14 }
0x14bc   :  { %4352 = vmatprep.subr.bf16.mxu1 %v4788_v51 }
0x157d   :  { %v4618_v21 = vpop.f32.mrb[80].mxu1 }
0x157e   :  { %v3084_v53 = vpop.f32.mrb[81].mxu1  ;;  %v3093_v50 = vadd.f32 %v4618_v21, %v4122_v54 }
0x157f   :  { %v3085_v13 = vadd.f32 %v4122_v54, %v3084_v53  ;;  %v4619_v8 = vpop.f32.mrb[82].mxu1 }
0x1580   :  { %v3087_v57 = vpop.f32.mrb[83].mxu1  ;;  %v6045_v44 = vadd.f32 %v3093_v50, %v5675_v16  ;;  %v3096_v28 = vadd.f32 %v4619_v8, %v4122_v54 }
0x1581   :  { %v6042_v63 = vadd.f32 %v3085_v13, %v5665_v10  ;;  %v3088_v35 = vadd.f32 %v4122_v54, %v3087_v57 }
0x1582   :  { %v6055_v1 = vadd.f32 %v3096_v28, %v5678_v7  ;;  %v3113_v10 = vsel %vm82_vm0, %v6045_v44, 0.0  ;;  %v4131_v28 = vld [vmem:[%s6315_s6 + $0x1] ss:$0 sm:$0xff] }
0x1583   :  { %v6048_v46 = vadd.f32 %v3088_v35, %v5668_v36  ;;  %v3107_v5 = vsel %vm82_vm0, %v6042_v63, 0.0 }
0x1584   :  { %3108 = vadd.xlane.f32.xlu0 %v3107_v5  ;;  %v3116_v16 = vsel %vm82_vm0, %v6055_v1, 0.0 }
0x1585   :  { %v3110_v39 = vsel %vm82_vm0, %v6048_v46, 0.0 }
0x1586   :  { %3111 = vadd.xlane.f32.xlu1 %v3110_v39 }
0x1588   :  { %3114 = vadd.xlane.f32.xlu0 %v3113_v10 }
0x158c   :  { %3117 = vadd.xlane.f32.xlu0 %v3116_v16 }
0x1611   :  { %v3109_v36 = vpop.xlane.xlu0 %3108 }
0x1612   :  { %v3119_v19 = vmul.f32 0.015625, %v3109_v36 }
0x1613   :  { %v3112_v47 = vpop.xlane.xlu1 %3111 }
0x1614   :  { %v6062_v4 = vsub.f32 %v6042_v63, %v3119_v19  ;;  %v3120_v38 = vmul.f32 0.015625, %v3112_v47  ;;  %v4132_v19 = vld [vmem:[%s6316_s7 + $0x1] ss:$0 sm:$0xff] }
0x1615   :  { %v3115_v43 = vpop.xlane.xlu0 %3114 }
0x1616   :  { %v6065_v29 = vsub.f32 %v6048_v46, %v3120_v38  ;;  %v3121_v7 = vmul.f32 0.015625, %v3115_v43  ;;  %v3127_v11 = vmul.f32 %v6062_v4, %v6062_v4 }
0x1618   :  { %v6070_v2 = vsub.f32 %v6045_v44, %v3121_v7  ;;  %v3131_v49 = vsel %vm82_vm0, %v3127_v11, 0.0  ;;  %v3128_v55 = vmul.f32 %v6065_v29, %v6065_v29 }
0x1619   :  { %3132 = vadd.xlane.f32.xlu0 %v3131_v49  ;;  %v3118_v59 = vpop.xlane.xlu0 %3117 }
0x161a   :  { %v3122_v34 = vmul.f32 0.015625, %v3118_v59  ;;  %v3134_v30 = vsel %vm82_vm0, %v3128_v55, 0.0  ;;  %v3129_v17 = vmul.f32 %v6070_v2, %v6070_v2 }
0x161b   :  { %3135 = vadd.xlane.f32.xlu1 %v3134_v30 }
0x161c   :  { %v6079_v41 = vsub.f32 %v6055_v1, %v3122_v34  ;;  %v3137_v52 = vsel %vm82_vm0, %v3129_v17, 0.0  ;;  %v4790_v17 = vld [vmem:[%s6319_s10 + $0xf0] sm:$0xff]  }
0x161d   :  { %3138 = vadd.xlane.f32.xlu0 %v3137_v52  ;;  %v4792_v52 = vld [vmem:[%s6319_s10 + $0xf8] sm:$0xff]  }
0x161e   :  { %v3130_v45 = vmul.f32 %v6079_v41, %v6079_v41 }
0x1620   :  { %v3140_v24 = vsel %vm82_vm0, %v3130_v45, 0.0  ;;  %v4793_v45 = vld [vmem:[%s6319_s10 + $0xb8] sm:$0xff]  }
0x1621   :  { %3141 = vadd.xlane.f32.xlu1 %v3140_v24  ;;  %v4141_v24 = vld [vmem:[%s6318_s9 + $0x2] sm:$0x3] }
0x1622   :  { %v3196_v23 = vrot.slane %v4141_v24, %v5649_v15  ;;  %v3200_v27 = vrot.slane %v4141_v24, %v5655_v25 }
0x16a6   :  { %v3133_v0 = vpop.xlane.xlu0 %3132 }
0x16a7   :  { %v3143_v58 = vmul.f32 0.015625, %v3133_v0 }
0x16a8   :  { %v3136_v9 = vpop.xlane.xlu1 %3135 }
0x16a9   :  { %v3147_v61 = vadd.f32 1e-05, %v3143_v58  ;;  %v3144_v12 = vmul.f32 0.015625, %v3136_v9 }
0x16aa   :  { %v3139_v54 = vpop.xlane.xlu0 %3138 }
0x16ab   :  { %4978 = vrsqrt.f32 %v3147_v61  ;;  %v3148_v21 = vadd.f32 1e-05, %v3144_v12  ;;  %v3145_v53 = vmul.f32 0.015625, %v3139_v54 }
0x16ad   :  { %4980 = vrsqrt.f32 %v3148_v21  ;;  %v3149_v50 = vadd.f32 1e-05, %v3145_v53 }
0x16ae   :  { %v3142_v13 = vpop.xlane.xlu1 %3141 }
0x16af   :  { %4982 = vrsqrt.f32 %v3149_v50  ;;  %v3146_v8 = vmul.f32 0.015625, %v3142_v13 }
0x16b1   :  { %v3150_v57 = vadd.f32 1e-05, %v3146_v8 }
0x16b3   :  { %4984 = vrsqrt.f32 %v3150_v57 }
0x16b5   :  { %v4979_v35 = vpop.eup %4978 }
0x16b6   :  { %v3155_v5 = vmul.f32 %v4979_v35, %v6062_v4  ;;  %v4185_v35 = vld [vmem:[%s6320_s11 + $0x1] ss:$0 sm:$0xff] }
0x16b7   :  { %v4981_v39 = vpop.eup %4980 }
0x16b8   :  { %v3165_v10 = vmul.f32 %v4131_v28, %v3155_v5  ;;  %v3156_v16 = vmul.f32 %v4981_v39, %v6065_v29 }
0x16b9   :  { %v4983_v36 = vpop.eup %4982 }
0x16ba   :  { %v3166_v47 = vmul.f32 %v4131_v28, %v3156_v16  ;;  %v3157_v38 = vmul.f32 %v4983_v36, %v6070_v2  ;;  %v3175_v43 = vadd.f32 %v4132_v19, %v3165_v10  ;;  %v4789_v2 = vld [vmem:[%s6319_s10 + $0xa8] sm:$0xff]  }
0x16bb   :  { %4353 = vmatpush3.bf16.msra.mxu1 %v4789_v2 }
0x16bc   :  { %v3176_v7 = vadd.f32 %v4132_v19, %v3166_v47  ;;  %v3167_v4 = vmul.f32 %v4131_v28, %v3157_v38  ;;  %4354 = vmatprep.subr.bf16.mxu1 %v4790_v17 }
0x16bd   :  { %v4985_v11 = vpop.eup %4984 }
0x16be   :  { %v3158_v49 = vmul.f32 %v4985_v11, %v6079_v41  ;;  %v3188_v55 = vpack.c.bf16 %v3176_v7, %v3175_v43  ;;  %v3177_v34 = vadd.f32 %v4132_v19, %v3167_v4  ;;  %v4791_v41 = vld [vmem:[%s6319_s10 + $0xb0] sm:$0xff]  }
0x16bf   :  { %4355 = vmatpush3.bf16.msra.mxu1 %v4791_v41 }
0x16c0   :  { %4150 = vmatmul.mubr.msk.bf16.vlgmr.msra.gmra.mrb[84].mxu0 %vm82_vm0, %v3188_v55  ;;  %v3168_v59 = vmul.f32 %v4131_v28, %v3158_v49  ;;  %4356 = vmatprep.subr.bf16.mxu1 %v4792_v52 }
0x16c1   :  { %3291 = vmatprep.mubr.bf16.mxu0 %v5021_v18 }
0x16c2   :  { %v3178_v29 = vadd.f32 %v4132_v19, %v3168_v59 }
0x16c3   :  { %4357 = vmatpush3.bf16.msra.mxu1 %v4793_v45 }
0x16c4   :  { %v3189_v30 = vpack.c.bf16 %v3178_v29, %v3177_v34 }
0x16c8   :  { %4151 = vmatmul.mubr.msk.bf16.gmra.mrb[88].mxu0 %vm82_vm0, %v3189_v30 }
0x16c9   :  { %3678 = vmatprep.mubr.bf16.mxu0 %v5021_v18 }
0x1793   :  { %v3283_v60 = vpop.f32.mrb[84].mxu0 }
0x1794   :  { %v3284_v33 = vadd.f32 %v3283_v60, %v3196_v23  ;;  %v3285_v22 = vpop.f32.mrb[85].mxu0 }
0x1795   :  { %v3286_v26 = vadd.f32 %v3285_v22, %v3200_v27  ;;  %v3287_v37 = vpop.f32.mrb[86].mxu0 }
0x1796   :  { %v3288_v3 = vadd.f32 %v3287_v37, %v3196_v23  ;;  %v3289_v6 = vpop.f32.mrb[87].mxu0  ;;  %v3302_v62 = vmax.f32 %v3284_v33, 0.0 }
0x1797   :  { %v3290_v42 = vadd.f32 %v3289_v6, %v3200_v27  ;;  %v3303_v20 = vmax.f32 %v3286_v26, 0.0 }
0x1798   :  { %v3304_v32 = vmax.f32 %v3288_v3, 0.0 }
0x1799   :  { %v3305_v56 = vmax.f32 %v3290_v42, 0.0 }
0x179a   :  { %v3343_v31 = vpack.c.bf16 %v3304_v32, %v3302_v62 }
0x179b   :  { %v3344_v48 = vpack.c.bf16 %v3305_v56, %v3303_v20  ;;  %v3293_v40 = vpop.f32.mrb[88].mxu0 }
0x179c   :  { %v3294_v14 = vadd.f32 %v3293_v40, %v3196_v23  ;;  %v3295_v51 = vpop.f32.mrb[89].mxu0  ;;  %v4799_v40 = vld [vmem:[%s6323_s14 + $0x14] ss:$8 sps:$4 sm:$0xff]  }
0x179d   :  { %v3296_v0 = vadd.f32 %v3295_v51, %v3200_v27  ;;  %v3297_v58 = vpop.f32.mrb[90].mxu0  ;;  %3483 = vmatprep.mubr.bf16.mxu1 %v3344_v48  ;;  %v4794_v48 = vld [vmem:[%s6323_s14] ss:$8 sps:$4 sm:$0xff]   ;;  %v4802_v51 = vld [vmem:[%s6323_s14 + $0x24] ss:$8 sps:$4 sm:$0xff]  }
0x179e   :  { %v3298_v9 = vadd.f32 %v3297_v58, %v3196_v23  ;;  %v3299_v61 = vpop.f32.mrb[91].mxu0  ;;  %3484 = vmatmul.mubr.bf16.vlgmr.msra.gmra.mrb[84].mxu1 %v3343_v31  ;;  %v3306_v54 = vmax.f32 %v3294_v14, 0.0  ;;  %v4796_v31 = vld [vmem:[%s6323_s14 + $0x4] ss:$8 sps:$4 sm:$0xff]   ;;  %v4797_v14 = vld [vmem:[%s6323_s14 + $0x10] ss:$8 sps:$4 sm:$0xff]  }
0x179f   :  { %v3300_v12 = vadd.f32 %v3299_v61, %v3200_v27  ;;  %v3307_v53 = vmax.f32 %v3296_v0, 0.0  ;;  %3646 = vmatprep.subr.bf16.mxu0 %v4796_v31  ;;  %v4800_v0 = vld [vmem:[%s6323_s14 + $0x20] ss:$8 sps:$4 sm:$0xff]   ;;  %v4805_v58 = vld [vmem:[%s6323_s14 + $0x34] ss:$8 sps:$4 sm:$0xff]  }
0x17a0   :  { %v3308_v21 = vmax.f32 %v3298_v9, 0.0  ;;  %3647 = vmatpush1.bf16.msra.mxu0 %v4794_v48  ;;  %v4803_v9 = vld [vmem:[%s6323_s14 + $0x30] ss:$8 sps:$4 sm:$0xff]   ;;  %v4806_v61 = vld [vmem:[%s6325_s16 + $0x40] sm:$0xff]  }
0x17a1   :  { %v3309_v50 = vmax.f32 %v3300_v12, 0.0  ;;  %3648 = vmatprep.subr.bf16.mxu0 %v4799_v40 }
0x17a2   :  { %v3345_v13 = vpack.c.bf16 %v3308_v21, %v3306_v54 }
0x17a3   :  { %v3346_v8 = vpack.c.bf16 %v3309_v50, %v3307_v53 }
0x17a4   :  { %3649 = vmatpush1.bf16.msra.mxu0 %v4797_v14 }
0x17a5   :  { %3491 = vmatprep.mubr.bf16.mxu1 %v3346_v8  ;;  %3650 = vmatprep.subr.bf16.mxu0 %v4802_v51 }
0x17a6   :  { %3492 = vmatmul.mubr.bf16.gmra.mrb[88].mxu1 %v3345_v13 }
0x17a8   :  { %3651 = vmatpush1.bf16.msra.mxu0 %v4800_v0 }
0x17a9   :  { %3652 = vmatprep.subr.bf16.mxu0 %v4805_v58 }
0x17ac   :  { %3653 = vmatpush1.bf16.msra.mxu0 %v4803_v9 }
0x17ad   :  { %4370 = vmatprep.subr.bf16.mxu0 %v4806_v61 }
0x1871   :  { %v4358_v57 = vpop.f32.mrb[84].mxu1 }
0x1872   :  { %v4359_v28 = vpop.f32.mrb[85].mxu1 }
0x1873   :  { %v4360_v5 = vadd.f32 %v4359_v28, %v4358_v57  ;;  %v4361_v39 = vpop.f32.mrb[86].mxu1 }
0x1874   :  { %v4362_v10 = vpop.f32.mrb[87].mxu1 }
0x1875   :  { %v3486_v16 = vadd.f32 %v4360_v5, %v4185_v35  ;;  %v4363_v36 = vadd.f32 %v4362_v10, %v4361_v39 }
0x1877   :  { %v3489_v19 = vadd.f32 %v4363_v36, %v4185_v35  ;;  %v3500_v47 = vadd.f32 %v3486_v16, %v6042_v63  ;;  %v4202_v16 = vld [vmem:[%s6321_s12] ss:$0 sm:$0xff] }
0x1879   :  { %v4364_v38 = vpop.f32.mrb[88].mxu1  ;;  %v3506_v43 = vsel %vm82_vm0, %v3500_v47, 0.0  ;;  %v3501_v7 = vadd.f32 %v3489_v19, %v6048_v46 }
0x187a   :  { %3507 = vadd.xlane.f32.xlu0 %v3506_v43  ;;  %v4365_v11 = vpop.f32.mrb[89].mxu1  ;;  %v4203_v43 = vld [vmem:[%s6322_s13] ss:$0 sm:$0xff] }
0x187b   :  { %v4366_v49 = vadd.f32 %v4365_v11, %v4364_v38  ;;  %v4367_v55 = vpop.f32.mrb[90].mxu1  ;;  %v3509_v4 = vsel %vm82_vm0, %v3501_v7, 0.0 }
0x187c   :  { %3510 = vadd.xlane.f32.xlu1 %v3509_v4  ;;  %v4368_v59 = vpop.f32.mrb[91].mxu1  ;;  %v4807_v4 = vld [vmem:[%s6325_s16] sm:$0xff]  }
0x187d   :  { %v3494_v29 = vadd.f32 %v4366_v49, %v4185_v35  ;;  %v4369_v34 = vadd.f32 %v4368_v59, %v4367_v55 }
0x187f   :  { %v3497_v30 = vadd.f32 %v4369_v34, %v4185_v35  ;;  %v3502_v2 = vadd.f32 %v3494_v29, %v6045_v44  ;;  %v4808_v34 = vld [vmem:[%s6325_s16 + $0x48] sm:$0xff]  }
0x1881   :  { %v3512_v63 = vsel %vm82_vm0, %v3502_v2, 0.0  ;;  %v3503_v17 = vadd.f32 %v3497_v30, %v6055_v1 }
0x1882   :  { %3513 = vadd.xlane.f32.xlu0 %v3512_v63 }
0x1883   :  { %v3515_v46 = vsel %vm82_vm0, %v3503_v17, 0.0 }
0x1884   :  { %3516 = vadd.xlane.f32.xlu1 %v3515_v46 }
0x1907   :  { %v3508_v41 = vpop.xlane.xlu0 %3507 }
0x1908   :  { %v3518_v52 = vmul.f32 0.015625, %v3508_v41  ;;  %v4810_v41 = vld [vmem:[%s6325_s16 + $0x50] sm:$0xff]  }
0x1909   :  { %v3511_v45 = vpop.xlane.xlu1 %3510 }
0x190a   :  { %v3522_v24 = vsub.f32 %v3500_v47, %v3518_v52  ;;  %v3519_v23 = vmul.f32 0.015625, %v3511_v45 }
0x190c   :  { %v3523_v27 = vsub.f32 %v3501_v7, %v3519_v23  ;;  %v3526_v60 = vmul.f32 %v3522_v24, %v3522_v24 }
0x190e   :  { %v3530_v33 = vsel %vm82_vm0, %v3526_v60, 0.0  ;;  %v3527_v22 = vmul.f32 %v3523_v27, %v3523_v27  ;;  %v4814_v60 = vld [vmem:[%s6325_s16 + $0x60] sm:$0xff]  }
0x190f   :  { %3531 = vadd.xlane.f32.xlu0 %v3530_v33  ;;  %v3514_v44 = vpop.xlane.xlu0 %3513  ;;  %v4815_v33 = vld [vmem:[%s6325_s16 + $0x20] sm:$0xff]  }
0x1910   :  { %v3520_v26 = vmul.f32 0.015625, %v3514_v44  ;;  %v3533_v37 = vsel %vm82_vm0, %v3527_v22, 0.0  ;;  %v4816_v22 = vld [vmem:[%s6325_s16 + $0x68] sm:$0xff]  }
0x1911   :  { %3534 = vadd.xlane.f32.xlu1 %v3533_v37  ;;  %v3517_v1 = vpop.xlane.xlu1 %3516  ;;  %v4817_v44 = vld [vmem:[%s6325_s16 + $0x28] sm:$0xff]   ;;  %v4819_v37 = vld [vmem:[%s6325_s16 + $0x30] sm:$0xff]  }
0x1912   :  { %v3524_v3 = vsub.f32 %v3502_v2, %v3520_v26  ;;  %v3521_v6 = vmul.f32 0.015625, %v3517_v1  ;;  %v4818_v26 = vld [vmem:[%s6325_s16 + $0x70] sm:$0xff]   ;;  %v4820_v1 = vld [vmem:[%s6325_s16 + $0x78] sm:$0xff]  }
0x1914   :  { %v3525_v42 = vsub.f32 %v3503_v17, %v3521_v6  ;;  %v3528_v62 = vmul.f32 %v3524_v3, %v3524_v3  ;;  %v4809_v17 = vld [vmem:[%s6325_s16 + $0x8] sm:$0xff]   ;;  %v3588_v6 = vld [vmem:[%s6324_s15] sm:$0x3] }
0x1916   :  { %v3536_v32 = vsel %vm82_vm0, %v3528_v62, 0.0  ;;  %v3529_v20 = vmul.f32 %v3525_v42, %v3525_v42  ;;  %v3597_v62 = vrot.slane %v3588_v6, %v5655_v25 }
0x1917   :  { %3537 = vadd.xlane.f32.xlu0 %v3536_v32 }
0x1918   :  { %v3539_v56 = vsel %vm82_vm0, %v3529_v20, 0.0 }
0x1919   :  { %3540 = vadd.xlane.f32.xlu1 %v3539_v56 }
0x199c   :  { %v3532_v12 = vpop.xlane.xlu0 %3531 }
0x199d   :  { %v3542_v54 = vmul.f32 0.015625, %v3532_v12 }
0x199e   :  { %v3535_v21 = vpop.xlane.xlu1 %3534 }
0x199f   :  { %v3546_v53 = vadd.f32 1e-05, %v3542_v54  ;;  %v3543_v50 = vmul.f32 0.015625, %v3535_v21 }
0x19a1   :  { %4986 = vrsqrt.f32 %v3546_v53  ;;  %v3547_v13 = vadd.f32 1e-05, %v3543_v50 }
0x19a3   :  { %4988 = vrsqrt.f32 %v3547_v13 }
0x19a4   :  { %v3538_v8 = vpop.xlane.xlu0 %3537 }
0x19a5   :  { %v3544_v57 = vmul.f32 0.015625, %v3538_v8 }
0x19a6   :  { %v3541_v35 = vpop.xlane.xlu1 %3540 }
0x19a7   :  { %v3548_v28 = vadd.f32 1e-05, %v3544_v57  ;;  %v3545_v5 = vmul.f32 0.015625, %v3541_v35 }
0x19a9   :  { %4990 = vrsqrt.f32 %v3548_v28  ;;  %v3549_v39 = vadd.f32 1e-05, %v3545_v5 }
0x19ab   :  { %v4987_v10 = vpop.eup %4986  ;;  %4992 = vrsqrt.f32 %v3549_v39 }
0x19ac   :  { %v3554_v36 = vmul.f32 %v4987_v10, %v3522_v24  ;;  %v4811_v24 = vld [vmem:[%s6325_s16 + $0x10] sm:$0xff]  }
0x19ad   :  { %v4989_v19 = vpop.eup %4988 }
0x19ae   :  { %v3564_v47 = vmul.f32 %v4202_v16, %v3554_v36  ;;  %v3555_v38 = vmul.f32 %v4989_v19, %v3523_v27  ;;  %v4813_v27 = vld [vmem:[%s6325_s16 + $0x18] sm:$0xff]   ;;  %v4822_v36 = vld [vmem:[%s6327_s18] sm:$0xff]   ;;  %v4823_v19 = vld [vmem:[%s6327_s18 + $0x8] sm:$0xff]  }
0x19af   :  { %4620 = vmatprep.subr.bf16.mxu1 %v4822_v36 }
0x19b0   :  { %v3565_v7 = vmul.f32 %v4202_v16, %v3555_v38  ;;  %v3574_v11 = vadd.f32 %v4203_v43, %v3564_v47  ;;  %4621 = vmatpush3.bf16.msra.mxu1 %v4822_v36  ;;  %v4824_v47 = vld [vmem:[%s6327_s18 + $0x10] sm:$0xff]   ;;  %v4825_v38 = vld [vmem:[%s6327_s18 + $0x18] sm:$0xff]  }
0x19b1   :  { %4622 = vmatprep.subr.bf16.mxu1 %v4823_v19 }
0x19b2   :  { %v3575_v49 = vadd.f32 %v4203_v43, %v3565_v7 }
0x19b3   :  { %v4991_v55 = vpop.eup %4990 }
0x19b4   :  { %v3556_v59 = vmul.f32 %v4991_v55, %v3524_v3  ;;  %v3586_v29 = vpack.c.bf16 %v3575_v49, %v3574_v11  ;;  %v4821_v3 = vld [vmem:[%s6325_s16 + $0x38] sm:$0xff]   ;;  %4623 = vmatpush3.bf16.msra.mxu1 %v4823_v19  ;;  %v4214_v55 = vld [vmem:[%s6326_s17] ss:$0 sm:$0xff] }
0x19b5   :  { %v4993_v30 = vpop.eup %4992  ;;  %4624 = vmatprep.subr.bf16.mxu1 %v4824_v47 }
0x19b6   :  { %v3557_v2 = vmul.f32 %v4993_v30, %v3525_v42  ;;  %4212 = vmatmul.mubr.msk.bf16.vlgmr.msra.gmra.mrb[92].mxu0 %vm82_vm0, %v3586_v29  ;;  %v3566_v63 = vmul.f32 %v4202_v16, %v3556_v59  ;;  %v3593_v42 = vrot.slane %v3588_v6, %v5649_v15 }
0x19b7   :  { %3688 = vmatprep.mubr.bf16.mxu0 %v5021_v18  ;;  %4371 = vmatpush3.bf16.msra.mxu0 %v4807_v4  ;;  %v4812_v18 = vld [vmem:[%s6325_s16 + $0x58] sm:$0xff]  }
0x19b8   :  { %v3567_v46 = vmul.f32 %v4202_v16, %v3557_v2  ;;  %4372 = vmatprep.subr.bf16.mxu0 %v4808_v34  ;;  %v3576_v52 = vadd.f32 %v4203_v43, %v3566_v63  ;;  %4625 = vmatpush3.bf16.msra.mxu1 %v4824_v47 }
0x19b9   :  { %4626 = vmatprep.subr.bf16.mxu1 %v4825_v38 }
0x19ba   :  { %v3577_v45 = vadd.f32 %v4203_v43, %v3567_v46 }
0x19bb   :  { %4373 = vmatpush3.bf16.msra.mxu0 %v4809_v17 }
0x19bc   :  { %v3587_v23 = vpack.c.bf16 %v3577_v45, %v3576_v52  ;;  %4374 = vmatprep.subr.bf16.mxu0 %v4810_v41  ;;  %4627 = vmatpush3.bf16.msra.mxu1 %v4825_v38 }
0x19be   :  { %4213 = vmatmul.mubr.msk.bf16.gmra.mrb[96].mxu0 %vm82_vm0, %v3587_v23 }
0x19bf   :  { %4375 = vmatpush3.bf16.msra.mxu0 %v4811_v24 }
0x19c0   :  { %4376 = vmatprep.subr.bf16.mxu0 %v4812_v18  ;;  %v4231_v18 = vld [vmem:[%s6328_s19] ss:$0 sm:$0xff] }
0x19c3   :  { %4377 = vmatpush3.bf16.msra.mxu0 %v4813_v27 }
0x19c4   :  { %4378 = vmatprep.subr.bf16.mxu0 %v4814_v60 }
0x19c7   :  { %4379 = vmatpush3.bf16.msra.mxu0 %v4815_v33 }
0x19c8   :  { %4380 = vmatprep.subr.bf16.mxu0 %v4816_v22 }
0x19cb   :  { %4381 = vmatpush3.bf16.msra.mxu0 %v4817_v44 }
0x19cc   :  { %4382 = vmatprep.subr.bf16.mxu0 %v4818_v26 }
0x19cf   :  { %4383 = vmatpush3.bf16.msra.mxu0 %v4819_v37 }
0x19d0   :  { %4384 = vmatprep.subr.bf16.mxu0 %v4820_v1 }
0x19d3   :  { %4385 = vmatpush3.bf16.msra.mxu0 %v4821_v3 }
0x1a89   :  { %v3680_v32 = vpop.f32.mrb[92].mxu0 }
0x1a8a   :  { %v3681_v20 = vadd.f32 %v3680_v32, %v3593_v42  ;;  %v3682_v56 = vpop.f32.mrb[93].mxu0 }
0x1a8b   :  { %v3683_v31 = vadd.f32 %v3682_v56, %v3597_v62  ;;  %v3684_v48 = vpop.f32.mrb[94].mxu0 }
0x1a8c   :  { %v3685_v40 = vadd.f32 %v3684_v48, %v3593_v42  ;;  %v3686_v14 = vpop.f32.mrb[95].mxu0  ;;  %v3699_v0 = vmax.f32 %v3681_v20, 0.0 }
0x1a8d   :  { %v3687_v51 = vadd.f32 %v3686_v14, %v3597_v62  ;;  %v3700_v9 = vmax.f32 %v3683_v31, 0.0 }
0x1a8e   :  { %v3701_v58 = vmax.f32 %v3685_v40, 0.0 }
0x1a8f   :  { %v3702_v61 = vmax.f32 %v3687_v51, 0.0 }
0x1a90   :  { %v3739_v12 = vpack.c.bf16 %v3701_v58, %v3699_v0 }
0x1a91   :  { %v3740_v54 = vpack.c.bf16 %v3702_v61, %v3700_v9  ;;  %v3690_v21 = vpop.f32.mrb[96].mxu0 }
0x1a92   :  { %v3691_v53 = vadd.f32 %v3690_v21, %v3593_v42  ;;  %v3692_v50 = vpop.f32.mrb[97].mxu0 }
0x1a93   :  { %v3693_v15 = vadd.f32 %v3692_v50, %v3597_v62  ;;  %v3694_v13 = vpop.f32.mrb[98].mxu0  ;;  %3878 = vmatprep.mubr.bf16.mxu0 %v3740_v54 }
0x1a94   :  { %v3695_v25 = vadd.f32 %v3694_v13, %v3593_v42  ;;  %v3696_v8 = vpop.f32.mrb[99].mxu0  ;;  %3879 = vmatmul.mubr.bf16.vlgmr.msra.gmra.mrb[100].mxu0 %v3739_v12  ;;  %v3703_v35 = vmax.f32 %v3691_v53, 0.0 }
0x1a95   :  { %v3697_v57 = vadd.f32 %v3696_v8, %v3597_v62  ;;  %v3704_v5 = vmax.f32 %v3693_v15, 0.0 }
0x1a96   :  { %v3705_v28 = vmax.f32 %v3695_v25, 0.0 }
0x1a97   :  { %v3706_v39 = vmax.f32 %v3697_v57, 0.0 }
0x1a98   :  { %v3741_v10 = vpack.c.bf16 %v3705_v28, %v3703_v35 }
0x1a99   :  { %v3742_v16 = vpack.c.bf16 %v3706_v39, %v3704_v5 }
0x1a9b   :  { %3886 = vmatprep.mubr.bf16.mxu0 %v3742_v16 }
0x1a9c   :  { %3887 = vmatmul.mubr.bf16.gmra.mrb[104].mxu0 %v3741_v10 }
0x1b67   :  { %v4386_v43 = vpop.f32.mrb[100].mxu0 }
0x1b68   :  { %v4387_v7 = vpop.f32.mrb[101].mxu0 }
0x1b69   :  { %v4388_v11 = vadd.f32 %v4387_v7, %v4386_v43  ;;  %v4389_v49 = vpop.f32.mrb[102].mxu0 }
0x1b6a   :  { %v4390_v4 = vpop.f32.mrb[103].mxu0 }
0x1b6b   :  { %v4391_v59 = vadd.f32 %v4390_v4, %v4389_v49  ;;  %v3881_v29 = vadd.f32 %v4388_v11, %v4214_v55 }
0x1b6d   :  { %v3884_v34 = vadd.f32 %v4391_v59, %v4214_v55 }
0x1b6f   :  { %v3903_v30 = vpack.c.bf16 %v3884_v34, %v3881_v29  ;;  %v4392_v2 = vpop.f32.mrb[104].mxu0 }
0x1b70   :  { %v4393_v63 = vpop.f32.mrb[105].mxu0 }
0x1b71   :  { %v4394_v17 = vadd.f32 %v4393_v63, %v4392_v2  ;;  %v4395_v46 = vpop.f32.mrb[106].mxu0  ;;  %4628 = vmatprep.mubr.msk.bf16.mxu1 %vm82_vm0, %v3903_v30 }
0x1b72   :  { %v4396_v41 = vpop.f32.mrb[107].mxu0 }
0x1b73   :  { %v4397_v52 = vadd.f32 %v4396_v41, %v4395_v46  ;;  %v3889_v45 = vadd.f32 %v4394_v17, %v4214_v55 }
0x1b75   :  { %v3892_v24 = vadd.f32 %v4397_v52, %v4214_v55 }
0x1b77   :  { %v3904_v23 = vpack.c.bf16 %v3892_v24, %v3889_v45 }
0x1b79   :  { %4629 = vmatmul.mubr.msk.bf16.vlgmr.msra.gmra.mrb[92].mxu1 %vm82_vm0, %v3904_v23 }
0x1c4c   :  { %v4630_v27 = vpop.f32.mrb[92].mxu1 }
0x1c4d   :  { %v3985_v60 = vadd.f32 %v4630_v27, %v4231_v18  ;;  %v3976_v33 = vpop.f32.mrb[93].mxu1 }
0x1c4e   :  { %v3977_v22 = vadd.f32 %v4231_v18, %v3976_v33  ;;  %v4631_v44 = vpop.f32.mrb[94].mxu1 }
0x1c4f   :  { %3993 = vst [vmem:[#allocation2 + $0x10] sm:$0xff] %v3985_v60  ;;  %v3988_v26 = vadd.f32 %v4631_v44, %v4231_v18  ;;  %v3979_v37 = vpop.f32.mrb[95].mxu1 }
0x1c50   :  { %3991 = vst [vmem:[#allocation2] sm:$0xff] %v3977_v22  ;;  %v3980_v1 = vadd.f32 %v4231_v18, %v3979_v37 }
0x1c51   :  { %3994 = vst [vmem:[#allocation2 + $0x18] sm:$0xff] %v3988_v26 }
0x1c52   :  { %3992 = vst [vmem:[#allocation2 + $0x8] sm:$0xff] %v3980_v1 }
0x1c53   :  { %5008 = shalt.err (!%p5005_p4)
}
0x1c54   :  { %s5009_s25 = scalar_lea.hbm %s6329_s20, 512 }
0x1c55   :  { %p5010_p5 = scmp.ne.s32.totalorder %s6329_s20, %s5009_s25  ;;  %p5013_p6 = scmp.lt.u32.totalorder %s5009_s25, %s6329_s20 }
0x1c57   :  { %p5015_p7 = pnand %p5013_p6, %p5010_p5 }
0x1c59   :  { %5018 = shalt.err (!%p5015_p7)
}
0x1c5a   :  { %s5033_s9 = smov 128   ;;  %s5034_s10 = smov 8  }
0x1c5b   :  { %4006 = dma.vmem_to_hbm [thread:$0]  %s4001_s24, 512, %s6329_s20, [#allocation3], %s5033_s9, %s5033_s9, %s5034_s10  }
0x1c5c   :  { %5019 = dma.done.wait [#allocation3], 512  }
0x1c5d   :  { %5020 = vsyncadd [#allocation3], 4294966784 }
0x1c5e   :  { %4010 = vsyncpa [#allocation3], 1 }

</bundles_post_ra>
